<compile_context>
chip_gen: v5e
topology: v5e:2x2
jax: 0.10.0
libtpu: 0.0.40
codegen_flags: <defaults>
</compile_context>

<pallas_src>
import math

import jax
import jax.numpy as jnp
from jax.experimental import pallas as pl
from jax.experimental.pallas import tpu as pltpu


def _round_up(v, m):
    return ((v + m - 1) // m) * m


# ---------------------------------------------------------------------------
# Kernel
# ---------------------------------------------------------------------------
def _encoder1_kernel(x_ref, w2_ref, b2_ref, w4_ref, b4_ref, out_ref):
    # fc2: cast the streamed f32 x tile to bf16 *inside* the kernel (avoids an
    # extra HBM pad/cast pass in the wrapper); f32 accumulation on the MXU.
    x = x_ref[...].astype(jnp.bfloat16)
    h = jnp.dot(x, w2_ref[...], preferred_element_type=jnp.float32)
    h = jnp.maximum(h + b2_ref[...], 0.0)
    # fc4: activation re-quantized to bf16 for the second MXU pass (documented
    # inference-precision choice); accumulation stays f32.
    o = jnp.dot(h.astype(jnp.bfloat16), w4_ref[...],
                preferred_element_type=jnp.float32)
    out_ref[...] = (o + b4_ref[...]).astype(out_ref.dtype)


# ---------------------------------------------------------------------------
# pallas_call builder
# ---------------------------------------------------------------------------
def _build_call(b, in_dim, hid_p, out_p, tm, grid_m, x_dtype,
                single_buffer_weights):
    if single_buffer_weights:
        # Constant index_map -> VMEM-resident; a second pipeline buffer would
        # be pure VMEM waste (matters most under v7x's 64 MiB/TC).
        def resident(shape):
            return pl.BlockSpec(shape, lambda i: (0, 0),
                                pipeline_mode=pl.Buffered(1))
    else:
        def resident(shape):
            return pl.BlockSpec(shape, lambda i: (0, 0))

    itemsize = jnp.dtype(x_dtype).itemsize
    # Explicit scoped-VMEM budget: streamed tiles double-buffered, weights
    # (ideally) single-buffered, plus bf16/f32 intermediates; ~50% headroom.
    # Floor at 32 MiB so we never shrink the compiler's default budget.
    x_tile = tm * in_dim * itemsize
    out_tile = tm * out_p * 4
    weight_bytes = (in_dim * hid_p + hid_p * out_p) * 2 + (hid_p + out_p) * 4
    interm = tm * (in_dim * 2 + hid_p * (4 + 2) + out_p * 4)
    need = 2 * (x_tile + out_tile) + 2 * weight_bytes + interm
    vmem_limit = max(int(1.5 * need), 32 * 1024 * 1024)

    flops = 2 * b * (in_dim * hid_p + hid_p * out_p)
    bytes_accessed = b * in_dim * itemsize + weight_bytes + b * out_p * 4

    return pl.pallas_call(
        _encoder1_kernel,
        out_shape=jax.ShapeDtypeStruct((b, out_p), jnp.float32),
        grid_spec=pltpu.PrefetchScalarGridSpec(
            num_scalar_prefetch=0,
            grid=(grid_m,),
            in_specs=[
                pl.BlockSpec((tm, in_dim), lambda i: (i, 0)),   # x streams
                resident((in_dim, hid_p)),                      # w2 resident
                resident((1, hid_p)),                           # b2 resident
                resident((hid_p, out_p)),                       # w4 resident
                resident((1, out_p)),                           # b4 resident
            ],
            out_specs=pl.BlockSpec((tm, out_p), lambda i: (i, 0)),
        ),
        compiler_params=pltpu.CompilerParams(
            # M tiles are independent -> shard across the 2 TCs on v7x.
            dimension_semantics=("parallel",),
            vmem_limit_bytes=vmem_limit),
        cost_estimate=pl.CostEstimate(
            flops=flops, transcendentals=0, bytes_accessed=bytes_accessed),
    )


# ---------------------------------------------------------------------------
# Forward wrapper
# ---------------------------------------------------------------------------
def encoder1_forward(x, prepped, *, tm=512):
    """x: (B, ...) flattened like torch .view(B, -1). Returns f32 (B, out_dim)."""
    b = x.shape[0]
    x2d = x.reshape(b, -1)
    in_dim = prepped["in_dim"]
    assert x2d.shape[1] == in_dim, (x2d.shape, in_dim)

    # Balanced M tiling: cap the tile, then re-balance so there is never a
    # near-empty tail tile; no batch padding is materialized (the ragged tail
    # block's OOB rows are masked by the Pallas pipeline).
    tm = max(8, min(tm, _round_up(b, 8)))
    n_blocks = pl.cdiv(b, tm)
    tm = _round_up(pl.cdiv(b, n_blocks), 8)
    grid_m = pl.cdiv(b, tm)

    args = (x2d, prepped["w2t"], prepped["b2"], prepped["w4t"], prepped["b4"])
    try:
        out = _build_call(b, in_dim, prepped["hid_p"], prepped["out_p"],
                          tm, grid_m, x2d.dtype,
                          single_buffer_weights=True)(*args)
    except Exception:
        # Fallback for Pallas versions without BlockSpec pipeline_mode /
        # Buffered(1): default double-buffered weights (costs VMEM only).
        out = _build_call(b, in_dim, prepped["hid_p"], prepped["out_p"],
                          tm, grid_m, x2d.dtype,
                          single_buffer_weights=False)(*args)

    # Strip the 128-lane output padding (row count is already exact).
    # TODO(synk): skip this slice if the consumer accepts the (b, out_p) slab.
    return out[:, :prepped["out_dim"]]


# ---------------------------------------------------------------------------
# Parameter init (matches Encoder1.__init__) and one-time kernel prep
# ---------------------------------------------------------------------------
def init_encoder1_params(key, input_size, output_size, dtype=jnp.float32):
    """Raw torch-layout params: fc2 (hid,in)+(hid,), fc4 (out,hid)+(out,).
    kaiming_normal_(fan_in) weights, torch-default uniform biases."""
    hidden = int(math.ceil(input_size / 2))
    k_w2, k_b2, k_w4, k_b4 = jax.random.split(key, 4)

    std2 = math.sqrt(2.0 / input_size)   # kaiming_normal_, mode='fan_in', a=0
    std4 = math.sqrt(2.0 / hidden)
    w2 = jax.random.normal(k_w2, (hidden, input_size), dtype) * std2
    w4 = jax.random.normal(k_w4, (output_size, hidden), dtype) * std4

    bnd2 = 1.0 / math.sqrt(input_size)
    bnd4 = 1.0 / math.sqrt(hidden)
    b2 = jax.random.uniform(k_b2, (hidden,), dtype, -bnd2, bnd2)
    b4 = jax.random.uniform(k_b4, (output_size,), dtype, -bnd4, bnd4)
    return w2, b2, w4, b4


def prep_encoder1_params(raw_params):
    """One-time (hoisted) weight prep: transpose for y = x @ W^T + b, cast the
    weights to bf16, and zero-pad hid and out up to multiples of 128 lanes so
    both matmuls are lane-aligned and output stores are unmasked.  Padding is
    numerically exact: extra fc2 columns have zero weight+bias (ReLU(0)=0) and
    the matching fc4 rows are zero."""
    w2, b2, w4, b4 = raw_params
    hid, in_dim = w2.shape
    out_dim = w4.shape[0]
    hid_p = _round_up(hid, 128)
    out_p = _round_up(out_dim, 128)

    w2t = jnp.zeros((in_dim, hid_p), jnp.bfloat16).at[:, :hid].set(
        w2.T.astype(jnp.bfloat16))
    b2p = jnp.zeros((1, hid_p), jnp.float32).at[:, :hid].set(
        b2.astype(jnp.float32).reshape(1, hid))
    w4t = jnp.zeros((hid_p, out_p), jnp.bfloat16).at[:hid, :out_dim].set(
        w4.T.astype(jnp.bfloat16))
    b4p = jnp.zeros((1, out_p), jnp.float32).at[:, :out_dim].set(
        b4.astype(jnp.float32).reshape(1, out_dim))

    return {"w2t": w2t, "b2": b2p, "w4t": w4t, "b4": b4p,
            "in_dim": in_dim, "out_dim": out_dim,
            "hid_p": hid_p, "out_p": out_p}


# ---------------------------------------------------------------------------
if __name__ == "__main__":
    key = jax.random.PRNGKey(0)
    k_x, k_p = jax.random.split(key)

    # Small shapes consistent with the module: NCHW tensor gets flattened.
    B, C, H, W = 2, 4, 16, 16
    input_size = C * H * W                   # 1024
    output_size = 32
    hidden = int(math.ceil(input_size / 2))  # 512

    x = jax.random.normal(k_x, (B, C, H, W), jnp.float32)
    raw_params = init_encoder1_params(k_p, input_size, output_size)
    prepped = prep_encoder1_params(raw_params)   # one-time weight prep

    out = encoder1_forward(x, prepped)
    out = jax.block_until_ready(out)

    # Pure-JAX reference following the SAME bf16-operand / f32-accumulate path.
    w2, b2, w4, b4 = raw_params
    x2d = x.reshape(B, -1)
    h_ref = jnp.maximum(
        jnp.dot(x2d.astype(jnp.bfloat16), w2.T.astype(jnp.bfloat16),
                preferred_element_type=jnp.float32)
        + b2.astype(jnp.float32)[None, :], 0.0)
    ref = (jnp.dot(h_ref.astype(jnp.bfloat16), w4.T.astype(jnp.bfloat16),
                   preferred_element_type=jnp.float32)
           + b4.astype(jnp.float32)[None, :])

    assert out.shape == (B, output_size), out.shape
    assert out.dtype == jnp.float32
    assert jnp.allclose(out, ref, atol=1e-2, rtol=1e-2), "mismatch vs reference"

    print("KERNEL_OK")
</pallas_src>

<mosaic_0001>
module attributes {stable_mosaic.version = 11 : i64} {
  func.func @_encoder1_kernel(%arg0: i32, %arg1: memref<8x1024xf32, #tpu.memory_space<vmem>>, %arg2: memref<1024x512xbf16, #tpu.memory_space<vmem>>, %arg3: memref<1x512xf32, #tpu.memory_space<vmem>>, %arg4: memref<512x128xbf16, #tpu.memory_space<vmem>>, %arg5: memref<1x128xf32, #tpu.memory_space<vmem>>, %arg6: memref<8x128xf32, #tpu.memory_space<vmem>>) attributes {dimension_semantics = [#tpu.dimension_semantics<parallel>], iteration_bounds = array<i64: 1>, scalar_prefetch = 0 : i64, scratch_operands = 0 : i64, tpu.core_type = #tpu.core_type<tc>, window_params = [{transform_indices = @transform_0, window_bounds = array<i64: 8, 1024>}, {pipeline_mode = #tpu.pipeline_mode<synchronous>, transform_indices = @transform_1, window_bounds = array<i64: 1024, 512>}, {pipeline_mode = #tpu.pipeline_mode<synchronous>, transform_indices = @transform_2, window_bounds = array<i64: 1, 512>}, {pipeline_mode = #tpu.pipeline_mode<synchronous>, transform_indices = @transform_3, window_bounds = array<i64: 512, 128>}, {pipeline_mode = #tpu.pipeline_mode<synchronous>, transform_indices = @transform_4, window_bounds = array<i64: 1, 128>}, {transform_indices = @transform_5, window_bounds = array<i64: 8, 128>}]} {
    %c0 = arith.constant 0 : index
    %c0_0 = arith.constant 0 : index
    %0 = vector.load %arg1[%c0, %c0_0] : memref<8x1024xf32, #tpu.memory_space<vmem>>, vector<8x1024xf32>
    %1 = arith.truncf %0 : vector<8x1024xf32> to vector<8x1024xbf16>
    %c0_1 = arith.constant 0 : index
    %c0_2 = arith.constant 0 : index
    %2 = vector.load %arg2[%c0_1, %c0_2] : memref<1024x512xbf16, #tpu.memory_space<vmem>>, vector<1024x512xbf16>
    %cst = arith.constant dense<0.000000e+00> : vector<8x512xf32>
    %3 = tpu.matmul %1, %2, %cst {dimension_numbers = #tpu.dot_dimension_numbers<[1], [0], [0], [1], [0, 0, 1, 1], [], []>} : vector<8x1024xbf16>, vector<1024x512xbf16>, vector<8x512xf32> -> vector<8x512xf32>
    %c0_3 = arith.constant 0 : index
    %c0_4 = arith.constant 0 : index
    %4 = vector.load %arg3[%c0_3, %c0_4] : memref<1x512xf32, #tpu.memory_space<vmem>>, vector<1x512xf32>
    %5 = vector.broadcast %4 : vector<1x512xf32> to vector<8x512xf32>
    %6 = arith.addf %3, %5 : vector<8x512xf32>
    %cst_5 = arith.constant 0.000000e+00 : f32
    %7 = vector.broadcast %cst_5 : f32 to vector<8x512xf32>
    %8 = arith.maximumf %6, %7 : vector<8x512xf32>
    %9 = arith.truncf %8 : vector<8x512xf32> to vector<8x512xbf16>
    %c0_6 = arith.constant 0 : index
    %c0_7 = arith.constant 0 : index
    %10 = vector.load %arg4[%c0_6, %c0_7] : memref<512x128xbf16, #tpu.memory_space<vmem>>, vector<512x128xbf16>
    %cst_8 = arith.constant dense<0.000000e+00> : vector<8x128xf32>
    %11 = tpu.matmul %9, %10, %cst_8 {dimension_numbers = #tpu.dot_dimension_numbers<[1], [0], [0], [1], [0, 0, 1, 1], [], []>} : vector<8x512xbf16>, vector<512x128xbf16>, vector<8x128xf32> -> vector<8x128xf32>
    %c0_9 = arith.constant 0 : index
    %c0_10 = arith.constant 0 : index
    %12 = vector.load %arg5[%c0_9, %c0_10] : memref<1x128xf32, #tpu.memory_space<vmem>>, vector<1x128xf32>
    %13 = vector.broadcast %12 : vector<1x128xf32> to vector<8x128xf32>
    %14 = arith.addf %11, %13 : vector<8x128xf32>
    %c0_11 = arith.constant 0 : index
    %c0_12 = arith.constant 0 : index
    %15 = vector.load %arg6[%c0_11, %c0_12] : memref<8x128xf32, #tpu.memory_space<vmem>>, vector<8x128xf32>
    tpu.vector_store %arg6[%c0_11, %c0_12], %14 {strides = array<i32>} : memref<8x128xf32, #tpu.memory_space<vmem>>, vector<8x128xf32>,
    return
  }
  func.func @transform_0(%arg0: i32) -> (i32, i32) {
    %c0_i32 = arith.constant 0 : i32
    %c0_i32_0 = arith.constant 0 : i32
    return %arg0, %c0_i32 : i32, i32
  }
  func.func @transform_1(%arg0: i32) -> (i32, i32) {
    %c0_i32 = arith.constant 0 : i32
    %c0_i32_0 = arith.constant 0 : i32
    %c0_i32_1 = arith.constant 0 : i32
    return %c0_i32, %c0_i32_0 : i32, i32
  }
  func.func @transform_2(%arg0: i32) -> (i32, i32) {
    %c0_i32 = arith.constant 0 : i32
    %c0_i32_0 = arith.constant 0 : i32
    %c0_i32_1 = arith.constant 0 : i32
    return %c0_i32, %c0_i32_0 : i32, i32
  }
  func.func @transform_3(%arg0: i32) -> (i32, i32) {
    %c0_i32 = arith.constant 0 : i32
    %c0_i32_0 = arith.constant 0 : i32
    %c0_i32_1 = arith.constant 0 : i32
    return %c0_i32, %c0_i32_0 : i32, i32
  }
  func.func @transform_4(%arg0: i32) -> (i32, i32) {
    %c0_i32 = arith.constant 0 : i32
    %c0_i32_0 = arith.constant 0 : i32
    %c0_i32_1 = arith.constant 0 : i32
    return %c0_i32, %c0_i32_0 : i32, i32
  }
  func.func @transform_5(%arg0: i32) -> (i32, i32) {
    %c0_i32 = arith.constant 0 : i32
    %c0_i32_0 = arith.constant 0 : i32
    return %arg0, %c0_i32 : i32, i32
  }
}

module attributes {stable_mosaic.version = 11 : i64} {
  func.func @_encoder1_kernel(%arg0: i32, %arg1: memref<8x1024xf32, #tpu.memory_space<vmem>>, %arg2: memref<1024x512xbf16, #tpu.memory_space<vmem>>, %arg3: memref<1x512xf32, #tpu.memory_space<vmem>>, %arg4: memref<512x128xbf16, #tpu.memory_space<vmem>>, %arg5: memref<1x128xf32, #tpu.memory_space<vmem>>, %arg6: memref<8x128xf32, #tpu.memory_space<vmem>>) attributes {dimension_semantics = [#tpu.dimension_semantics<parallel>], iteration_bounds = array<i64: 1>, scalar_prefetch = 0 : i64, scratch_operands = 0 : i64, tpu.core_type = #tpu.core_type<tc>, window_params = [{transform_indices = @transform_0, window_bounds = array<i64: 8, 1024>}, {pipeline_mode = #tpu.pipeline_mode<synchronous>, transform_indices = @transform_1, window_bounds = array<i64: 1024, 512>}, {pipeline_mode = #tpu.pipeline_mode<synchronous>, transform_indices = @transform_2, window_bounds = array<i64: 1, 512>}, {pipeline_mode = #tpu.pipeline_mode<synchronous>, transform_indices = @transform_3, window_bounds = array<i64: 512, 128>}, {pipeline_mode = #tpu.pipeline_mode<synchronous>, transform_indices = @transform_4, window_bounds = array<i64: 1, 128>}, {transform_indices = @transform_5, window_bounds = array<i64: 8, 128>}]} {
    %c0 = arith.constant 0 : index
    %c0_0 = arith.constant 0 : index
    %0 = vector.load %arg1[%c0, %c0_0] : memref<8x1024xf32, #tpu.memory_space<vmem>>, vector<8x1024xf32>
    %1 = arith.truncf %0 : vector<8x1024xf32> to vector<8x1024xbf16>
    %c0_1 = arith.constant 0 : index
    %c0_2 = arith.constant 0 : index
    %2 = vector.load %arg2[%c0_1, %c0_2] : memref<1024x512xbf16, #tpu.memory_space<vmem>>, vector<1024x512xbf16>
    %cst = arith.constant dense<0.000000e+00> : vector<8x512xf32>
    %3 = tpu.matmul %1, %2, %cst {dimension_numbers = #tpu.dot_dimension_numbers<[1], [0], [0], [1], [0, 0, 1, 1], [], []>} : vector<8x1024xbf16>, vector<1024x512xbf16>, vector<8x512xf32> -> vector<8x512xf32>
    %c0_3 = arith.constant 0 : index
    %c0_4 = arith.constant 0 : index
    %4 = vector.load %arg3[%c0_3, %c0_4] : memref<1x512xf32, #tpu.memory_space<vmem>>, vector<1x512xf32>
    %5 = vector.broadcast %4 : vector<1x512xf32> to vector<8x512xf32>
    %6 = arith.addf %3, %5 : vector<8x512xf32>
    %cst_5 = arith.constant 0.000000e+00 : f32
    %7 = vector.broadcast %cst_5 : f32 to vector<8x512xf32>
    %8 = arith.maximumf %6, %7 : vector<8x512xf32>
    %9 = arith.truncf %8 : vector<8x512xf32> to vector<8x512xbf16>
    %c0_6 = arith.constant 0 : index
    %c0_7 = arith.constant 0 : index
    %10 = vector.load %arg4[%c0_6, %c0_7] : memref<512x128xbf16, #tpu.memory_space<vmem>>, vector<512x128xbf16>
    %cst_8 = arith.constant dense<0.000000e+00> : vector<8x128xf32>
    %11 = tpu.matmul %9, %10, %cst_8 {dimension_numbers = #tpu.dot_dimension_numbers<[1], [0], [0], [1], [0, 0, 1, 1], [], []>} : vector<8x512xbf16>, vector<512x128xbf16>, vector<8x128xf32> -> vector<8x128xf32>
    %c0_9 = arith.constant 0 : index
    %c0_10 = arith.constant 0 : index
    %12 = vector.load %arg5[%c0_9, %c0_10] : memref<1x128xf32, #tpu.memory_space<vmem>>, vector<1x128xf32>
    %13 = vector.broadcast %12 : vector<1x128xf32> to vector<8x128xf32>
    %14 = arith.addf %11, %13 : vector<8x128xf32>
    %c0_11 = arith.constant 0 : index
    %c0_12 = arith.constant 0 : index
    %15 = vector.load %arg6[%c0_11, %c0_12] : memref<8x128xf32, #tpu.memory_space<vmem>>, vector<8x128xf32>
    tpu.vector_store %arg6[%c0_11, %c0_12], %14 {strides = array<i32>} : memref<8x128xf32, #tpu.memory_space<vmem>>, vector<8x128xf32>,
    return
  }
  func.func @transform_0(%arg0: i32) -> (i32, i32) {
    %c0_i32 = arith.constant 0 : i32
    %c0_i32_0 = arith.constant 0 : i32
    return %arg0, %c0_i32 : i32, i32
  }
  func.func @transform_1(%arg0: i32) -> (i32, i32) {
    %c0_i32 = arith.constant 0 : i32
    %c0_i32_0 = arith.constant 0 : i32
    %c0_i32_1 = arith.constant 0 : i32
    return %c0_i32, %c0_i32_0 : i32, i32
  }
  func.func @transform_2(%arg0: i32) -> (i32, i32) {
    %c0_i32 = arith.constant 0 : i32
    %c0_i32_0 = arith.constant 0 : i32
    %c0_i32_1 = arith.constant 0 : i32
    return %c0_i32, %c0_i32_0 : i32, i32
  }
  func.func @transform_3(%arg0: i32) -> (i32, i32) {
    %c0_i32 = arith.constant 0 : i32
    %c0_i32_0 = arith.constant 0 : i32
    %c0_i32_1 = arith.constant 0 : i32
    return %c0_i32, %c0_i32_0 : i32, i32
  }
  func.func @transform_4(%arg0: i32) -> (i32, i32) {
    %c0_i32 = arith.constant 0 : i32
    %c0_i32_0 = arith.constant 0 : i32
    %c0_i32_1 = arith.constant 0 : i32
    return %c0_i32, %c0_i32_0 : i32, i32
  }
  func.func @transform_5(%arg0: i32) -> (i32, i32) {
    %c0_i32 = arith.constant 0 : i32
    %c0_i32_0 = arith.constant 0 : i32
    return %arg0, %c0_i32 : i32, i32
  }
}

</mosaic_0001>

<bundles_post_ra>
// kernel: tpu_custom_call.1
= control target key start
LH: loop header
LB: loop body
LE: loop exit
PB: predicated region body
PF: predicated region fallthrough
CT: control target
= control target key end

     0   :  { %10 = vsyncpa [#allocation3], 0  ;;  %s4149_s0 = inlined_call_operand.hbm [shape: f32[2,1024], index: 0, kind: input, shape index: {}]   ;;  %s4150_s1 = inlined_call_operand.hbm [shape: bf16[1024,512], index: 1, kind: input, shape index: {}]   ;;  %s4151_s2 = inlined_call_operand.hbm [shape: f32[1,512], index: 2, kind: input, shape index: {}]   ;;  %s4152_s3 = inlined_call_operand.hbm [shape: bf16[512,128], index: 3, kind: input, shape index: {}]   ;;  %s4153_s4 = inlined_call_operand.vmem [shape: f32[1,128], index: 4, kind: input, shape index: {}]   ;;  %s4154_s5 = inlined_call_operand.hbm [shape: f32[2,128], index: 5, kind: output, shape index: {}]  }
   0x1   :  { %11 = vsyncpa [#allocation6], 0 }
   0x2   :  { %12 = vsyncpa [#allocation9], 0 }
   0x3   :  { %13 = vsyncpa [#allocation4], 0 }
   0x4   :  { %17 = vsyncadd [#allocation3], 768  ;;  %s31_s20 = sshll.u32 %s4150_s1, 4  ;;  %s4021_s21 = smov [#allocation5]   ;;  %s32_s20 = int_to_ptr.hbm [resolvable:$true] %s31_s20 }
   0x5   :  { %s33_s22 = sshll.u32 %s4021_s21, 4  ;;  %s18_s25 = sshll.u32 %s4149_s0, 4  ;;  %s34_s22 = int_to_ptr.vmem [resolvable:$true] %s33_s22  ;;  %s19_s25 = int_to_ptr.hbm [resolvable:$true] %s18_s25 }
   0x6   :  { %s4022_s26 = smov 256   ;;  %s4023_s27 = smov 16  }
   0x7   :  { %39 = dma.hbm_to_vmem [thread:$0]  %s32_s20, 32768, %s34_s22, [#allocation6], %s4022_s26, %s4022_s26, %s4023_s27  }
   0x8   :  { %s4024_s28 = smov [#allocation2]   ;;  %s45_s7 = sshll.u32 %s4151_s2, 4  ;;  %s46_s7 = int_to_ptr.hbm [resolvable:$true] %s45_s7 }
   0x9   :  { %s20_s29 = sshll.u32 %s4024_s28, 4  ;;  %s55_s9 = sshll.u32 %s4152_s3, 4  ;;  %s21_s29 = int_to_ptr.vmem [resolvable:$true] %s20_s29  ;;  %s56_s9 = int_to_ptr.hbm [resolvable:$true] %s55_s9 }
   0xa   :  { %26 = dma.hbm_to_vmem [thread:$0]  %s19_s25, 256, %s21_s29, [#allocation3], %s4022_s26, %s4022_s26, %s4023_s27  }
   0xb   :  { %s4025_s10 = smov [#allocation7]   ;;  %s4026_s0 = smov [#allocation8]  }
   0xc   :  { %s47_s11 = sshll.u32 %s4025_s10, 4  ;;  %s57_s12 = sshll.u32 %s4026_s0, 4  ;;  %s48_s11 = int_to_ptr.vmem [resolvable:$true] %s47_s11  ;;  %s58_s12 = int_to_ptr.vmem [resolvable:$true] %s57_s12 }
   0xd   :  { %50 = dma.hbm_to_vmem [thread:$0]  %s46_s7, 64, %s48_s11, [#allocation6]  }
   0xe   :  { %s4027_s13 = smov 64   ;;  %s4028_s14 = smov 4  }
   0xf   :  { %63 = dma.hbm_to_vmem [thread:$0]  %s56_s9, 4096, %s58_s12, [#allocation9], %s4027_s13, %s4027_s13, %s4028_s14  }
  0x10   :  { %4013 = dma.done.wait [#allocation3], 1024  }
  0x11   :  { %4014 = vsyncadd [#allocation3], 4294966272 }
  0x12   :  { %4015 = dma.done.wait [#allocation6], 32832  }
  0x13   :  { %4016 = vsyncadd [#allocation6], 4294934464 }
  0x14   :  { %4017 = dma.done.wait [#allocation9], 4096  }
  0x15   :  { %4018 = vsyncadd [#allocation9], 4294963200  ;;  %v2555_v0 = vld [vmem:[#allocation5 + $0xe0] sm:$0xf]  ;;  %v3623_v1 = vld [vmem:[#allocation5 + $0xec] sm:$0xf0] }
  0x16   :  { %v2683_v2 = vld [vmem:[#allocation5 + $0x1e0] sm:$0xf]  ;;  %v2556_v3 = vor.u32 %v3623_v1, %v2555_v0  ;;  %v3655_v4 = vld [vmem:[#allocation5 + $0x1ec] sm:$0xf0] }
  0x17   :  { %v2811_v5 = vld [vmem:[#allocation5 + $0x2e0] sm:$0xf]  ;;  %v3687_v6 = vld [vmem:[#allocation5 + $0x2ec] sm:$0xf0]  ;;  %v2684_v7 = vor.u32 %v3655_v4, %v2683_v2 }
  0x18   :  { %v2812_v8 = vor.u32 %v3687_v6, %v2811_v5  ;;  %v2939_v9 = vld [vmem:[#allocation5 + $0x3e0] sm:$0xf]  ;;  %v3719_v10 = vld [vmem:[#allocation5 + $0x3ec] sm:$0xf0]  ;;  %1683 = vmatpush.bf16.msra.mxu0 %v2556_v3 }
  0x19   :  { %v2539_v11 = vld [vmem:[#allocation5 + $0xc0] sm:$0xf]  ;;  %v2940_v12 = vor.u32 %v3719_v10, %v2939_v9  ;;  %v3619_v13 = vld [vmem:[#allocation5 + $0xcc] sm:$0xf0]  ;;  %1696 = vmatpush.bf16.msra.mxu1 %v2684_v7 }
  0x1a   :  { %v2667_v14 = vld [vmem:[#allocation5 + $0x1c0] sm:$0xf]  ;;  %v3651_v15 = vld [vmem:[#allocation5 + $0x1cc] sm:$0xf0]  ;;  %1709 = vmatpush.bf16.msra.mxu2 %v2812_v8  ;;  %v2540_v16 = vor.u32 %v3619_v13, %v2539_v11 }
  0x1b   :  { %v2668_v17 = vor.u32 %v3651_v15, %v2667_v14  ;;  %v2795_v18 = vld [vmem:[#allocation5 + $0x2c0] sm:$0xf]  ;;  %v3683_v19 = vld [vmem:[#allocation5 + $0x2cc] sm:$0xf0]  ;;  %1722 = vmatpush.bf16.msra.mxu3 %v2940_v12 }
  0x1c   :  { %v2923_v20 = vld [vmem:[#allocation5 + $0x3c0] sm:$0xf]  ;;  %v2796_v21 = vor.u32 %v3683_v19, %v2795_v18  ;;  %v3715_v22 = vld [vmem:[#allocation5 + $0x3cc] sm:$0xf0]  ;;  %1684 = vmatpush.bf16.msra.mxu0 %v2540_v16 }
  0x1d   :  { %v2523_v23 = vld [vmem:[#allocation5 + $0xa0] sm:$0xf]  ;;  %v3615_v24 = vld [vmem:[#allocation5 + $0xac] sm:$0xf0]  ;;  %v2924_v25 = vor.u32 %v3715_v22, %v2923_v20  ;;  %1697 = vmatpush.bf16.msra.mxu1 %v2668_v17 }
  0x1e   :  { %v2651_v26 = vld [vmem:[#allocation5 + $0x1a0] sm:$0xf]  ;;  %v3647_v27 = vld [vmem:[#allocation5 + $0x1ac] sm:$0xf0]  ;;  %v2524_v29 = vor.u32 %v3615_v24, %v2523_v23  ;;  %1710 = vmatpush.bf16.msra.mxu2 %v2796_v21 }
  0x1f   :  { %v2779_v28 = vld [vmem:[#allocation5 + $0x2a0] sm:$0xf]  ;;  %v3679_v30 = vld [vmem:[#allocation5 + $0x2ac] sm:$0xf0]  ;;  %v2652_v33 = vor.u32 %v3647_v27, %v2651_v26  ;;  %1723 = vmatpush.bf16.msra.mxu3 %v2924_v25 }
  0x20   :  { %v2907_v31 = vld [vmem:[#allocation5 + $0x3a0] sm:$0xf]  ;;  %v3711_v32 = vld [vmem:[#allocation5 + $0x3ac] sm:$0xf0]  ;;  %v2780_v34 = vor.u32 %v3679_v30, %v2779_v28  ;;  %1685 = vmatpush.bf16.msra.mxu0 %v2524_v29 }
  0x21   :  { %v2507_v35 = vld [vmem:[#allocation5 + $0x80] sm:$0xf]  ;;  %v3611_v36 = vld [vmem:[#allocation5 + $0x8c] sm:$0xf0]  ;;  %v2908_v38 = vor.u32 %v3711_v32, %v2907_v31  ;;  %1698 = vmatpush.bf16.msra.mxu1 %v2652_v33 }
  0x22   :  { %v2635_v37 = vld [vmem:[#allocation5 + $0x180] sm:$0xf]  ;;  %v3643_v39 = vld [vmem:[#allocation5 + $0x18c] sm:$0xf0]  ;;  %v2508_v44 = vor.u32 %v3611_v36, %v2507_v35  ;;  %1711 = vmatpush.bf16.msra.mxu2 %v2780_v34 }
  0x23   :  { %v2763_v40 = vld [vmem:[#allocation5 + $0x280] sm:$0xf]  ;;  %v3675_v41 = vld [vmem:[#allocation5 + $0x28c] sm:$0xf0]  ;;  %v2636_v45 = vor.u32 %v3643_v39, %v2635_v37  ;;  %1724 = vmatpush.bf16.msra.mxu3 %v2908_v38 }
  0x24   :  { %v2891_v42 = vld [vmem:[#allocation5 + $0x380] sm:$0xf]  ;;  %v3707_v43 = vld [vmem:[#allocation5 + $0x38c] sm:$0xf0]  ;;  %v2764_v46 = vor.u32 %v3675_v41, %v2763_v40  ;;  %1686 = vmatpush.bf16.msra.mxu0 %v2508_v44 }
  0x25   :  { %v2491_v47 = vld [vmem:[#allocation5 + $0x60] sm:$0xf]  ;;  %v3607_v48 = vld [vmem:[#allocation5 + $0x6c] sm:$0xf0]  ;;  %v2892_v50 = vor.u32 %v3707_v43, %v2891_v42  ;;  %1699 = vmatpush.bf16.msra.mxu1 %v2636_v45 }
  0x26   :  { %v2619_v49 = vld [vmem:[#allocation5 + $0x160] sm:$0xf]  ;;  %v3639_v51 = vld [vmem:[#allocation5 + $0x16c] sm:$0xf0]  ;;  %v2492_v56 = vor.u32 %v3607_v48, %v2491_v47  ;;  %1712 = vmatpush.bf16.msra.mxu2 %v2764_v46 }
  0x27   :  { %v2747_v52 = vld [vmem:[#allocation5 + $0x260] sm:$0xf]  ;;  %v3671_v53 = vld [vmem:[#allocation5 + $0x26c] sm:$0xf0]  ;;  %v2620_v57 = vor.u32 %v3639_v51, %v2619_v49  ;;  %1725 = vmatpush.bf16.msra.mxu3 %v2892_v50 }
  0x28   :  { %v2875_v54 = vld [vmem:[#allocation5 + $0x360] sm:$0xf]  ;;  %v3703_v55 = vld [vmem:[#allocation5 + $0x36c] sm:$0xf0]  ;;  %v2748_v58 = vor.u32 %v3671_v53, %v2747_v52  ;;  %1687 = vmatpush.bf16.msra.mxu0 %v2492_v56 }
  0x29   :  { %v2475_v59 = vld [vmem:[#allocation5 + $0x40] sm:$0xf]  ;;  %v3603_v60 = vld [vmem:[#allocation5 + $0x4c] sm:$0xf0]  ;;  %v2876_v62 = vor.u32 %v3703_v55, %v2875_v54  ;;  %1700 = vmatpush.bf16.msra.mxu1 %v2620_v57 }
  0x2a   :  { %v2603_v61 = vld [vmem:[#allocation5 + $0x140] sm:$0xf]  ;;  %v3635_v63 = vld [vmem:[#allocation5 + $0x14c] sm:$0xf0]  ;;  %v2476_v4 = vor.u32 %v3603_v60, %v2475_v59  ;;  %1713 = vmatpush.bf16.msra.mxu2 %v2748_v58 }
  0x2b   :  { %v2731_v0 = vld [vmem:[#allocation5 + $0x240] sm:$0xf]  ;;  %v3667_v1 = vld [vmem:[#allocation5 + $0x24c] sm:$0xf0]  ;;  %v2604_v5 = vor.u32 %v3635_v63, %v2603_v61  ;;  %1726 = vmatpush.bf16.msra.mxu3 %v2876_v62 }
  0x2c   :  { %v2859_v2 = vld [vmem:[#allocation5 + $0x340] sm:$0xf]  ;;  %v3699_v3 = vld [vmem:[#allocation5 + $0x34c] sm:$0xf0]  ;;  %v2732_v6 = vor.u32 %v3667_v1, %v2731_v0  ;;  %1688 = vmatpush.bf16.msra.mxu0 %v2476_v4 }
  0x2d   :  { %v2459_v7 = vld [vmem:[#allocation5 + $0x20] sm:$0xf]  ;;  %v3599_v8 = vld [vmem:[#allocation5 + $0x2c] sm:$0xf0]  ;;  %v2860_v10 = vor.u32 %v3699_v3, %v2859_v2  ;;  %1701 = vmatpush.bf16.msra.mxu1 %v2604_v5 }
  0x2e   :  { %v2587_v9 = vld [vmem:[#allocation5 + $0x120] sm:$0xf]  ;;  %v3631_v11 = vld [vmem:[#allocation5 + $0x12c] sm:$0xf0]  ;;  %v2460_v16 = vor.u32 %v3599_v8, %v2459_v7  ;;  %1714 = vmatpush.bf16.msra.mxu2 %v2732_v6 }
  0x2f   :  { %v2715_v12 = vld [vmem:[#allocation5 + $0x220] sm:$0xf]  ;;  %v3663_v13 = vld [vmem:[#allocation5 + $0x22c] sm:$0xf0]  ;;  %v2588_v19 = vor.u32 %v3631_v11, %v2587_v9  ;;  %1727 = vmatpush.bf16.msra.mxu3 %v2860_v10 }
  0x30   :  { %v2843_v14 = vld [vmem:[#allocation5 + $0x320] sm:$0xf]  ;;  %v3695_v15 = vld [vmem:[#allocation5 + $0x32c] sm:$0xf0]  ;;  %v2716_v20 = vor.u32 %v3663_v13, %v2715_v12  ;;  %1689 = vmatpush.bf16.msra.mxu0 %v2460_v16 }
  0x31   :  { %v2443_v17 = vld [vmem:[#allocation5] sm:$0xf]  ;;  %v3595_v18 = vld [vmem:[#allocation5 + $0xc] sm:$0xf0]  ;;  %v2844_v24 = vor.u32 %v3695_v15, %v2843_v14  ;;  %1702 = vmatpush.bf16.msra.mxu1 %v2588_v19 }
  0x32   :  { %v2571_v21 = vld [vmem:[#allocation5 + $0x100] sm:$0xf]  ;;  %v3627_v22 = vld [vmem:[#allocation5 + $0x10c] sm:$0xf0]  ;;  %v2444_v31 = vor.u32 %v3595_v18, %v2443_v17  ;;  %1715 = vmatpush.bf16.msra.mxu2 %v2716_v20 }
  0x33   :  { %v2699_v23 = vld [vmem:[#allocation5 + $0x200] sm:$0xf]  ;;  %v3659_v25 = vld [vmem:[#allocation5 + $0x20c] sm:$0xf0]  ;;  %v2572_v35 = vor.u32 %v3627_v22, %v2571_v21  ;;  %1728 = vmatpush.bf16.msra.mxu3 %v2844_v24 }
  0x34   :  { %v2827_v26 = vld [vmem:[#allocation5 + $0x300] sm:$0xf]  ;;  %v3691_v27 = vld [vmem:[#allocation5 + $0x30c] sm:$0xf0]  ;;  %v2700_v36 = vor.u32 %v3659_v25, %v2699_v23  ;;  %1690 = vmatpush.bf16.msra.mxu0 %v2444_v31 }
  0x35   :  { %v3067_v28 = vld [vmem:[#allocation5 + $0x4e0] sm:$0xf]  ;;  %v3751_v29 = vld [vmem:[#allocation5 + $0x4ec] sm:$0xf0]  ;;  %v2828_v39 = vor.u32 %v3691_v27, %v2827_v26  ;;  %1703 = vmatpush.bf16.msra.mxu1 %v2572_v35 }
  0x36   :  { %v3195_v30 = vld [vmem:[#allocation5 + $0x5e0] sm:$0xf]  ;;  %v3783_v32 = vld [vmem:[#allocation5 + $0x5ec] sm:$0xf0]  ;;  %v3068_v40 = vor.u32 %v3751_v29, %v3067_v28  ;;  %1716 = vmatpush.bf16.msra.mxu2 %v2700_v36 }
  0x37   :  { %v3323_v33 = vld [vmem:[#allocation5 + $0x6e0] sm:$0xf]  ;;  %v3815_v34 = vld [vmem:[#allocation5 + $0x6ec] sm:$0xf0]  ;;  %v3196_v41 = vor.u32 %v3783_v32, %v3195_v30  ;;  %1729 = vmatpush.bf16.msra.mxu3 %v2828_v39 }
  0x38   :  { %v3451_v37 = vld [vmem:[#allocation5 + $0x7e0] sm:$0xf]  ;;  %v3847_v38 = vld [vmem:[#allocation5 + $0x7ec] sm:$0xf0]  ;;  %v3324_v42 = vor.u32 %v3815_v34, %v3323_v33  ;;  %1735 = vmatpush.bf16.msrb.mxu0 %v3068_v40 }
  0x39   :  { %v3051_v43 = vld [vmem:[#allocation5 + $0x4c0] sm:$0xf]  ;;  %v3747_v44 = vld [vmem:[#allocation5 + $0x4cc] sm:$0xf0]  ;;  %v3452_v46 = vor.u32 %v3847_v38, %v3451_v37  ;;  %1748 = vmatpush.bf16.msrb.mxu1 %v3196_v41 }
  0x3a   :  { %v3179_v45 = vld [vmem:[#allocation5 + $0x5c0] sm:$0xf]  ;;  %v3779_v47 = vld [vmem:[#allocation5 + $0x5cc] sm:$0xf0]  ;;  %v3052_v52 = vor.u32 %v3747_v44, %v3051_v43  ;;  %1761 = vmatpush.bf16.msrb.mxu2 %v3324_v42 }
  0x3b   :  { %v3307_v48 = vld [vmem:[#allocation5 + $0x6c0] sm:$0xf]  ;;  %v3811_v49 = vld [vmem:[#allocation5 + $0x6cc] sm:$0xf0]  ;;  %v3180_v54 = vor.u32 %v3779_v47, %v3179_v45  ;;  %1774 = vmatpush.bf16.msrb.mxu3 %v3452_v46 }
  0x3c   :  { %v3435_v50 = vld [vmem:[#allocation5 + $0x7c0] sm:$0xf]  ;;  %v3843_v51 = vld [vmem:[#allocation5 + $0x7cc] sm:$0xf0]  ;;  %v3308_v55 = vor.u32 %v3811_v49, %v3307_v48  ;;  %1736 = vmatpush.bf16.msrb.mxu0 %v3052_v52 }
  0x3d   :  { %v3035_v53 = vld [vmem:[#allocation5 + $0x4a0] sm:$0xf]  ;;  %v3743_v56 = vld [vmem:[#allocation5 + $0x4ac] sm:$0xf0]  ;;  %v3436_v59 = vor.u32 %v3843_v51, %v3435_v50  ;;  %1749 = vmatpush.bf16.msrb.mxu1 %v3180_v54 }
  0x3e   :  { %v3163_v57 = vld [vmem:[#allocation5 + $0x5a0] sm:$0xf]  ;;  %v3775_v58 = vld [vmem:[#allocation5 + $0x5ac] sm:$0xf0]  ;;  %v3036_v2 = vor.u32 %v3743_v56, %v3035_v53  ;;  %1762 = vmatpush.bf16.msrb.mxu2 %v3308_v55 }
  0x3f   :  { %v3291_v60 = vld [vmem:[#allocation5 + $0x6a0] sm:$0xf]  ;;  %v3807_v61 = vld [vmem:[#allocation5 + $0x6ac] sm:$0xf0]  ;;  %v3164_v6 = vor.u32 %v3775_v58, %v3163_v57  ;;  %1775 = vmatpush.bf16.msrb.mxu3 %v3436_v59 }
  0x40   :  { %v3419_v62 = vld [vmem:[#allocation5 + $0x7a0] sm:$0xf]  ;;  %v3839_v63 = vld [vmem:[#allocation5 + $0x7ac] sm:$0xf0]  ;;  %v3292_v7 = vor.u32 %v3807_v61, %v3291_v60  ;;  %1737 = vmatpush.bf16.msrb.mxu0 %v3036_v2 }
  0x41   :  { %v3019_v0 = vld [vmem:[#allocation5 + $0x480] sm:$0xf]  ;;  %v3739_v1 = vld [vmem:[#allocation5 + $0x48c] sm:$0xf0]  ;;  %v3420_v11 = vor.u32 %v3839_v63, %v3419_v62  ;;  %1750 = vmatpush.bf16.msrb.mxu1 %v3164_v6  ;;  %v83_v62 = vld [vmem:[#allocation2 + $0x8] sm:$0xff] }
  0x42   :  { %v3147_v3 = vld [vmem:[#allocation5 + $0x580] sm:$0xf]  ;;  %v84_v5 = vld [vmem:[#allocation2 + $0x10] sm:$0xff]  ;;  %v3020_v16 = vor.u32 %v3739_v1, %v3019_v0  ;;  %1763 = vmatpush.bf16.msrb.mxu2 %v3292_v7  ;;  %v85_v63 = vld [vmem:[#allocation2 + $0x18] sm:$0xff]  ;;  %106 = vst [vmem:[#allocation1 + $0x20] ss:$4 sm:$0xff] %v83_v62 }
  0x43   :  { %v82_v4 = vld [vmem:[#allocation2] sm:$0xff]  ;;  %v3771_v8 = vld [vmem:[#allocation5 + $0x58c] sm:$0xf0]  ;;  %100 = vst [vmem:[#allocation1 + $0x1] ss:$4 sm:$0xff] %v84_v5  ;;  %1776 = vmatpush.bf16.msrb.mxu3 %v3420_v11  ;;  %v89_v5 = vld [vmem:[#allocation2 + $0x38] sm:$0xff] }
  0x44   :  { %v86_v9 = vld [vmem:[#allocation2 + $0x20] sm:$0xff]  ;;  %v88_v10 = vld [vmem:[#allocation2 + $0x30] sm:$0xff]  ;;  %98 = vst [vmem:[#allocation1] ss:$4 sm:$0xff] %v82_v4  ;;  %v3148_v17 = vor.u32 %v3771_v8, %v3147_v3  ;;  %1738 = vmatpush.bf16.msrb.mxu0 %v3020_v16  ;;  %v87_v4 = vld [vmem:[#allocation2 + $0x28] sm:$0xff] }
  0x45   :  { %v3275_v12 = vld [vmem:[#allocation5 + $0x680] sm:$0xf]  ;;  %v3803_v13 = vld [vmem:[#allocation5 + $0x68c] sm:$0xf0]  ;;  %102 = vst [vmem:[#allocation1 + $0x2] ss:$4 sm:$0xff] %v86_v9 }
  0x46   :  { %v3403_v14 = vld [vmem:[#allocation5 + $0x780] sm:$0xf]  ;;  %v3835_v15 = vld [vmem:[#allocation5 + $0x78c] sm:$0xf0]  ;;  %104 = vst [vmem:[#allocation1 + $0x3] ss:$4 sm:$0xff] %v88_v10  ;;  %v3276_v18 = vor.u32 %v3803_v13, %v3275_v12  ;;  %1751 = vmatpush.bf16.msrb.mxu1 %v3148_v17 }
  0x47   :  { %v3003_v19 = vld [vmem:[#allocation5 + $0x460] sm:$0xf]  ;;  %v3735_v20 = vld [vmem:[#allocation5 + $0x46c] sm:$0xf0]  ;;  %v3404_v22 = vor.u32 %v3835_v15, %v3403_v14  ;;  %108 = vst [vmem:[#allocation1 + $0x21] ss:$4 sm:$0xff] %v85_v63 }
  0x48   :  { %v3131_v21 = vld [vmem:[#allocation5 + $0x560] sm:$0xf]  ;;  %v3767_v23 = vld [vmem:[#allocation5 + $0x56c] sm:$0xf0]  ;;  %v3004_v28 = vor.u32 %v3735_v20, %v3003_v19  ;;  %1764 = vmatpush.bf16.msrb.mxu2 %v3276_v18  ;;  %v3621_v12 = vld [vmem:[#allocation5 + $0xe4] sm:$0xf] }
  0x49   :  { %v3259_v24 = vld [vmem:[#allocation5 + $0x660] sm:$0xf]  ;;  %v3799_v25 = vld [vmem:[#allocation5 + $0x66c] sm:$0xf0]  ;;  %v3132_v31 = vor.u32 %v3767_v23, %v3131_v21  ;;  %1777 = vmatpush.bf16.msrb.mxu3 %v3404_v22  ;;  %110 = vst [vmem:[#allocation1 + $0x22] ss:$4 sm:$0xff] %v87_v4 }
  0x4a   :  { %v3387_v26 = vld [vmem:[#allocation5 + $0x760] sm:$0xf]  ;;  %v3831_v27 = vld [vmem:[#allocation5 + $0x76c] sm:$0xf0]  ;;  %v3260_v32 = vor.u32 %v3799_v25, %v3259_v24  ;;  %1739 = vmatpush.bf16.msrb.mxu0 %v3004_v28  ;;  %v2557_v13 = vld [vmem:[#allocation5 + $0xf0] sm:$0xf0] }
  0x4b   :  { %v2987_v29 = vld [vmem:[#allocation5 + $0x440] sm:$0xf]  ;;  %v3731_v30 = vld [vmem:[#allocation5 + $0x44c] sm:$0xf0]  ;;  %v3388_v36 = vor.u32 %v3831_v27, %v3387_v26  ;;  %1752 = vmatpush.bf16.msrb.mxu1 %v3132_v31  ;;  %v3653_v14 = vld [vmem:[#allocation5 + $0x1e4] sm:$0xf]  ;;  %v2560_v24 = vor.u32 %v3621_v12, %v2557_v13 }
  0x4c   :  { %v3115_v33 = vld [vmem:[#allocation5 + $0x540] sm:$0xf]  ;;  %v3763_v34 = vld [vmem:[#allocation5 + $0x54c] sm:$0xf0]  ;;  %v2988_v44 = vor.u32 %v3731_v30, %v2987_v29  ;;  %1765 = vmatpush.bf16.msrb.mxu2 %v3260_v32  ;;  %112 = vst [vmem:[#allocation1 + $0x23] ss:$4 sm:$0xff] %v89_v5 }
  0x4d   :  { %v3243_v35 = vld [vmem:[#allocation5 + $0x640] sm:$0xf]  ;;  %v3795_v37 = vld [vmem:[#allocation5 + $0x64c] sm:$0xf0]  ;;  %v3116_v45 = vor.u32 %v3763_v34, %v3115_v33  ;;  %1778 = vmatpush.bf16.msrb.mxu3 %v3388_v36  ;;  %v2685_v16 = vld [vmem:[#allocation5 + $0x1f0] sm:$0xf0] }
  0x4e   :  { %v3371_v38 = vld [vmem:[#allocation5 + $0x740] sm:$0xf]  ;;  %v3827_v39 = vld [vmem:[#allocation5 + $0x74c] sm:$0xf0]  ;;  %v3244_v50 = vor.u32 %v3795_v37, %v3243_v35  ;;  %1740 = vmatpush.bf16.msrb.mxu0 %v2988_v44  ;;  %v3685_v17 = vld [vmem:[#allocation5 + $0x2e4] sm:$0xf]  ;;  %v2688_v26 = vor.u32 %v3653_v14, %v2685_v16 }
  0x4f   :  { %v115_v40 = vld.sshfl [vmem:[#allocation1 + $0x10] sm:$0xff pattern:$0x73625140]  ;;  %v113_v41 = vld.sshfl [vmem:[#allocation1] sm:$0xff pattern:$0x73625140]  ;;  %v3372_v56 = vor.u32 %v3827_v39, %v3371_v38  ;;  %1753 = vmatpush.bf16.msrb.mxu1 %v3116_v45 }
  0x50   :  { %v2971_v42 = vld [vmem:[#allocation5 + $0x420] sm:$0xf]  ;;  %v3727_v43 = vld [vmem:[#allocation5 + $0x42c] sm:$0xf0]  ;;  %v4074_v46 = vpack.c.bf16 %v115_v40, %v115_v40  ;;  %v4076_v47 = vpack.c.bf16 %v113_v41, %v113_v41  ;;  %1766 = vmatpush.bf16.msrb.mxu2 %v3244_v50  ;;  %v2813_v18 = vld [vmem:[#allocation5 + $0x2f0] sm:$0xf0] }
  0x51   :  { %v116_v48 = vld.sshfl [vmem:[#allocation1 + $0x18] sm:$0xff pattern:$0x73625140]  ;;  %v114_v49 = vld.sshfl [vmem:[#allocation1 + $0x8] sm:$0xff pattern:$0x73625140]  ;;  %v2972_v0 = vor.u32 %v3727_v43, %v2971_v42  ;;  %1779 = vmatpush.bf16.msrb.mxu3 %v3372_v56  ;;  %v2816_v27 = vor.u32 %v3685_v17, %v2813_v18 }
  0x52   :  { %v4078_v51 = vpack.c.bf16 %v116_v48, %v116_v48  ;;  %v3099_v52 = vld [vmem:[#allocation5 + $0x520] sm:$0xf]  ;;  %v3759_v53 = vld [vmem:[#allocation5 + $0x52c] sm:$0xf0]  ;;  %v4080_v55 = vpack.c.bf16 %v114_v49, %v114_v49  ;;  %1717 = vmatmul.bf16.vlgmr.msra.gmra.mxu2 %v4074_v46  ;;  %1691 = vmatmul.bf16.vlgmr.msra.gmra.mxu0 %v4076_v47  ;;  %v3717_v21 = vld [vmem:[#allocation5 + $0x3e4] sm:$0xf] }
  0x53   :  { %v3227_v54 = vld [vmem:[#allocation5 + $0x620] sm:$0xf]  ;;  %v3791_v57 = vld [vmem:[#allocation5 + $0x62c] sm:$0xf0]  ;;  %v3100_v6 = vor.u32 %v3759_v53, %v3099_v52  ;;  %1741 = vmatpush.bf16.msrb.mxu0 %v2972_v0  ;;  %v2941_v22 = vld [vmem:[#allocation5 + $0x3f0] sm:$0xf0] }
  0x54   :  { %v3355_v58 = vld [vmem:[#allocation5 + $0x720] sm:$0xf]  ;;  %v3823_v59 = vld [vmem:[#allocation5 + $0x72c] sm:$0xf0]  ;;  %1730 = vmatmul.bf16.vlgmr.msra.gmra.mxu3 %v4078_v51  ;;  %1704 = vmatmul.bf16.vlgmr.msra.gmra.mxu1 %v4080_v55  ;;  %v3228_v7 = vor.u32 %v3791_v57, %v3227_v54  ;;  %v3617_v25 = vld [vmem:[#allocation5 + $0xc4] sm:$0xf]  ;;  %v2944_v31 = vor.u32 %v3717_v21, %v2941_v22 }
  0x55   :  { %v2955_v60 = vld [vmem:[#allocation5 + $0x400] sm:$0xf]  ;;  %v3723_v61 = vld [vmem:[#allocation5 + $0x40c] sm:$0xf0]  ;;  %v3356_v10 = vor.u32 %v3823_v59, %v3355_v58  ;;  %1754 = vmatpush.bf16.msrb.mxu1 %v3100_v6  ;;  %v2541_v28 = vld [vmem:[#allocation5 + $0xd0] sm:$0xf0] }
  0x56   :  { %v3083_v1 = vld [vmem:[#allocation5 + $0x500] sm:$0xf]  ;;  %v3755_v2 = vld [vmem:[#allocation5 + $0x50c] sm:$0xf0]  ;;  %v2956_v15 = vor.u32 %v3723_v61, %v2955_v60  ;;  %1767 = vmatpush.bf16.msrb.mxu2 %v3228_v7  ;;  %v3649_v29 = vld [vmem:[#allocation5 + $0x1c4] sm:$0xf]  ;;  %v2544_v38 = vor.u32 %v3617_v25, %v2541_v28 }
  0x57   :  { %v3211_v3 = vld [vmem:[#allocation5 + $0x600] sm:$0xf]  ;;  %v3787_v8 = vld [vmem:[#allocation5 + $0x60c] sm:$0xf0]  ;;  %v3084_v19 = vor.u32 %v3755_v2, %v3083_v1  ;;  %1780 = vmatpush.bf16.msrb.mxu3 %v3356_v10  ;;  %v2669_v30 = vld [vmem:[#allocation5 + $0x1d0] sm:$0xf0] }
  0x58   :  { %v3339_v9 = vld [vmem:[#allocation5 + $0x700] sm:$0xf]  ;;  %v3819_v11 = vld [vmem:[#allocation5 + $0x70c] sm:$0xf0]  ;;  %v3212_v20 = vor.u32 %v3787_v8, %v3211_v3  ;;  %1742 = vmatpush.bf16.msrb.mxu0 %v2956_v15  ;;  %v3681_v32 = vld [vmem:[#allocation5 + $0x2c4] sm:$0xf]  ;;  %v2672_v42 = vor.u32 %v3649_v29, %v2669_v30 }
  0x59   :  { %v3340_v23 = vor.u32 %v3819_v11, %v3339_v9  ;;  %v2797_v33 = vld [vmem:[#allocation5 + $0x2d0] sm:$0xf0]  ;;  %v3713_v34 = vld [vmem:[#allocation5 + $0x3c4] sm:$0xf]  ;;  %1755 = vmatpush.bf16.msrb.mxu1 %v3084_v19 }
  0x5a   :  { %1768 = vmatpush.bf16.msrb.mxu2 %v3212_v20  ;;  %v2925_v35 = vld [vmem:[#allocation5 + $0x3d0] sm:$0xf0]  ;;  %v3613_v36 = vld [vmem:[#allocation5 + $0xa4] sm:$0xf]  ;;  %v2800_v43 = vor.u32 %v3681_v32, %v2797_v33 }
  0x5b   :  { %v2525_v37 = vld [vmem:[#allocation5 + $0xb0] sm:$0xf0]  ;;  %1781 = vmatpush.bf16.msrb.mxu3 %v3340_v23  ;;  %v119_v39 = vld.sshfl [vmem:[#allocation1 + $0x30] sm:$0xff pattern:$0x73625140]  ;;  %v2928_v49 = vor.u32 %v3713_v34, %v2925_v35 }
  0x5c   :  { %1787 = vmatpush.bf16.msra.mxu0 %v2560_v24  ;;  %v3645_v40 = vld [vmem:[#allocation5 + $0x1a4] sm:$0xf]  ;;  %v117_v41 = vld.sshfl [vmem:[#allocation1 + $0x20] sm:$0xff pattern:$0x73625140]  ;;  %v4086_v44 = vpack.c.bf16 %v119_v39, %v119_v39  ;;  %v2528_v60 = vor.u32 %v3613_v36, %v2525_v37 }
  0x5d   :  { %1800 = vmatpush.bf16.msra.mxu1 %v2688_v26  ;;  %v120_v45 = vld.sshfl [vmem:[#allocation1 + $0x38] sm:$0xff pattern:$0x73625140]  ;;  %v118_v48 = vld.sshfl [vmem:[#allocation1 + $0x28] sm:$0xff pattern:$0x73625140]  ;;  %v4088_v54 = vpack.c.bf16 %v117_v41, %v117_v41 }
  0x5e   :  { %1813 = vmatpush.bf16.msra.mxu2 %v2816_v27  ;;  %v2653_v50 = vld [vmem:[#allocation5 + $0x1b0] sm:$0xf0]  ;;  %v3677_v52 = vld [vmem:[#allocation5 + $0x2a4] sm:$0xf]  ;;  %v4090_v58 = vpack.c.bf16 %v120_v45, %v120_v45  ;;  %v4092_v59 = vpack.c.bf16 %v118_v48, %v118_v48 }
  0x5f   :  { %1826 = vmatpush.bf16.msra.mxu3 %v2944_v31  ;;  %v2781_v53 = vld [vmem:[#allocation5 + $0x2b0] sm:$0xf0]  ;;  %v3709_v56 = vld [vmem:[#allocation5 + $0x3a4] sm:$0xf]  ;;  %v2656_v61 = vor.u32 %v3645_v40, %v2653_v50 }
  0x60   :  { %v2909_v57 = vld [vmem:[#allocation5 + $0x3b0] sm:$0xf0]  ;;  %1788 = vmatpush.bf16.msra.mxu0 %v2544_v38  ;;  %v2784_v62 = vor.u32 %v3677_v52, %v2781_v53  ;;  %v3609_v63 = vld [vmem:[#allocation5 + $0x84] sm:$0xf] }
  0x61   :  { %1801 = vmatpush.bf16.msra.mxu1 %v2672_v42  ;;  %v2509_v0 = vld [vmem:[#allocation5 + $0x90] sm:$0xf0]  ;;  %v3641_v1 = vld [vmem:[#allocation5 + $0x184] sm:$0xf]  ;;  %v2912_v2 = vor.u32 %v3709_v56, %v2909_v57 }
  0x62   :  { %1769 = vmatmul.bf16.vlgmr.msrb.gmra.mxu2 %v4086_v44  ;;  %1743 = vmatmul.bf16.vlgmr.msrb.gmra.mxu0 %v4088_v54  ;;  %v2637_v3 = vld [vmem:[#allocation5 + $0x190] sm:$0xf0]  ;;  %v3673_v4 = vld [vmem:[#allocation5 + $0x284] sm:$0xf]  ;;  %v2512_v8 = vor.u32 %v3609_v63, %v2509_v0 }
  0x63   :  { %1814 = vmatpush.bf16.msra.mxu2 %v2800_v43  ;;  %1827 = vmatpush.bf16.msra.mxu3 %v2928_v49  ;;  %v2765_v5 = vld [vmem:[#allocation5 + $0x290] sm:$0xf0]  ;;  %v3705_v6 = vld [vmem:[#allocation5 + $0x384] sm:$0xf]  ;;  %v2640_v9 = vor.u32 %v3641_v1, %v2637_v3 }
  0x64   :  { %1782 = vmatmul.bf16.vlgmr.msrb.gmra.mxu3 %v4090_v58  ;;  %1756 = vmatmul.bf16.vlgmr.msrb.gmra.mxu1 %v4092_v59  ;;  %v2893_v7 = vld [vmem:[#allocation5 + $0x390] sm:$0xf0]  ;;  %v2768_v10 = vor.u32 %v3673_v4, %v2765_v5  ;;  %v3605_v11 = vld [vmem:[#allocation5 + $0x64] sm:$0xf] }
  0x65   :  { %1789 = vmatpush.bf16.msra.mxu0 %v2528_v60  ;;  %1802 = vmatpush.bf16.msra.mxu1 %v2656_v61  ;;  %v2493_v12 = vld [vmem:[#allocation5 + $0x70] sm:$0xf0]  ;;  %v3637_v13 = vld [vmem:[#allocation5 + $0x164] sm:$0xf]  ;;  %v2896_v14 = vor.u32 %v3705_v6, %v2893_v7 }
  0x66   :  { %v2621_v15 = vld [vmem:[#allocation5 + $0x170] sm:$0xf0]  ;;  %v3669_v16 = vld [vmem:[#allocation5 + $0x264] sm:$0xf]  ;;  %v2496_v20 = vor.u32 %v3605_v11, %v2493_v12 }
  0x67   :  { %1815 = vmatpush.bf16.msra.mxu2 %v2784_v62  ;;  %1828 = vmatpush.bf16.msra.mxu3 %v2912_v2  ;;  %v2749_v17 = vld [vmem:[#allocation5 + $0x270] sm:$0xf0]  ;;  %v3701_v18 = vld [vmem:[#allocation5 + $0x364] sm:$0xf]  ;;  %v2624_v21 = vor.u32 %v3637_v13, %v2621_v15 }
  0x68   :  { %v2877_v19 = vld [vmem:[#allocation5 + $0x370] sm:$0xf0]  ;;  %v2752_v22 = vor.u32 %v3669_v16, %v2749_v17  ;;  %v3601_v23 = vld [vmem:[#allocation5 + $0x44] sm:$0xf] }
  0x69   :  { %1790 = vmatpush.bf16.msra.mxu0 %v2512_v8  ;;  %1803 = vmatpush.bf16.msra.mxu1 %v2640_v9  ;;  %v2477_v24 = vld [vmem:[#allocation5 + $0x50] sm:$0xf0]  ;;  %v3633_v25 = vld [vmem:[#allocation5 + $0x144] sm:$0xf]  ;;  %v2880_v26 = vor.u32 %v3701_v18, %v2877_v19 }
  0x6a   :  { %v2605_v27 = vld [vmem:[#allocation5 + $0x150] sm:$0xf0]  ;;  %v3665_v28 = vld [vmem:[#allocation5 + $0x244] sm:$0xf]  ;;  %v2480_v32 = vor.u32 %v3601_v23, %v2477_v24 }
  0x6b   :  { %1816 = vmatpush.bf16.msra.mxu2 %v2768_v10  ;;  %1829 = vmatpush.bf16.msra.mxu3 %v2896_v14  ;;  %v2733_v29 = vld [vmem:[#allocation5 + $0x250] sm:$0xf0]  ;;  %v3697_v30 = vld [vmem:[#allocation5 + $0x344] sm:$0xf]  ;;  %v2608_v33 = vor.u32 %v3633_v25, %v2605_v27 }
  0x6c   :  { %v2861_v31 = vld [vmem:[#allocation5 + $0x350] sm:$0xf0]  ;;  %v2736_v34 = vor.u32 %v3665_v28, %v2733_v29  ;;  %v3597_v35 = vld [vmem:[#allocation5 + $0x24] sm:$0xf] }
  0x6d   :  { %1791 = vmatpush.bf16.msra.mxu0 %v2496_v20  ;;  %1804 = vmatpush.bf16.msra.mxu1 %v2624_v21  ;;  %v2461_v36 = vld [vmem:[#allocation5 + $0x30] sm:$0xf0]  ;;  %v3629_v37 = vld [vmem:[#allocation5 + $0x124] sm:$0xf]  ;;  %v2864_v38 = vor.u32 %v3697_v30, %v2861_v31 }
  0x6e   :  { %v2589_v39 = vld [vmem:[#allocation5 + $0x130] sm:$0xf0]  ;;  %v3661_v40 = vld [vmem:[#allocation5 + $0x224] sm:$0xf]  ;;  %v2464_v45 = vor.u32 %v3597_v35, %v2461_v36 }
  0x6f   :  { %1817 = vmatpush.bf16.msra.mxu2 %v2752_v22  ;;  %1830 = vmatpush.bf16.msra.mxu3 %v2880_v26  ;;  %v2717_v41 = vld [vmem:[#allocation5 + $0x230] sm:$0xf0]  ;;  %v3693_v42 = vld [vmem:[#allocation5 + $0x324] sm:$0xf]  ;;  %v2592_v50 = vor.u32 %v3629_v37, %v2589_v39 }
  0x70   :  { %v2845_v43 = vld [vmem:[#allocation5 + $0x330] sm:$0xf0]  ;;  %v3593_v48 = vld [vmem:[#allocation5 + $0x4] sm:$0xf]  ;;  %v2720_v52 = vor.u32 %v3661_v40, %v2717_v41 }
  0x71   :  { %1792 = vmatpush.bf16.msra.mxu0 %v2480_v32  ;;  %v2445_v49 = vld [vmem:[#allocation5 + $0x10] sm:$0xf0]  ;;  %1805 = vmatpush.bf16.msra.mxu1 %v2608_v33  ;;  %v3625_v53 = vld [vmem:[#allocation5 + $0x104] sm:$0xf]  ;;  %v2848_v60 = vor.u32 %v3693_v42, %v2845_v43 }
  0x72   :  { %v2573_v56 = vld [vmem:[#allocation5 + $0x110] sm:$0xf0]  ;;  %v3657_v57 = vld [vmem:[#allocation5 + $0x204] sm:$0xf]  ;;  %v2448_v3 = vor.u32 %v3593_v48, %v2445_v49 }
  0x73   :  { %1818 = vmatpush.bf16.msra.mxu2 %v2736_v34  ;;  %1831 = vmatpush.bf16.msra.mxu3 %v2864_v38  ;;  %v2701_v61 = vld [vmem:[#allocation5 + $0x210] sm:$0xf0]  ;;  %v3689_v62 = vld [vmem:[#allocation5 + $0x304] sm:$0xf]  ;;  %v2576_v7 = vor.u32 %v3625_v53, %v2573_v56 }
  0x74   :  { %v2829_v63 = vld [vmem:[#allocation5 + $0x310] sm:$0xf0]  ;;  %v3749_v0 = vld [vmem:[#allocation5 + $0x4e4] sm:$0xf]  ;;  %v2704_v8 = vor.u32 %v3657_v57, %v2701_v61 }
  0x75   :  { %v3069_v1 = vld [vmem:[#allocation5 + $0x4f0] sm:$0xf0]  ;;  %v3781_v2 = vld [vmem:[#allocation5 + $0x5e4] sm:$0xf]  ;;  %1793 = vmatpush.bf16.msra.mxu0 %v2464_v45  ;;  %1806 = vmatpush.bf16.msra.mxu1 %v2592_v50  ;;  %v2832_v11 = vor.u32 %v3689_v62, %v2829_v63 }
  0x76   :  { %v3197_v4 = vld [vmem:[#allocation5 + $0x5f0] sm:$0xf0]  ;;  %v3813_v5 = vld [vmem:[#allocation5 + $0x6e4] sm:$0xf]  ;;  %v3072_v12 = vor.u32 %v3749_v0, %v3069_v1 }
  0x77   :  { %v3325_v6 = vld [vmem:[#allocation5 + $0x6f0] sm:$0xf0]  ;;  %1819 = vmatpush.bf16.msra.mxu2 %v2720_v52  ;;  %v3845_v9 = vld [vmem:[#allocation5 + $0x7e4] sm:$0xf]  ;;  %1832 = vmatpush.bf16.msra.mxu3 %v2848_v60  ;;  %v3200_v13 = vor.u32 %v3781_v2, %v3197_v4 }
  0x78   :  { %v3453_v10 = vld [vmem:[#allocation5 + $0x7f0] sm:$0xf0]  ;;  %v3328_v14 = vor.u32 %v3813_v5, %v3325_v6  ;;  %v3745_v15 = vld [vmem:[#allocation5 + $0x4c4] sm:$0xf] }
  0x79   :  { %v3053_v16 = vld [vmem:[#allocation5 + $0x4d0] sm:$0xf0]  ;;  %v3777_v17 = vld [vmem:[#allocation5 + $0x5c4] sm:$0xf]  ;;  %1794 = vmatpush.bf16.msra.mxu0 %v2448_v3  ;;  %v3456_v18 = vor.u32 %v3845_v9, %v3453_v10  ;;  %1807 = vmatpush.bf16.msra.mxu1 %v2576_v7 }
  0x7a   :  { %v3181_v19 = vld [vmem:[#allocation5 + $0x5d0] sm:$0xf0]  ;;  %v3809_v20 = vld [vmem:[#allocation5 + $0x6c4] sm:$0xf]  ;;  %v3056_v24 = vor.u32 %v3745_v15, %v3053_v16 }
  0x7b   :  { %v3309_v21 = vld [vmem:[#allocation5 + $0x6d0] sm:$0xf0]  ;;  %1820 = vmatpush.bf16.msra.mxu2 %v2704_v8  ;;  %v3841_v22 = vld [vmem:[#allocation5 + $0x7c4] sm:$0xf]  ;;  %1833 = vmatpush.bf16.msra.mxu3 %v2832_v11  ;;  %v3184_v25 = vor.u32 %v3777_v17, %v3181_v19 }
  0x7c   :  { %v3437_v23 = vld [vmem:[#allocation5 + $0x7d0] sm:$0xf0]  ;;  %v3312_v26 = vor.u32 %v3809_v20, %v3309_v21  ;;  %v3741_v27 = vld [vmem:[#allocation5 + $0x4a4] sm:$0xf]  ;;  %1795 = vmatmul.bf16.vlgmr.msra.gmra.mxu0 %v4076_v47  ;;  %1808 = vmatmul.bf16.vlgmr.msra.gmra.mxu1 %v4080_v55 }
  0x7d   :  { %1839 = vmatpush.bf16.msrb.mxu0 %v3072_v12  ;;  %1852 = vmatpush.bf16.msrb.mxu1 %v3200_v13  ;;  %v3037_v28 = vld [vmem:[#allocation5 + $0x4b0] sm:$0xf0]  ;;  %v3773_v29 = vld [vmem:[#allocation5 + $0x5a4] sm:$0xf]  ;;  %v3440_v30 = vor.u32 %v3841_v22, %v3437_v23 }
  0x7e   :  { %v3165_v31 = vld [vmem:[#allocation5 + $0x5b0] sm:$0xf0]  ;;  %v3805_v32 = vld [vmem:[#allocation5 + $0x6a4] sm:$0xf]  ;;  %1821 = vmatmul.bf16.vlgmr.msra.gmra.mxu2 %v4074_v46  ;;  %1834 = vmatmul.bf16.vlgmr.msra.gmra.mxu3 %v4078_v51  ;;  %v3040_v36 = vor.u32 %v3741_v27, %v3037_v28 }
  0x7f   :  { %1865 = vmatpush.bf16.msrb.mxu2 %v3328_v14  ;;  %1878 = vmatpush.bf16.msrb.mxu3 %v3456_v18  ;;  %v3293_v33 = vld [vmem:[#allocation5 + $0x6b0] sm:$0xf0]  ;;  %v3837_v34 = vld [vmem:[#allocation5 + $0x7a4] sm:$0xf]  ;;  %v3168_v37 = vor.u32 %v3773_v29, %v3165_v31 }
  0x80   :  { %v3421_v35 = vld [vmem:[#allocation5 + $0x7b0] sm:$0xf0]  ;;  %v3296_v38 = vor.u32 %v3805_v32, %v3293_v33  ;;  %v3737_v39 = vld [vmem:[#allocation5 + $0x484] sm:$0xf] }
  0x81   :  { %1840 = vmatpush.bf16.msrb.mxu0 %v3056_v24  ;;  %1853 = vmatpush.bf16.msrb.mxu1 %v3184_v25  ;;  %v3021_v40 = vld [vmem:[#allocation5 + $0x490] sm:$0xf0]  ;;  %v3769_v41 = vld [vmem:[#allocation5 + $0x584] sm:$0xf]  ;;  %v3424_v42 = vor.u32 %v3837_v34, %v3421_v35 }
  0x82   :  { %v3149_v43 = vld [vmem:[#allocation5 + $0x590] sm:$0xf0]  ;;  %v3801_v45 = vld [vmem:[#allocation5 + $0x684] sm:$0xf]  ;;  %v3024_v52 = vor.u32 %v3737_v39, %v3021_v40  ;;  %v2563_v40 = vld [vmem:[#allocation5 + $0xe8] sm:$0xf] }
  0x83   :  { %1866 = vmatpush.bf16.msrb.mxu2 %v3312_v26  ;;  %1879 = vmatpush.bf16.msrb.mxu3 %v3440_v30  ;;  %v3277_v48 = vld [vmem:[#allocation5 + $0x690] sm:$0xf0]  ;;  %v3833_v49 = vld [vmem:[#allocation5 + $0x784] sm:$0xf]  ;;  %v3152_v53 = vor.u32 %v3769_v41, %v3149_v43  ;;  %v3624_v41 = vld [vmem:[#allocation5 + $0xf4] sm:$0xf0] }
  0x84   :  { %v3405_v50 = vld [vmem:[#allocation5 + $0x790] sm:$0xf0]  ;;  %v3280_v56 = vor.u32 %v3801_v45, %v3277_v48  ;;  %v3733_v57 = vld [vmem:[#allocation5 + $0x464] sm:$0xf]  ;;  %v3656_v45 = vld [vmem:[#allocation5 + $0x1f4] sm:$0xf0] }
  0x85   :  { %1841 = vmatpush.bf16.msrb.mxu0 %v3040_v36  ;;  %1854 = vmatpush.bf16.msrb.mxu1 %v3168_v37  ;;  %v3005_v60 = vld [vmem:[#allocation5 + $0x470] sm:$0xf0]  ;;  %v3765_v61 = vld [vmem:[#allocation5 + $0x564] sm:$0xf]  ;;  %v3408_v62 = vor.u32 %v3833_v49, %v3405_v50  ;;  %v2819_v48 = vld [vmem:[#allocation5 + $0x2e8] sm:$0xf] }
  0x86   :  { %v3133_v63 = vld [vmem:[#allocation5 + $0x570] sm:$0xf0]  ;;  %v3797_v0 = vld [vmem:[#allocation5 + $0x664] sm:$0xf]  ;;  %v3008_v4 = vor.u32 %v3733_v57, %v3005_v60  ;;  %v3688_v49 = vld [vmem:[#allocation5 + $0x2f4] sm:$0xf0]  ;;  %v2564_v60 = vor.u32 %v3624_v41, %v2563_v40 }
  0x87   :  { %1867 = vmatpush.bf16.msrb.mxu2 %v3296_v38  ;;  %1880 = vmatpush.bf16.msrb.mxu3 %v3424_v42  ;;  %v3261_v1 = vld [vmem:[#allocation5 + $0x670] sm:$0xf0]  ;;  %v3829_v2 = vld [vmem:[#allocation5 + $0x764] sm:$0xf]  ;;  %v3136_v5 = vor.u32 %v3765_v61, %v3133_v63  ;;  %v2691_v42 = vld [vmem:[#allocation5 + $0x1e8] sm:$0xf] }
  0x88   :  { %v3389_v3 = vld [vmem:[#allocation5 + $0x770] sm:$0xf0]  ;;  %v3264_v6 = vor.u32 %v3797_v0, %v3261_v1  ;;  %v3729_v7 = vld [vmem:[#allocation5 + $0x444] sm:$0xf]  ;;  %v2692_v61 = vor.u32 %v3656_v45, %v2691_v42  ;;  %v2547_v63 = vld [vmem:[#allocation5 + $0xc8] sm:$0xf] }
  0x89   :  { %1842 = vmatpush.bf16.msrb.mxu0 %v3024_v52  ;;  %1855 = vmatpush.bf16.msrb.mxu1 %v3152_v53  ;;  %v2989_v8 = vld [vmem:[#allocation5 + $0x450] sm:$0xf0]  ;;  %v3761_v9 = vld [vmem:[#allocation5 + $0x544] sm:$0xf]  ;;  %v3392_v10 = vor.u32 %v3829_v2, %v3389_v3  ;;  %v2947_v53 = vld [vmem:[#allocation5 + $0x3e8] sm:$0xf] }
  0x8a   :  { %v3117_v11 = vld [vmem:[#allocation5 + $0x550] sm:$0xf0]  ;;  %v3793_v12 = vld [vmem:[#allocation5 + $0x644] sm:$0xf]  ;;  %v2992_v16 = vor.u32 %v3729_v7, %v2989_v8  ;;  %v3620_v0 = vld [vmem:[#allocation5 + $0xd4] sm:$0xf0] }
  0x8b   :  { %1868 = vmatpush.bf16.msrb.mxu2 %v3280_v56  ;;  %1881 = vmatpush.bf16.msrb.mxu3 %v3408_v62  ;;  %v3245_v13 = vld [vmem:[#allocation5 + $0x650] sm:$0xf0]  ;;  %v3825_v14 = vld [vmem:[#allocation5 + $0x744] sm:$0xf]  ;;  %v3120_v17 = vor.u32 %v3761_v9, %v3117_v11  ;;  %v3720_v56 = vld [vmem:[#allocation5 + $0x3f4] sm:$0xf0]  ;;  %v2820_v62 = vor.u32 %v3688_v49, %v2819_v48  ;;  %v2548_v8 = vor.u32 %v3620_v0, %v2547_v63 }
  0x8c   :  { %v3373_v15 = vld [vmem:[#allocation5 + $0x750] sm:$0xf0]  ;;  %v3248_v18 = vor.u32 %v3793_v12, %v3245_v13  ;;  %v3725_v19 = vld [vmem:[#allocation5 + $0x424] sm:$0xf]  ;;  %v2675_v1 = vld [vmem:[#allocation5 + $0x1c8] sm:$0xf]  ;;  %v2948_v2 = vor.u32 %v3720_v56, %v2947_v53 }
  0x8d   :  { %1843 = vmatpush.bf16.msrb.mxu0 %v3008_v4  ;;  %1856 = vmatpush.bf16.msrb.mxu1 %v3136_v5  ;;  %v2973_v20 = vld [vmem:[#allocation5 + $0x430] sm:$0xf0]  ;;  %v3757_v21 = vld [vmem:[#allocation5 + $0x524] sm:$0xf]  ;;  %v3376_v22 = vor.u32 %v3825_v14, %v3373_v15  ;;  %v3652_v3 = vld [vmem:[#allocation5 + $0x1d4] sm:$0xf0] }
  0x8e   :  { %v3101_v23 = vld [vmem:[#allocation5 + $0x530] sm:$0xf0]  ;;  %v3789_v24 = vld [vmem:[#allocation5 + $0x624] sm:$0xf]  ;;  %v2976_v28 = vor.u32 %v3725_v19, %v2973_v20  ;;  %v2803_v4 = vld [vmem:[#allocation5 + $0x2c8] sm:$0xf]  ;;  %v2676_v9 = vor.u32 %v3652_v3, %v2675_v1 }
  0x8f   :  { %1869 = vmatpush.bf16.msrb.mxu2 %v3264_v6  ;;  %1882 = vmatpush.bf16.msrb.mxu3 %v3392_v10  ;;  %v3229_v25 = vld [vmem:[#allocation5 + $0x630] sm:$0xf0]  ;;  %v3821_v26 = vld [vmem:[#allocation5 + $0x724] sm:$0xf]  ;;  %v3104_v31 = vor.u32 %v3757_v21, %v3101_v23  ;;  %v3684_v5 = vld [vmem:[#allocation5 + $0x2d4] sm:$0xf0] }
  0x90   :  { %v3357_v27 = vld [vmem:[#allocation5 + $0x730] sm:$0xf0]  ;;  %v3721_v29 = vld [vmem:[#allocation5 + $0x404] sm:$0xf]  ;;  %v3232_v32 = vor.u32 %v3789_v24, %v3229_v25  ;;  %v2931_v6 = vld [vmem:[#allocation5 + $0x3c8] sm:$0xf]  ;;  %v2804_v10 = vor.u32 %v3684_v5, %v2803_v4 }
  0x91   :  { %1844 = vmatpush.bf16.msrb.mxu0 %v2992_v16  ;;  %v2957_v30 = vld [vmem:[#allocation5 + $0x410] sm:$0xf0]  ;;  %1857 = vmatpush.bf16.msrb.mxu1 %v3120_v17  ;;  %v3753_v33 = vld [vmem:[#allocation5 + $0x504] sm:$0xf]  ;;  %v3360_v36 = vor.u32 %v3821_v26, %v3357_v27  ;;  %v3716_v7 = vld [vmem:[#allocation5 + $0x3d4] sm:$0xf0] }
  0x92   :  { %v3085_v34 = vld [vmem:[#allocation5 + $0x510] sm:$0xf0]  ;;  %v3785_v35 = vld [vmem:[#allocation5 + $0x604] sm:$0xf]  ;;  %v2960_v43 = vor.u32 %v3721_v29, %v2957_v30  ;;  %v2531_v11 = vld [vmem:[#allocation5 + $0xa8] sm:$0xf]  ;;  %v2932_v14 = vor.u32 %v3716_v7, %v2931_v6 }
  0x93   :  { %1870 = vmatpush.bf16.msrb.mxu2 %v3248_v18  ;;  %1883 = vmatpush.bf16.msrb.mxu3 %v3376_v22  ;;  %v3213_v37 = vld [vmem:[#allocation5 + $0x610] sm:$0xf0]  ;;  %v3817_v38 = vld [vmem:[#allocation5 + $0x704] sm:$0xf]  ;;  %v3088_v50 = vor.u32 %v3753_v33, %v3085_v34  ;;  %v3616_v12 = vld [vmem:[#allocation5 + $0xb4] sm:$0xf0] }
  0x94   :  { %v3341_v39 = vld [vmem:[#allocation5 + $0x710] sm:$0xf0]  ;;  %v3216_v52 = vor.u32 %v3785_v35, %v3213_v37  ;;  %v2659_v13 = vld [vmem:[#allocation5 + $0x1a8] sm:$0xf]  ;;  %v3648_v15 = vld [vmem:[#allocation5 + $0x1b4] sm:$0xf0]  ;;  %v2532_v20 = vor.u32 %v3616_v12, %v2531_v11 }
  0x95   :  { %1845 = vmatpush.bf16.msrb.mxu0 %v2976_v28  ;;  %1858 = vmatpush.bf16.msrb.mxu1 %v3104_v31  ;;  %v3344_v57 = vor.u32 %v3817_v38, %v3341_v39  ;;  %v2787_v16 = vld [vmem:[#allocation5 + $0x2a8] sm:$0xf]  ;;  %v3680_v17 = vld [vmem:[#allocation5 + $0x2b4] sm:$0xf0]  ;;  %v2660_v21 = vor.u32 %v3648_v15, %v2659_v13 }
  0x96   :  { %v2915_v18 = vld [vmem:[#allocation5 + $0x3a8] sm:$0xf]  ;;  %v3712_v19 = vld [vmem:[#allocation5 + $0x3b4] sm:$0xf0]  ;;  %v2788_v22 = vor.u32 %v3680_v17, %v2787_v16 }
  0x97   :  { %1871 = vmatpush.bf16.msrb.mxu2 %v3232_v32  ;;  %1884 = vmatpush.bf16.msrb.mxu3 %v3360_v36  ;;  %v2515_v23 = vld [vmem:[#allocation5 + $0x88] sm:$0xf]  ;;  %v3612_v24 = vld [vmem:[#allocation5 + $0x94] sm:$0xf0]  ;;  %v2916_v26 = vor.u32 %v3712_v19, %v2915_v18 }
  0x98   :  { %v2643_v25 = vld [vmem:[#allocation5 + $0x188] sm:$0xf]  ;;  %v3644_v27 = vld [vmem:[#allocation5 + $0x194] sm:$0xf0]  ;;  %v2516_v32 = vor.u32 %v3612_v24, %v2515_v23 }
  0x99   :  { %1846 = vmatpush.bf16.msrb.mxu0 %v2960_v43  ;;  %1859 = vmatpush.bf16.msrb.mxu1 %v3088_v50  ;;  %v2771_v28 = vld [vmem:[#allocation5 + $0x288] sm:$0xf]  ;;  %v3676_v29 = vld [vmem:[#allocation5 + $0x294] sm:$0xf0]  ;;  %v2644_v33 = vor.u32 %v3644_v27, %v2643_v25 }
  0x9a   :  { %v2899_v30 = vld [vmem:[#allocation5 + $0x388] sm:$0xf]  ;;  %v3708_v31 = vld [vmem:[#allocation5 + $0x394] sm:$0xf0]  ;;  %v2772_v34 = vor.u32 %v3676_v29, %v2771_v28 }
  0x9b   :  { %1872 = vmatpush.bf16.msrb.mxu2 %v3216_v52  ;;  %1885 = vmatpush.bf16.msrb.mxu3 %v3344_v57  ;;  %v2499_v35 = vld [vmem:[#allocation5 + $0x68] sm:$0xf]  ;;  %v3608_v36 = vld [vmem:[#allocation5 + $0x74] sm:$0xf0]  ;;  %v2900_v38 = vor.u32 %v3708_v31, %v2899_v30 }
  0x9c   :  { %1847 = vmatmul.bf16.vlgmr.msrb.gmra.mxu0 %v4088_v54  ;;  %1860 = vmatmul.bf16.vlgmr.msrb.gmra.mxu1 %v4092_v59  ;;  %v2627_v37 = vld [vmem:[#allocation5 + $0x168] sm:$0xf]  ;;  %v3640_v39 = vld [vmem:[#allocation5 + $0x174] sm:$0xf0]  ;;  %v2500_v45 = vor.u32 %v3608_v36, %v2499_v35 }
  0x9d   :  { %1891 = vmatpush.bf16.msra.mxu0 %v2564_v60  ;;  %1904 = vmatpush.bf16.msra.mxu1 %v2692_v61  ;;  %v2755_v40 = vld [vmem:[#allocation5 + $0x268] sm:$0xf]  ;;  %v3672_v41 = vld [vmem:[#allocation5 + $0x274] sm:$0xf0]  ;;  %v2628_v48 = vor.u32 %v3640_v39, %v2627_v37 }
  0x9e   :  { %1873 = vmatmul.bf16.vlgmr.msrb.gmra.mxu2 %v4086_v44  ;;  %1886 = vmatmul.bf16.vlgmr.msrb.gmra.mxu3 %v4090_v58  ;;  %v2883_v42 = vld [vmem:[#allocation5 + $0x368] sm:$0xf]  ;;  %v3704_v43 = vld [vmem:[#allocation5 + $0x374] sm:$0xf0]  ;;  %v2756_v49 = vor.u32 %v3672_v41, %v2755_v40 }
  0x9f   :  { %1917 = vmatpush.bf16.msra.mxu2 %v2820_v62  ;;  %1930 = vmatpush.bf16.msra.mxu3 %v2948_v2  ;;  %v2483_v50 = vld [vmem:[#allocation5 + $0x48] sm:$0xf]  ;;  %v3604_v52 = vld [vmem:[#allocation5 + $0x54] sm:$0xf0]  ;;  %v2884_v56 = vor.u32 %v3704_v43, %v2883_v42 }
  0xa0   :  { %v2611_v53 = vld [vmem:[#allocation5 + $0x148] sm:$0xf]  ;;  %v3636_v57 = vld [vmem:[#allocation5 + $0x154] sm:$0xf0]  ;;  %v2484_v0 = vor.u32 %v3604_v52, %v2483_v50 }
  0xa1   :  { %1892 = vmatpush.bf16.msra.mxu0 %v2548_v8  ;;  %1905 = vmatpush.bf16.msra.mxu1 %v2676_v9  ;;  %v2739_v60 = vld [vmem:[#allocation5 + $0x248] sm:$0xf]  ;;  %v3668_v61 = vld [vmem:[#allocation5 + $0x254] sm:$0xf0]  ;;  %v2612_v1 = vor.u32 %v3636_v57, %v2611_v53 }
  0xa2   :  { %v2867_v62 = vld [vmem:[#allocation5 + $0x348] sm:$0xf]  ;;  %v3700_v63 = vld [vmem:[#allocation5 + $0x354] sm:$0xf0]  ;;  %v2740_v2 = vor.u32 %v3668_v61, %v2739_v60 }
  0xa3   :  { %1918 = vmatpush.bf16.msra.mxu2 %v2804_v10  ;;  %1931 = vmatpush.bf16.msra.mxu3 %v2932_v14  ;;  %v2467_v3 = vld [vmem:[#allocation5 + $0x28] sm:$0xf]  ;;  %v3600_v4 = vld [vmem:[#allocation5 + $0x34] sm:$0xf0]  ;;  %v2868_v6 = vor.u32 %v3700_v63, %v2867_v62 }
  0xa4   :  { %v2595_v5 = vld [vmem:[#allocation5 + $0x128] sm:$0xf]  ;;  %v3632_v7 = vld [vmem:[#allocation5 + $0x134] sm:$0xf0]  ;;  %v2468_v12 = vor.u32 %v3600_v4, %v2467_v3 }
  0xa5   :  { %1893 = vmatpush.bf16.msra.mxu0 %v2532_v20  ;;  %1906 = vmatpush.bf16.msra.mxu1 %v2660_v21  ;;  %v2723_v8 = vld [vmem:[#allocation5 + $0x228] sm:$0xf]  ;;  %v3664_v9 = vld [vmem:[#allocation5 + $0x234] sm:$0xf0]  ;;  %v2596_v15 = vor.u32 %v3632_v7, %v2595_v5 }
  0xa6   :  { %v2851_v10 = vld [vmem:[#allocation5 + $0x328] sm:$0xf]  ;;  %v3696_v11 = vld [vmem:[#allocation5 + $0x334] sm:$0xf0]  ;;  %v2724_v16 = vor.u32 %v3664_v9, %v2723_v8 }
  0xa7   :  { %1919 = vmatpush.bf16.msra.mxu2 %v2788_v22  ;;  %1932 = vmatpush.bf16.msra.mxu3 %v2916_v26  ;;  %v2451_v13 = vld [vmem:[#allocation5 + $0x8] sm:$0xf]  ;;  %v3596_v14 = vld [vmem:[#allocation5 + $0x14] sm:$0xf0]  ;;  %v2852_v20 = vor.u32 %v3696_v11, %v2851_v10 }
  0xa8   :  { %v2579_v17 = vld [vmem:[#allocation5 + $0x108] sm:$0xf]  ;;  %v3628_v18 = vld [vmem:[#allocation5 + $0x114] sm:$0xf0]  ;;  %v2452_v27 = vor.u32 %v3596_v14, %v2451_v13 }
  0xa9   :  { %1894 = vmatpush.bf16.msra.mxu0 %v2516_v32  ;;  %1907 = vmatpush.bf16.msra.mxu1 %v2644_v33  ;;  %v2707_v19 = vld [vmem:[#allocation5 + $0x208] sm:$0xf]  ;;  %v3660_v21 = vld [vmem:[#allocation5 + $0x214] sm:$0xf0]  ;;  %v2580_v31 = vor.u32 %v3628_v18, %v2579_v17 }
  0xaa   :  { %v2835_v22 = vld [vmem:[#allocation5 + $0x308] sm:$0xf]  ;;  %v3692_v23 = vld [vmem:[#allocation5 + $0x314] sm:$0xf0]  ;;  %v2708_v32 = vor.u32 %v3660_v21, %v2707_v19 }
  0xab   :  { %1920 = vmatpush.bf16.msra.mxu2 %v2772_v34  ;;  %1933 = vmatpush.bf16.msra.mxu3 %v2900_v38  ;;  %v3075_v24 = vld [vmem:[#allocation5 + $0x4e8] sm:$0xf]  ;;  %v3752_v25 = vld [vmem:[#allocation5 + $0x4f4] sm:$0xf0]  ;;  %v2836_v35 = vor.u32 %v3692_v23, %v2835_v22 }
  0xac   :  { %v3203_v26 = vld [vmem:[#allocation5 + $0x5e8] sm:$0xf]  ;;  %v3784_v28 = vld [vmem:[#allocation5 + $0x5f4] sm:$0xf0]  ;;  %v3076_v36 = vor.u32 %v3752_v25, %v3075_v24 }
  0xad   :  { %1895 = vmatpush.bf16.msra.mxu0 %v2500_v45  ;;  %1908 = vmatpush.bf16.msra.mxu1 %v2628_v48  ;;  %v3331_v29 = vld [vmem:[#allocation5 + $0x6e8] sm:$0xf]  ;;  %v3816_v30 = vld [vmem:[#allocation5 + $0x6f4] sm:$0xf0]  ;;  %v3204_v37 = vor.u32 %v3784_v28, %v3203_v26 }
  0xae   :  { %v3459_v33 = vld [vmem:[#allocation5 + $0x7e8] sm:$0xf]  ;;  %v3848_v34 = vld [vmem:[#allocation5 + $0x7f4] sm:$0xf0]  ;;  %v3332_v38 = vor.u32 %v3816_v30, %v3331_v29 }
  0xaf   :  { %1921 = vmatpush.bf16.msra.mxu2 %v2756_v49  ;;  %1934 = vmatpush.bf16.msra.mxu3 %v2884_v56  ;;  %v3059_v39 = vld [vmem:[#allocation5 + $0x4c8] sm:$0xf]  ;;  %v3748_v40 = vld [vmem:[#allocation5 + $0x4d4] sm:$0xf0]  ;;  %v3460_v42 = vor.u32 %v3848_v34, %v3459_v33 }
  0xb0   :  { %v3187_v41 = vld [vmem:[#allocation5 + $0x5c8] sm:$0xf]  ;;  %v3780_v43 = vld [vmem:[#allocation5 + $0x5d4] sm:$0xf0]  ;;  %v3060_v52 = vor.u32 %v3748_v40, %v3059_v39 }
  0xb1   :  { %1896 = vmatpush.bf16.msra.mxu0 %v2484_v0  ;;  %1909 = vmatpush.bf16.msra.mxu1 %v2612_v1  ;;  %v3315_v45 = vld [vmem:[#allocation5 + $0x6c8] sm:$0xf]  ;;  %v3812_v48 = vld [vmem:[#allocation5 + $0x6d4] sm:$0xf0]  ;;  %v3188_v53 = vor.u32 %v3780_v43, %v3187_v41 }
  0xb2   :  { %v3443_v49 = vld [vmem:[#allocation5 + $0x7c8] sm:$0xf]  ;;  %v3844_v50 = vld [vmem:[#allocation5 + $0x7d4] sm:$0xf0]  ;;  %v3316_v56 = vor.u32 %v3812_v48, %v3315_v45 }
  0xb3   :  { %1922 = vmatpush.bf16.msra.mxu2 %v2740_v2  ;;  %1935 = vmatpush.bf16.msra.mxu3 %v2868_v6  ;;  %v3043_v57 = vld [vmem:[#allocation5 + $0x4a8] sm:$0xf]  ;;  %v3744_v60 = vld [vmem:[#allocation5 + $0x4b4] sm:$0xf0]  ;;  %v3444_v62 = vor.u32 %v3844_v50, %v3443_v49 }
  0xb4   :  { %v3171_v61 = vld [vmem:[#allocation5 + $0x5a8] sm:$0xf]  ;;  %v3776_v63 = vld [vmem:[#allocation5 + $0x5b4] sm:$0xf0]  ;;  %v3044_v4 = vor.u32 %v3744_v60, %v3043_v57 }
  0xb5   :  { %1897 = vmatpush.bf16.msra.mxu0 %v2468_v12  ;;  %1910 = vmatpush.bf16.msra.mxu1 %v2596_v15  ;;  %v3299_v0 = vld [vmem:[#allocation5 + $0x6a8] sm:$0xf]  ;;  %v3808_v1 = vld [vmem:[#allocation5 + $0x6b4] sm:$0xf0]  ;;  %v3172_v5 = vor.u32 %v3776_v63, %v3171_v61 }
  0xb6   :  { %v3427_v2 = vld [vmem:[#allocation5 + $0x7a8] sm:$0xf]  ;;  %v3840_v3 = vld [vmem:[#allocation5 + $0x7b4] sm:$0xf0]  ;;  %v3300_v6 = vor.u32 %v3808_v1, %v3299_v0 }
  0xb7   :  { %1923 = vmatpush.bf16.msra.mxu2 %v2724_v16  ;;  %1936 = vmatpush.bf16.msra.mxu3 %v2852_v20  ;;  %v3027_v7 = vld [vmem:[#allocation5 + $0x488] sm:$0xf]  ;;  %v3740_v8 = vld [vmem:[#allocation5 + $0x494] sm:$0xf0]  ;;  %v3428_v10 = vor.u32 %v3840_v3, %v3427_v2 }
  0xb8   :  { %v3155_v9 = vld [vmem:[#allocation5 + $0x588] sm:$0xf]  ;;  %v3772_v11 = vld [vmem:[#allocation5 + $0x594] sm:$0xf0]  ;;  %v3028_v16 = vor.u32 %v3740_v8, %v3027_v7 }
  0xb9   :  { %1898 = vmatpush.bf16.msra.mxu0 %v2452_v27  ;;  %1911 = vmatpush.bf16.msra.mxu1 %v2580_v31  ;;  %v3283_v12 = vld [vmem:[#allocation5 + $0x688] sm:$0xf]  ;;  %v3804_v13 = vld [vmem:[#allocation5 + $0x694] sm:$0xf0]  ;;  %v3156_v17 = vor.u32 %v3772_v11, %v3155_v9  ;;  %v2565_v11 = vld [vmem:[#allocation5 + $0xf8] sm:$0xf0] }
  0xba   :  { %v3411_v14 = vld [vmem:[#allocation5 + $0x788] sm:$0xf]  ;;  %v3836_v15 = vld [vmem:[#allocation5 + $0x794] sm:$0xf0]  ;;  %v3284_v18 = vor.u32 %v3804_v13, %v3283_v12  ;;  %v3654_v12 = vld [vmem:[#allocation5 + $0x1ec] sm:$0xf] }
  0xbb   :  { %1924 = vmatpush.bf16.msra.mxu2 %v2708_v32  ;;  %1937 = vmatpush.bf16.msra.mxu3 %v2836_v35  ;;  %v3011_v19 = vld [vmem:[#allocation5 + $0x468] sm:$0xf]  ;;  %v3736_v20 = vld [vmem:[#allocation5 + $0x474] sm:$0xf0]  ;;  %v3412_v22 = vor.u32 %v3836_v15, %v3411_v14  ;;  %v2693_v14 = vld [vmem:[#allocation5 + $0x1f8] sm:$0xf0] }
  0xbc   :  { %1899 = vmatmul.bf16.vlgmr.msra.gmra.mxu0 %v4076_v47  ;;  %1912 = vmatmul.bf16.vlgmr.msra.gmra.mxu1 %v4080_v55  ;;  %v3139_v21 = vld [vmem:[#allocation5 + $0x568] sm:$0xf]  ;;  %v3768_v23 = vld [vmem:[#allocation5 + $0x574] sm:$0xf0]  ;;  %v3012_v28 = vor.u32 %v3736_v20, %v3011_v19  ;;  %v3686_v15 = vld [vmem:[#allocation5 + $0x2ec] sm:$0xf] }
  0xbd   :  { %1943 = vmatpush.bf16.msrb.mxu0 %v3076_v36  ;;  %1956 = vmatpush.bf16.msrb.mxu1 %v3204_v37  ;;  %v3267_v24 = vld [vmem:[#allocation5 + $0x668] sm:$0xf]  ;;  %v3800_v25 = vld [vmem:[#allocation5 + $0x674] sm:$0xf0]  ;;  %v3140_v29 = vor.u32 %v3768_v23, %v3139_v21  ;;  %v3718_v20 = vld [vmem:[#allocation5 + $0x3ec] sm:$0xf] }
  0xbe   :  { %1925 = vmatmul.bf16.vlgmr.msra.gmra.mxu2 %v4074_v46  ;;  %1938 = vmatmul.bf16.vlgmr.msra.gmra.mxu3 %v4078_v51  ;;  %v3395_v26 = vld [vmem:[#allocation5 + $0x768] sm:$0xf]  ;;  %v3832_v27 = vld [vmem:[#allocation5 + $0x774] sm:$0xf0]  ;;  %v3268_v30 = vor.u32 %v3800_v25, %v3267_v24  ;;  %v2949_v21 = vld [vmem:[#allocation5 + $0x3f8] sm:$0xf0] }
  0xbf   :  { %1969 = vmatpush.bf16.msrb.mxu2 %v3332_v38  ;;  %1982 = vmatpush.bf16.msrb.mxu3 %v3460_v42  ;;  %v2995_v31 = vld [vmem:[#allocation5 + $0x448] sm:$0xf]  ;;  %v3732_v32 = vld [vmem:[#allocation5 + $0x454] sm:$0xf0]  ;;  %v3396_v34 = vor.u32 %v3832_v27, %v3395_v26  ;;  %v2696_v26 = vor.u32 %v3654_v12, %v2693_v14  ;;  %v2901_v12 = vld [vmem:[#allocation5 + $0x398] sm:$0xf0] }
  0xc0   :  { %v3123_v33 = vld [vmem:[#allocation5 + $0x548] sm:$0xf]  ;;  %v3764_v35 = vld [vmem:[#allocation5 + $0x554] sm:$0xf0]  ;;  %v2996_v40 = vor.u32 %v3732_v32, %v2995_v31  ;;  %v2952_v32 = vor.u32 %v3718_v20, %v2949_v21  ;;  %v3638_v20 = vld [vmem:[#allocation5 + $0x16c] sm:$0xf] }
  0xc1   :  { %1944 = vmatpush.bf16.msrb.mxu0 %v3060_v52  ;;  %1957 = vmatpush.bf16.msrb.mxu1 %v3188_v53  ;;  %v3251_v36 = vld [vmem:[#allocation5 + $0x648] sm:$0xf]  ;;  %v3796_v37 = vld [vmem:[#allocation5 + $0x654] sm:$0xf0]  ;;  %v3124_v42 = vor.u32 %v3764_v35, %v3123_v33  ;;  %v2677_v33 = vld [vmem:[#allocation5 + $0x1d8] sm:$0xf0] }
  0xc2   :  { %v3379_v38 = vld [vmem:[#allocation5 + $0x748] sm:$0xf]  ;;  %v3828_v39 = vld [vmem:[#allocation5 + $0x754] sm:$0xf0]  ;;  %v3252_v43 = vor.u32 %v3796_v37, %v3251_v36  ;;  %v2805_v35 = vld [vmem:[#allocation5 + $0x2d8] sm:$0xf0] }
  0xc3   :  { %1970 = vmatpush.bf16.msrb.mxu2 %v3316_v56  ;;  %1983 = vmatpush.bf16.msrb.mxu3 %v3444_v62  ;;  %v2979_v41 = vld [vmem:[#allocation5 + $0x428] sm:$0xf]  ;;  %v3728_v45 = vld [vmem:[#allocation5 + $0x434] sm:$0xf0]  ;;  %v3380_v50 = vor.u32 %v3828_v39, %v3379_v38  ;;  %v4110_v56 = vld [vmem:[#allocation7] sm:$0xf] }
  0xc4   :  { %v3107_v48 = vld [vmem:[#allocation5 + $0x528] sm:$0xf]  ;;  %v3760_v49 = vld [vmem:[#allocation5 + $0x534] sm:$0xf0]  ;;  %v2980_v61 = vor.u32 %v3728_v45, %v2979_v41  ;;  %v3714_v36 = vld [vmem:[#allocation5 + $0x3cc] sm:$0xf] }
  0xc5   :  { %1945 = vmatpush.bf16.msrb.mxu0 %v3044_v4  ;;  %1958 = vmatpush.bf16.msrb.mxu1 %v3172_v5  ;;  %v3235_v52 = vld [vmem:[#allocation5 + $0x628] sm:$0xf]  ;;  %v3792_v53 = vld [vmem:[#allocation5 + $0x634] sm:$0xf0]  ;;  %v3108_v1 = vor.u32 %v3760_v49, %v3107_v48  ;;  %v395_v5 = vperm.slane %v4110_v56, 0 }
  0xc6   :  { %v3363_v57 = vld [vmem:[#allocation5 + $0x728] sm:$0xf]  ;;  %v3824_v60 = vld [vmem:[#allocation5 + $0x734] sm:$0xf0]  ;;  %v3236_v2 = vor.u32 %v3792_v53, %v3235_v52  ;;  %v2933_v37 = vld [vmem:[#allocation5 + $0x3d8] sm:$0xf0] }
  0xc7   :  { %1971 = vmatpush.bf16.msrb.mxu2 %v3300_v6  ;;  %1984 = vmatpush.bf16.msrb.mxu3 %v3428_v10  ;;  %v2963_v62 = vld [vmem:[#allocation5 + $0x408] sm:$0xf]  ;;  %v3724_v63 = vld [vmem:[#allocation5 + $0x414] sm:$0xf0]  ;;  %v3364_v6 = vor.u32 %v3824_v60, %v3363_v57  ;;  %v3622_v10 = vld [vmem:[#allocation5 + $0xec] sm:$0xf] }
  0xc8   :  { %v3091_v0 = vld [vmem:[#allocation5 + $0x508] sm:$0xf]  ;;  %v3756_v3 = vld [vmem:[#allocation5 + $0x514] sm:$0xf0]  ;;  %v2964_v13 = vor.u32 %v3724_v63, %v2963_v62  ;;  %v2568_v25 = vor.u32 %v3622_v10, %v2565_v11  ;;  %v3614_v45 = vld [vmem:[#allocation5 + $0xac] sm:$0xf] }
  0xc9   :  { %1946 = vmatpush.bf16.msrb.mxu0 %v3028_v16  ;;  %1959 = vmatpush.bf16.msrb.mxu1 %v3156_v17  ;;  %v3219_v4 = vld [vmem:[#allocation5 + $0x608] sm:$0xf]  ;;  %v3788_v7 = vld [vmem:[#allocation5 + $0x614] sm:$0xf0]  ;;  %v2821_v16 = vld [vmem:[#allocation5 + $0x2f8] sm:$0xf0] }
  0xca   :  { %v3347_v8 = vld [vmem:[#allocation5 + $0x708] sm:$0xf]  ;;  %v3820_v9 = vld [vmem:[#allocation5 + $0x714] sm:$0xf0]  ;;  %v3220_v19 = vor.u32 %v3788_v7, %v3219_v4  ;;  %v2824_v27 = vor.u32 %v3686_v15, %v2821_v16  ;;  %v2533_v48 = vld [vmem:[#allocation5 + $0xb8] sm:$0xf0] }
  0xcb   :  { %1972 = vmatpush.bf16.msrb.mxu2 %v3284_v18  ;;  %1985 = vmatpush.bf16.msrb.mxu3 %v3412_v22  ;;  %v3092_v18 = vor.u32 %v3756_v3, %v3091_v0  ;;  %v3348_v24 = vor.u32 %v3820_v9, %v3347_v8  ;;  %v3646_v49 = vld [vmem:[#allocation5 + $0x1ac] sm:$0xf]  ;;  %v2661_v52 = vld [vmem:[#allocation5 + $0x1b8] sm:$0xf0] }
  0xcc   :  { %v3678_v53 = vld [vmem:[#allocation5 + $0x2ac] sm:$0xf]  ;;  %v2789_v57 = vld [vmem:[#allocation5 + $0x2b8] sm:$0xf0] }
  0xcd   :  { %1947 = vmatpush.bf16.msrb.mxu0 %v3012_v28  ;;  %1960 = vmatpush.bf16.msrb.mxu1 %v3140_v29  ;;  %v3618_v28 = vld [vmem:[#allocation5 + $0xcc] sm:$0xf]  ;;  %v2549_v29 = vld [vmem:[#allocation5 + $0xd8] sm:$0xf0]  ;;  %v2792_v3 = vor.u32 %v3678_v53, %v2789_v57 }
  0xce   :  { %v2552_v39 = vor.u32 %v3618_v28, %v2549_v29  ;;  %v3710_v62 = vld [vmem:[#allocation5 + $0x3ac] sm:$0xf]  ;;  %v2917_v63 = vld [vmem:[#allocation5 + $0x3b8] sm:$0xf0] }
  0xcf   :  { %1973 = vmatpush.bf16.msrb.mxu2 %v3268_v30  ;;  %1986 = vmatpush.bf16.msrb.mxu3 %v3396_v34  ;;  %v1692_v17 = vpop.f32.mrf.mxu0  ;;  %v3650_v30 = vld [vmem:[#allocation5 + $0x1cc] sm:$0xf]  ;;  %v2920_v7 = vor.u32 %v3710_v62, %v2917_v63  ;;  %v2645_v8 = vld [vmem:[#allocation5 + $0x198] sm:$0xf0] }
  0xd0   :  { %v1693_v22 = vadd.f32 %v1692_v17, %v395_v5  ;;  %v3682_v34 = vld [vmem:[#allocation5 + $0x2cc] sm:$0xf]  ;;  %v2517_v5 = vld [vmem:[#allocation5 + $0x98] sm:$0xf0] }
  0xd1   :  { %1948 = vmatpush.bf16.msrb.mxu0 %v2996_v40  ;;  %1961 = vmatpush.bf16.msrb.mxu1 %v3124_v42  ;;  %v1705_v23 = vpop.f32.mrf.mxu1  ;;  %v2680_v42 = vor.u32 %v3650_v30, %v2677_v33  ;;  %v3610_v4 = vld [vmem:[#allocation5 + $0x8c] sm:$0xf]  ;;  %v2773_v10 = vld [vmem:[#allocation5 + $0x298] sm:$0xf0] }
  0xd2   :  { %v1706_v31 = vadd.f32 %v1705_v23, %v1693_v22  ;;  %v3674_v9 = vld [vmem:[#allocation5 + $0x28c] sm:$0xf]  ;;  %v2520_v14 = vor.u32 %v3610_v4, %v2517_v5  ;;  %v2629_v22 = vld [vmem:[#allocation5 + $0x178] sm:$0xf0] }
  0xd3   :  { %1974 = vmatpush.bf16.msrb.mxu2 %v3252_v43  ;;  %1987 = vmatpush.bf16.msrb.mxu3 %v3380_v50  ;;  %v2808_v43 = vor.u32 %v3682_v34, %v2805_v35  ;;  %v2936_v50 = vor.u32 %v3714_v36, %v2933_v37  ;;  %v3706_v11 = vld [vmem:[#allocation5 + $0x38c] sm:$0xf]  ;;  %v2776_v17 = vor.u32 %v3674_v9, %v2773_v10  ;;  %v2485_v34 = vld [vmem:[#allocation5 + $0x58] sm:$0xf0] }
  0xd4   :  { %v2904_v21 = vor.u32 %v3706_v11, %v2901_v12  ;;  %v3670_v23 = vld [vmem:[#allocation5 + $0x26c] sm:$0xf]  ;;  %v2613_v37 = vld [vmem:[#allocation5 + $0x158] sm:$0xf0] }
  0xd5   :  { %1949 = vmatpush.bf16.msrb.mxu0 %v2980_v61  ;;  %1962 = vmatpush.bf16.msrb.mxu1 %v3108_v1  ;;  %v1718_v38 = vpop.f32.mrf.mxu2  ;;  %v2536_v1 = vor.u32 %v3614_v45, %v2533_v48  ;;  %v3602_v33 = vld [vmem:[#allocation5 + $0x4c] sm:$0xf]  ;;  %v2469_v53 = vld [vmem:[#allocation5 + $0x38] sm:$0xf0] }
  0xd6   :  { %v1719_v40 = vadd.f32 %v1718_v38, %v1706_v31  ;;  %v2632_v31 = vor.u32 %v3638_v20, %v2629_v22  ;;  %v3634_v35 = vld [vmem:[#allocation5 + $0x14c] sm:$0xf]  ;;  %v2488_v45 = vor.u32 %v3602_v33, %v2485_v34  ;;  %v2725_v63 = vld [vmem:[#allocation5 + $0x238] sm:$0xf0] }
  0xd7   :  { %1975 = vmatpush.bf16.msrb.mxu2 %v3236_v2  ;;  %1988 = vmatpush.bf16.msrb.mxu3 %v3364_v6  ;;  %v1731_v41 = vpop.f32.mrf.mxu3  ;;  %v1694_v61 = vpop.f32.mrf.mxu0  ;;  %v2664_v2 = vor.u32 %v3646_v49, %v2661_v52  ;;  %v3642_v6 = vld [vmem:[#allocation5 + $0x18c] sm:$0xf]  ;;  %v2616_v49 = vor.u32 %v3634_v35, %v2613_v37  ;;  %v2581_v12 = vld [vmem:[#allocation5 + $0x118] sm:$0xf0] }
  0xd8   :  { %v1732_v60 = vadd.f32 %v1731_v41, %v1719_v40  ;;  %v2648_v16 = vor.u32 %v3642_v6, %v2645_v8  ;;  %v3666_v38 = vld [vmem:[#allocation5 + $0x24c] sm:$0xf]  ;;  %v2597_v61 = vld [vmem:[#allocation5 + $0x138] sm:$0xf0] }
  0xd9   :  { %1950 = vmatpush.bf16.msrb.mxu0 %v2964_v13  ;;  %1963 = vmatpush.bf16.msrb.mxu1 %v3092_v18  ;;  %v1707_v0 = vpop.f32.mrf.mxu1  ;;  %v3606_v18 = vld [vmem:[#allocation5 + $0x6c] sm:$0xf] }
  0xda   :  { %v3698_v41 = vld [vmem:[#allocation5 + $0x34c] sm:$0xf] }
  0xdb   :  { %1976 = vmatpush.bf16.msrb.mxu2 %v3220_v19  ;;  %1989 = vmatpush.bf16.msrb.mxu3 %v3348_v24  ;;  %v2501_v19 = vld [vmem:[#allocation5 + $0x78] sm:$0xf0]  ;;  %v3598_v52 = vld [vmem:[#allocation5 + $0x2c] sm:$0xf] }
  0xdc   :  { %1951 = vmatmul.bf16.vlgmr.msrb.gmra.mxu0 %v4088_v54  ;;  %1964 = vmatmul.bf16.vlgmr.msrb.gmra.mxu1 %v4092_v59  ;;  %v2757_v24 = vld [vmem:[#allocation5 + $0x278] sm:$0xf0]  ;;  %v2504_v28 = vor.u32 %v3606_v18, %v2501_v19  ;;  %v3630_v57 = vld [vmem:[#allocation5 + $0x12c] sm:$0xf]  ;;  %v2472_v5 = vor.u32 %v3598_v52, %v2469_v53 }
  0xdd   :  { %1995 = vmatpush.bf16.msra.mxu0 %v2568_v25  ;;  %2008 = vmatpush.bf16.msra.mxu1 %v2696_v26  ;;  %v1720_v13 = vpop.f32.mrf.mxu2  ;;  %v3702_v25 = vld [vmem:[#allocation5 + $0x36c] sm:$0xf]  ;;  %v2885_v26 = vld [vmem:[#allocation5 + $0x378] sm:$0xf0]  ;;  %v2600_v9 = vor.u32 %v3630_v57, %v2597_v61 }
  0xde   :  { %1977 = vmatmul.bf16.vlgmr.msrb.gmra.mxu2 %v4086_v44  ;;  %1990 = vmatmul.bf16.vlgmr.msrb.gmra.mxu3 %v4090_v58  ;;  %v2888_v36 = vor.u32 %v3702_v25, %v2885_v26  ;;  %v3662_v62 = vld [vmem:[#allocation5 + $0x22c] sm:$0xf]  ;;  %v3077_v19 = vld [vmem:[#allocation5 + $0x4f8] sm:$0xf0] }
  0xdf   :  { %2021 = vmatpush.bf16.msra.mxu2 %v2824_v27  ;;  %2034 = vmatpush.bf16.msra.mxu3 %v2952_v32  ;;  %v1733_v15 = vpop.f32.mrf.mxu3  ;;  %v1744_v27 = vpop.f32.mrf.mxu0  ;;  %v2760_v32 = vor.u32 %v3670_v23, %v2757_v24  ;;  %v3594_v6 = vld [vmem:[#allocation5 + $0xc] sm:$0xf]  ;;  %v2728_v10 = vor.u32 %v3662_v62, %v2725_v63  ;;  %v3205_v23 = vld [vmem:[#allocation5 + $0x5f8] sm:$0xf0] }
  0xe0   :  { %v1745_v29 = vadd.f32 %v1744_v27, %v1732_v60  ;;  %v3626_v11 = vld [vmem:[#allocation5 + $0x10c] sm:$0xf]  ;;  %v2709_v15 = vld [vmem:[#allocation5 + $0x218] sm:$0xf0] }
  0xe1   :  { %1996 = vmatpush.bf16.msra.mxu0 %v2552_v39  ;;  %2009 = vmatpush.bf16.msra.mxu1 %v2680_v42  ;;  %v1757_v30 = vpop.f32.mrf.mxu1  ;;  %v2741_v39 = vld [vmem:[#allocation5 + $0x258] sm:$0xf0]  ;;  %v3658_v13 = vld [vmem:[#allocation5 + $0x20c] sm:$0xf]  ;;  %v2584_v26 = vor.u32 %v3626_v11, %v2581_v12 }
  0xe2   :  { %v1758_v40 = vadd.f32 %v1757_v30, %v1745_v29  ;;  %v2869_v42 = vld [vmem:[#allocation5 + $0x358] sm:$0xf0]  ;;  %v3750_v18 = vld [vmem:[#allocation5 + $0x4ec] sm:$0xf]  ;;  %v2712_v27 = vor.u32 %v3658_v13, %v2709_v15 }
  0xe3   :  { %2022 = vmatpush.bf16.msra.mxu2 %v2808_v43  ;;  %2035 = vmatpush.bf16.msra.mxu3 %v2936_v50  ;;  %v2744_v50 = vor.u32 %v3666_v38, %v2741_v39  ;;  %v2872_v60 = vor.u32 %v3698_v41, %v2869_v42  ;;  %v3782_v20 = vld [vmem:[#allocation5 + $0x5ec] sm:$0xf]  ;;  %v3333_v25 = vld [vmem:[#allocation5 + $0x6f8] sm:$0xf0] }
  0xe4   :  { %v3814_v24 = vld [vmem:[#allocation5 + $0x6ec] sm:$0xf]  ;;  %v3461_v29 = vld [vmem:[#allocation5 + $0x7f8] sm:$0xf0]  ;;  %v3208_v33 = vor.u32 %v3782_v20, %v3205_v23 }
  0xe5   :  { %1997 = vmatpush.bf16.msra.mxu0 %v2536_v1  ;;  %2010 = vmatpush.bf16.msra.mxu1 %v2664_v2  ;;  %v1770_v43 = vpop.f32.mrf.mxu2  ;;  %v3694_v1 = vld [vmem:[#allocation5 + $0x32c] sm:$0xf]  ;;  %v2853_v2 = vld [vmem:[#allocation5 + $0x338] sm:$0xf0]  ;;  %v3336_v34 = vor.u32 %v3814_v24, %v3333_v25 }
  0xe6   :  { %v1771_v48 = vadd.f32 %v1770_v43, %v1758_v40  ;;  %v3746_v35 = vld [vmem:[#allocation5 + $0x4cc] sm:$0xf]  ;;  %v3189_v39 = vld [vmem:[#allocation5 + $0x5d8] sm:$0xf0] }
  0xe7   :  { %2023 = vmatpush.bf16.msra.mxu2 %v2792_v3  ;;  %2036 = vmatpush.bf16.msra.mxu3 %v2920_v7  ;;  %v1783_v0 = vpop.f32.mrf.mxu3  ;;  %v1746_v4 = vpop.f32.mrf.mxu0  ;;  %v2453_v7 = vld [vmem:[#allocation5 + $0x18] sm:$0xf0]  ;;  %v3778_v37 = vld [vmem:[#allocation5 + $0x5cc] sm:$0xf] }
  0xe8   :  { %v4117_v3 = vadd.f32 %v1783_v0, %v1771_v48  ;;  %v2456_v22 = vor.u32 %v3594_v6, %v2453_v7  ;;  %v3810_v40 = vld [vmem:[#allocation5 + $0x6cc] sm:$0xf]  ;;  %v3317_v41 = vld [vmem:[#allocation5 + $0x6d8] sm:$0xf0]  ;;  %v3192_v48 = vor.u32 %v3778_v37, %v3189_v39 }
  0xe9   :  { %1998 = vmatpush.bf16.msra.mxu0 %v2520_v14  ;;  %2011 = vmatpush.bf16.msra.mxu1 %v2648_v16  ;;  %v1759_v8 = vpop.f32.mrf.mxu1  ;;  %v2856_v14 = vor.u32 %v3694_v1, %v2853_v2  ;;  %v3690_v16 = vld [vmem:[#allocation5 + $0x30c] sm:$0xf]  ;;  %v3445_v43 = vld [vmem:[#allocation5 + $0x7d8] sm:$0xf0] }
  0xea   :  { %v3842_v42 = vld [vmem:[#allocation5 + $0x7cc] sm:$0xf]  ;;  %v3045_v52 = vld [vmem:[#allocation5 + $0x4b8] sm:$0xf0] }
  0xeb   :  { %2024 = vmatpush.bf16.msra.mxu2 %v2776_v17  ;;  %2037 = vmatpush.bf16.msra.mxu3 %v2904_v21  ;;  %v2837_v17 = vld [vmem:[#allocation5 + $0x318] sm:$0xf0]  ;;  %v3774_v53 = vld [vmem:[#allocation5 + $0x5ac] sm:$0xf]  ;;  %v3448_v57 = vor.u32 %v3842_v42, %v3445_v43 }
  0xec   :  { %v2840_v30 = vor.u32 %v3690_v16, %v2837_v17  ;;  %v3806_v61 = vld [vmem:[#allocation5 + $0x6ac] sm:$0xf]  ;;  %v3301_v62 = vld [vmem:[#allocation5 + $0x6b8] sm:$0xf0] }
  0xed   :  { %1999 = vmatpush.bf16.msra.mxu0 %v2504_v28  ;;  %2012 = vmatpush.bf16.msra.mxu1 %v2632_v31  ;;  %v1772_v21 = vpop.f32.mrf.mxu2  ;;  %v3846_v28 = vld [vmem:[#allocation5 + $0x7ec] sm:$0xf]  ;;  %v3080_v31 = vor.u32 %v3750_v18, %v3077_v19  ;;  %v3429_v0 = vld [vmem:[#allocation5 + $0x7b8] sm:$0xf0]  ;;  %v3304_v4 = vor.u32 %v3806_v61, %v3301_v62  ;;  %v396_v61 = vperm.slane %v4110_v56, 1 }
  0xee   :  { %v3464_v38 = vor.u32 %v3846_v28, %v3461_v29  ;;  %v3838_v63 = vld [vmem:[#allocation5 + $0x7ac] sm:$0xf]  ;;  %v3029_v6 = vld [vmem:[#allocation5 + $0x498] sm:$0xf0] }
  0xef   :  { %2025 = vmatpush.bf16.msra.mxu2 %v2760_v32  ;;  %2038 = vmatpush.bf16.msra.mxu3 %v2888_v36  ;;  %v1785_v32 = vpop.f32.mrf.mxu3  ;;  %v3061_v36 = vld [vmem:[#allocation5 + $0x4d8] sm:$0xf0]  ;;  %v3432_v7 = vor.u32 %v3838_v63, %v3429_v0  ;;  %v3834_v11 = vld [vmem:[#allocation5 + $0x78c] sm:$0xf] }
  0xf0   :  { %v3157_v8 = vld [vmem:[#allocation5 + $0x598] sm:$0xf0]  ;;  %v3766_v16 = vld [vmem:[#allocation5 + $0x56c] sm:$0xf] }
  0xf1   :  { %2000 = vmatpush.bf16.msra.mxu0 %v2488_v45  ;;  %2013 = vmatpush.bf16.msra.mxu1 %v2616_v49  ;;  %v3064_v45 = vor.u32 %v3746_v35, %v3061_v36  ;;  %v3320_v49 = vor.u32 %v3810_v40, %v3317_v41  ;;  %v3013_v15 = vld [vmem:[#allocation5 + $0x478] sm:$0xf0]  ;;  %v3798_v20 = vld [vmem:[#allocation5 + $0x66c] sm:$0xf] }
  0xf2   :  { %v3141_v19 = vld [vmem:[#allocation5 + $0x578] sm:$0xf0]  ;;  %v3762_v29 = vld [vmem:[#allocation5 + $0x54c] sm:$0xf] }
  0xf3   :  { %2026 = vmatpush.bf16.msra.mxu2 %v2744_v50  ;;  %2039 = vmatpush.bf16.msra.mxu3 %v2872_v60  ;;  %v3742_v50 = vld [vmem:[#allocation5 + $0x4ac] sm:$0xf]  ;;  %v3173_v60 = vld [vmem:[#allocation5 + $0x5b8] sm:$0xf0]  ;;  %v3144_v25 = vor.u32 %v3766_v16, %v3141_v19  ;;  %v3855_v19 = vld [vmem:[#allocation8 + $0x30] sm:$0xff] }
  0xf4   :  { %v3048_v1 = vor.u32 %v3742_v50, %v3045_v52  ;;  %v3176_v2 = vor.u32 %v3774_v53, %v3173_v60  ;;  %v3269_v21 = vld [vmem:[#allocation5 + $0x678] sm:$0xf0]  ;;  %v3826_v36 = vld [vmem:[#allocation5 + $0x74c] sm:$0xf] }
  0xf5   :  { %2001 = vmatpush.bf16.msra.mxu0 %v2472_v5  ;;  %2014 = vmatpush.bf16.msra.mxu1 %v2600_v9  ;;  %v3738_v5 = vld [vmem:[#allocation5 + $0x48c] sm:$0xf]  ;;  %v3397_v23 = vld [vmem:[#allocation5 + $0x778] sm:$0xf0] }
  0xf6   :  { %v3802_v9 = vld [vmem:[#allocation5 + $0x68c] sm:$0xf]  ;;  %v2997_v28 = vld [vmem:[#allocation5 + $0x458] sm:$0xf0] }
  0xf7   :  { %2027 = vmatpush.bf16.msra.mxu2 %v2728_v10  ;;  %2040 = vmatpush.bf16.msra.mxu3 %v2856_v14  ;;  %v3285_v10 = vld [vmem:[#allocation5 + $0x698] sm:$0xf0]  ;;  %v3734_v14 = vld [vmem:[#allocation5 + $0x46c] sm:$0xf] }
  0xf8   :  { %v3288_v13 = vor.u32 %v3802_v9, %v3285_v10  ;;  %v3016_v24 = vor.u32 %v3734_v14, %v3013_v15  ;;  %v3125_v32 = vld [vmem:[#allocation5 + $0x558] sm:$0xf0]  ;;  %v3726_v42 = vld [vmem:[#allocation5 + $0x42c] sm:$0xf] }
  0xf9   :  { %2002 = vmatpush.bf16.msra.mxu0 %v2456_v22  ;;  %2015 = vmatpush.bf16.msra.mxu1 %v2584_v26  ;;  %v4123_v12 = vpop.f32.mrf.mxu0  ;;  %v4125_v17 = vpop.f32.mrf.mxu1  ;;  %v3830_v22 = vld [vmem:[#allocation5 + $0x76c] sm:$0xf]  ;;  %v3272_v26 = vor.u32 %v3798_v20, %v3269_v21  ;;  %v3381_v37 = vld [vmem:[#allocation5 + $0x758] sm:$0xf0]  ;;  %v3128_v40 = vor.u32 %v3762_v29, %v3125_v32  ;;  %v3851_v32 = vld [vmem:[#allocation8 + $0x10] sm:$0xff] }
  0xfa   :  { %v2981_v43 = vld [vmem:[#allocation5 + $0x438] sm:$0xf0]  ;;  %v3790_v52 = vld [vmem:[#allocation5 + $0x62c] sm:$0xf] }
  0xfb   :  { %2028 = vmatpush.bf16.msra.mxu2 %v2712_v27  ;;  %2041 = vmatpush.bf16.msra.mxu3 %v2840_v30  ;;  %v3730_v27 = vld [vmem:[#allocation5 + $0x44c] sm:$0xf]  ;;  %v3109_v50 = vld [vmem:[#allocation5 + $0x538] sm:$0xf0]  ;;  %v2984_v62 = vor.u32 %v3726_v42, %v2981_v43 }
  0xfc   :  { %2003 = vmatmul.bf16.vlgmr.msra.gmra.mxu0 %v4076_v47  ;;  %2016 = vmatmul.bf16.vlgmr.msra.gmra.mxu1 %v4080_v55  ;;  %v3413_v47 = vld [vmem:[#allocation5 + $0x798] sm:$0xf0]  ;;  %v3818_v10 = vld [vmem:[#allocation5 + $0x70c] sm:$0xf] }
  0xfd   :  { %2047 = vmatpush.bf16.msrb.mxu0 %v3080_v31  ;;  %2060 = vmatpush.bf16.msrb.mxu1 %v3208_v33  ;;  %v3416_v18 = vor.u32 %v3834_v11, %v3413_v47  ;;  %v3400_v31 = vor.u32 %v3830_v22, %v3397_v23  ;;  %v3794_v33 = vld [vmem:[#allocation5 + $0x64c] sm:$0xf]  ;;  %v3237_v53 = vld [vmem:[#allocation5 + $0x638] sm:$0xf0]  ;;  %v1797_v47 = vadd.f32 %v4123_v12, %v396_v61  ;;  %v3863_v12 = vld [vmem:[#allocation8 + $0x70] sm:$0xff] }
  0xfe   :  { %2029 = vmatmul.bf16.vlgmr.msra.gmra.mxu2 %v4074_v46  ;;  %2042 = vmatmul.bf16.vlgmr.msra.gmra.mxu3 %v4078_v51  ;;  %v3770_v46 = vld [vmem:[#allocation5 + $0x58c] sm:$0xf]  ;;  %v3032_v51 = vor.u32 %v3738_v5, %v3029_v6  ;;  %v3365_v60 = vld [vmem:[#allocation5 + $0x738] sm:$0xf0]  ;;  %v3240_v0 = vor.u32 %v3790_v52, %v3237_v53  ;;  %v3867_v61 = vld [vmem:[#allocation8 + $0x90] sm:$0xff] }
  0xff   :  { %2073 = vmatpush.bf16.msrb.mxu2 %v3336_v34  ;;  %2086 = vmatpush.bf16.msrb.mxu3 %v3464_v38  ;;  %v3160_v55 = vor.u32 %v3770_v46, %v3157_v8  ;;  %v3253_v34 = vld [vmem:[#allocation5 + $0x658] sm:$0xf0]  ;;  %v3000_v38 = vor.u32 %v3730_v27, %v2997_v28  ;;  %v3862_v23 = vld [vmem:[#allocation8 + $0x68] sm:$0xff]  ;;  %v3871_v28 = vld [vmem:[#allocation8 + $0xb0] sm:$0xff] }
 0x100   :  { %v3256_v41 = vor.u32 %v3794_v33, %v3253_v34  ;;  %v3093_v46 = vld [vmem:[#allocation5 + $0x518] sm:$0xf0] }
 0x101   :  { %2048 = vmatpush.bf16.msrb.mxu0 %v3064_v45  ;;  %2061 = vmatpush.bf16.msrb.mxu1 %v3192_v48  ;;  %v4127_v30 = vpop.f32.mrf.mxu2  ;;  %v4129_v35 = vpop.f32.mrf.mxu3  ;;  %v3758_v45 = vld [vmem:[#allocation5 + $0x52c] sm:$0xf]  ;;  %v3221_v8 = vld [vmem:[#allocation5 + $0x618] sm:$0xf0] }
 0x102   :  { %v1798_v39 = vpop.f32.mrf.mxu0  ;;  %v1811_v48 = vpop.f32.mrf.mxu1  ;;  %v3112_v63 = vor.u32 %v3758_v45, %v3109_v50  ;;  %v3349_v11 = vld [vmem:[#allocation5 + $0x718] sm:$0xf0]  ;;  %v3857_v50 = vld [vmem:[#allocation8 + $0x40] sm:$0xff] }
 0x103   :  { %2074 = vmatpush.bf16.msrb.mxu2 %v3320_v49  ;;  %2087 = vmatpush.bf16.msrb.mxu3 %v3448_v57  ;;  %v3384_v49 = vor.u32 %v3826_v36, %v3381_v37  ;;  %v3822_v57 = vld [vmem:[#allocation5 + $0x72c] sm:$0xf]  ;;  %v3352_v14 = vor.u32 %v3818_v10, %v3349_v11  ;;  %v3856_v15 = vld [vmem:[#allocation8 + $0x38] sm:$0xff]  ;;  %v3859_v36 = vld [vmem:[#allocation8 + $0x50] sm:$0xff] }
 0x104   :  { %v3368_v6 = vor.u32 %v3822_v57, %v3365_v60  ;;  %v3864_v16 = vld [vmem:[#allocation8 + $0x78] sm:$0xff]  ;;  %v3850_v39 = vld [vmem:[#allocation8 + $0x8] sm:$0xff]  ;;  %v3849_v48 = vld [vmem:[#allocation8] sm:$0xff] }
 0x105   :  { %2049 = vmatpush.bf16.msrb.mxu0 %v3048_v1  ;;  %2062 = vmatpush.bf16.msrb.mxu1 %v3176_v2  ;;  %v3722_v1 = vld [vmem:[#allocation5 + $0x40c] sm:$0xf]  ;;  %v2965_v2 = vld [vmem:[#allocation5 + $0x418] sm:$0xf0] }
 0x106   :  { %v3872_v20 = vld [vmem:[#allocation8 + $0xb8] sm:$0xff] }
 0x107   :  { %2075 = vmatpush.bf16.msrb.mxu2 %v3304_v4  ;;  %2088 = vmatpush.bf16.msrb.mxu3 %v3432_v7  ;;  %v3754_v4 = vld [vmem:[#allocation5 + $0x50c] sm:$0xf] }
 0x108   :  { %v3786_v7 = vld [vmem:[#allocation5 + $0x60c] sm:$0xf] }
 0x109   :  { %2050 = vmatpush.bf16.msrb.mxu0 %v3032_v51  ;;  %2063 = vmatpush.bf16.msrb.mxu1 %v3160_v55  ;;  %v1824_v5 = vpop.f32.mrf.mxu2  ;;  %v1837_v9 = vpop.f32.mrf.mxu3  ;;  %v2968_v51 = vor.u32 %v3722_v1, %v2965_v2  ;;  %v3096_v55 = vor.u32 %v3754_v4, %v3093_v46  ;;  %v3865_v4 = vld [vmem:[#allocation8 + $0x80] sm:$0xff] }
 0x10b   :  { %2076 = vmatpush.bf16.msrb.mxu2 %v3288_v13  ;;  %2089 = vmatpush.bf16.msrb.mxu3 %v3416_v18  ;;  %v3224_v13 = vor.u32 %v3786_v7, %v3221_v8  ;;  %v1810_v18 = vadd.f32 %v4125_v17, %v1797_v47  ;;  %v3854_v17 = vld [vmem:[#allocation8 + $0x28] sm:$0xff] }
 0x10d   :  { %2051 = vmatpush.bf16.msrb.mxu0 %v3016_v24  ;;  %2064 = vmatpush.bf16.msrb.mxu1 %v3144_v25  ;;  %v1823_v21 = vadd.f32 %v4127_v30, %v1810_v18  ;;  %v3853_v24 = vld [vmem:[#allocation8 + $0x20] sm:$0xff] }
 0x10f   :  { %2077 = vmatpush.bf16.msrb.mxu2 %v3272_v26  ;;  %2090 = vmatpush.bf16.msrb.mxu3 %v3400_v31  ;;  %v1836_v22 = vadd.f32 %v4129_v35, %v1823_v21  ;;  %v3870_v31 = vld [vmem:[#allocation8 + $0xa8] sm:$0xff]  ;;  %v3869_v35 = vld [vmem:[#allocation8 + $0xa0] sm:$0xff] }
 0x111   :  { %2052 = vmatpush.bf16.msrb.mxu0 %v3000_v38  ;;  %2065 = vmatpush.bf16.msrb.mxu1 %v3128_v40  ;;  %v3868_v40 = vld [vmem:[#allocation8 + $0x98] sm:$0xff] }
 0x113   :  { %2078 = vmatpush.bf16.msrb.mxu2 %v3256_v41  ;;  %2091 = vmatpush.bf16.msrb.mxu3 %v3384_v49  ;;  %v3858_v41 = vld [vmem:[#allocation8 + $0x48] sm:$0xff]  ;;  %v2099_v49 = vmax.f32 %v4117_v3, 0.0  ;;  %v397_v3 = vperm.slane %v4110_v56, 2 }
 0x115   :  { %2053 = vmatpush.bf16.msrb.mxu0 %v2984_v62  ;;  %2066 = vmatpush.bf16.msrb.mxu1 %v3112_v63  ;;  %v2103_v53 = vpack.c.bf16 %v2099_v49, %v2099_v49 }
 0x117   :  { %2079 = vmatpush.bf16.msrb.mxu2 %v3240_v0  ;;  %2092 = vmatpush.bf16.msrb.mxu3 %v3368_v6  ;;  %v3866_v0 = vld [vmem:[#allocation8 + $0x88] sm:$0xff] }
 0x119   :  { %2054 = vmatpush.bf16.msrb.mxu0 %v2968_v51  ;;  %2067 = vmatpush.bf16.msrb.mxu1 %v3096_v55  ;;  %v1848_v25 = vpop.f32.mrf.mxu0  ;;  %v1861_v27 = vpop.f32.mrf.mxu1 }
 0x11a   :  { %v1849_v26 = vadd.f32 %v1848_v25, %v1836_v22  ;;  %v3876_v25 = vld [vmem:[#allocation8 + $0xd8] sm:$0xff] }
 0x11b   :  { %2080 = vmatpush.bf16.msrb.mxu2 %v3224_v13  ;;  %2093 = vmatpush.bf16.msrb.mxu3 %v3352_v14 }
 0x11c   :  { %2055 = vmatmul.bf16.vlgmr.msrb.gmra.mxu0 %v4088_v54  ;;  %2068 = vmatmul.bf16.vlgmr.msrb.gmra.mxu1 %v4092_v59  ;;  %v3861_v54 = vld [vmem:[#allocation8 + $0x60] sm:$0xff]  ;;  %v1862_v59 = vadd.f32 %v1861_v27, %v1849_v26 }
 0x11d   :  { %2367 = vmatpush.bf16.msra.mxu0 %v3856_v15  ;;  %2380 = vmatpush.bf16.msra.mxu1 %v3864_v16  ;;  %v3880_v15 = vld [vmem:[#allocation8 + $0xf8] sm:$0xff] }
 0x11e   :  { %2081 = vmatmul.bf16.vlgmr.msrb.gmra.mxu2 %v4086_v44  ;;  %2094 = vmatmul.bf16.vlgmr.msrb.gmra.mxu3 %v4090_v58  ;;  %v3852_v44 = vld [vmem:[#allocation8 + $0x18] sm:$0xff] }
 0x11f   :  { %2393 = vmatpush.bf16.msra.mxu2 %v3872_v20  ;;  %v3860_v58 = vld [vmem:[#allocation8 + $0x58] sm:$0xff]  ;;  %2406 = vmatpush.bf16.msra.mxu3 %v3880_v15 }
 0x121   :  { %2368 = vmatpush.bf16.msra.mxu0 %v3855_v19  ;;  %2381 = vmatpush.bf16.msra.mxu1 %v3863_v12  ;;  %v1874_v29 = vpop.f32.mrf.mxu2  ;;  %v1887_v30 = vpop.f32.mrf.mxu3  ;;  %v3879_v19 = vld [vmem:[#allocation8 + $0xf0] sm:$0xff] }
 0x122   :  { %v1875_v33 = vadd.f32 %v1874_v29, %v1862_v59  ;;  %v1850_v34 = vpop.f32.mrf.mxu0  ;;  %v1863_v37 = vpop.f32.mrf.mxu1  ;;  %v3873_v29 = vld [vmem:[#allocation8 + $0xc0] sm:$0xff] }
 0x123   :  { %2394 = vmatpush.bf16.msra.mxu2 %v3871_v28  ;;  %2407 = vmatpush.bf16.msra.mxu3 %v3879_v19  ;;  %v3874_v28 = vld [vmem:[#allocation8 + $0xc8] sm:$0xff] }
 0x124   :  { %v1888_v38 = vadd.f32 %v1887_v30, %v1875_v33 }
 0x125   :  { %2369 = vmatpush.bf16.msra.mxu0 %v3854_v17  ;;  %2382 = vmatpush.bf16.msra.mxu1 %v3862_v23  ;;  %v3878_v17 = vld [vmem:[#allocation8 + $0xe8] sm:$0xff] }
 0x126   :  { %v2100_v45 = vmax.f32 %v1888_v38, 0.0 }
 0x127   :  { %2395 = vmatpush.bf16.msra.mxu2 %v3870_v31  ;;  %2408 = vmatpush.bf16.msra.mxu3 %v3878_v17  ;;  %v398_v31 = vperm.slane %v4110_v56, 3 }
 0x128   :  { %v2104_v52 = vpack.c.bf16 %v2100_v45, %v2100_v45 }
 0x129   :  { %2370 = vmatpush.bf16.msra.mxu0 %v3853_v24  ;;  %2383 = vmatpush.bf16.msra.mxu1 %v3861_v54  ;;  %v1876_v42 = vpop.f32.mrf.mxu2  ;;  %v1889_v43 = vpop.f32.mrf.mxu3  ;;  %v3877_v24 = vld [vmem:[#allocation8 + $0xe0] sm:$0xff]  ;;  %v3875_v54 = vld [vmem:[#allocation8 + $0xd0] sm:$0xff] }
 0x12b   :  { %2396 = vmatpush.bf16.msra.mxu2 %v3869_v35  ;;  %2409 = vmatpush.bf16.msra.mxu3 %v3877_v24 }
 0x12d   :  { %2371 = vmatpush.bf16.msra.mxu0 %v3852_v44  ;;  %2384 = vmatpush.bf16.msra.mxu1 %v3860_v58 }
 0x12f   :  { %2397 = vmatpush.bf16.msra.mxu2 %v3868_v40  ;;  %2410 = vmatpush.bf16.msra.mxu3 %v3876_v25 }
 0x131   :  { %2372 = vmatpush.bf16.msra.mxu0 %v3851_v32  ;;  %2385 = vmatpush.bf16.msra.mxu1 %v3859_v36 }
 0x133   :  { %2398 = vmatpush.bf16.msra.mxu2 %v3867_v61  ;;  %2411 = vmatpush.bf16.msra.mxu3 %v3875_v54 }
 0x135   :  { %2373 = vmatpush.bf16.msra.mxu0 %v3850_v39  ;;  %2386 = vmatpush.bf16.msra.mxu1 %v3858_v41 }
 0x137   :  { %2399 = vmatpush.bf16.msra.mxu2 %v3866_v0  ;;  %2412 = vmatpush.bf16.msra.mxu3 %v3874_v28 }
 0x139   :  { %2374 = vmatpush.bf16.msra.mxu0 %v3849_v48  ;;  %2387 = vmatpush.bf16.msra.mxu1 %v3857_v50  ;;  %v1900_v57 = vpop.f32.mrf.mxu0  ;;  %v1913_v60 = vpop.f32.mrf.mxu1 }
 0x13a   :  { %v1901_v46 = vadd.f32 %v1900_v57, %v397_v3 }
 0x13b   :  { %2400 = vmatpush.bf16.msra.mxu2 %v3865_v4  ;;  %2413 = vmatpush.bf16.msra.mxu3 %v3873_v29 }
 0x13c   :  { %2375 = vmatmul.bf16.vlgmr.msra.gmra.mxu0 %v2103_v53  ;;  %2388 = vmatmul.bf16.vlgmr.msra.gmra.mxu1 %v2104_v52  ;;  %v1914_v7 = vadd.f32 %v1913_v60, %v1901_v46  ;;  %v3892_v60 = vld [vmem:[%s4153_s4] ss:$0 sm:$0xff] }
 0x141   :  { %v1926_v62 = vpop.f32.mrf.mxu2  ;;  %v1939_v63 = vpop.f32.mrf.mxu3 }
 0x142   :  { %v1902_v1 = vpop.f32.mrf.mxu0  ;;  %v1915_v2 = vpop.f32.mrf.mxu1  ;;  %v1927_v8 = vadd.f32 %v1926_v62, %v1914_v7 }
 0x144   :  { %v1940_v9 = vadd.f32 %v1939_v63, %v1927_v8 }
 0x149   :  { %v1928_v5 = vpop.f32.mrf.mxu2  ;;  %v1941_v6 = vpop.f32.mrf.mxu3 }
 0x159   :  { %v1952_v10 = vpop.f32.mrf.mxu0  ;;  %v1965_v47 = vpop.f32.mrf.mxu1 }
 0x15a   :  { %v1953_v11 = vadd.f32 %v1952_v10, %v1940_v9 }
 0x15c   :  { %v1966_v51 = vadd.f32 %v1965_v47, %v1953_v11 }
 0x161   :  { %v1978_v55 = vpop.f32.mrf.mxu2  ;;  %v1991_v14 = vpop.f32.mrf.mxu3 }
 0x162   :  { %v1979_v13 = vadd.f32 %v1978_v55, %v1966_v51  ;;  %v1954_v18 = vpop.f32.mrf.mxu0  ;;  %v1967_v20 = vpop.f32.mrf.mxu1 }
 0x164   :  { %v1992_v16 = vadd.f32 %v1991_v14, %v1979_v13 }
 0x166   :  { %v2101_v12 = vmax.f32 %v1992_v16, 0.0 }
 0x168   :  { %v2105_v21 = vpack.c.bf16 %v2101_v12, %v2101_v12 }
 0x169   :  { %v1980_v22 = vpop.f32.mrf.mxu2  ;;  %v1993_v23 = vpop.f32.mrf.mxu3 }
 0x16a   :  { %2401 = vmatmul.bf16.vlgmr.msra.gmra.mxu2 %v2105_v21 }
 0x179   :  { %v2004_v26 = vpop.f32.mrf.mxu0  ;;  %v2017_v27 = vpop.f32.mrf.mxu1 }
 0x17a   :  { %v2005_v34 = vadd.f32 %v2004_v26, %v398_v31 }
 0x17c   :  { %v2018_v35 = vadd.f32 %v2017_v27, %v2005_v34 }
 0x181   :  { %v2030_v44 = vpop.f32.mrf.mxu2  ;;  %v2043_v59 = vpop.f32.mrf.mxu3 }
 0x182   :  { %v2006_v58 = vpop.f32.mrf.mxu0  ;;  %v2019_v30 = vpop.f32.mrf.mxu1  ;;  %v2031_v36 = vadd.f32 %v2030_v44, %v2018_v35 }
 0x184   :  { %v2044_v37 = vadd.f32 %v2043_v59, %v2031_v36 }
 0x189   :  { %v2032_v32 = vpop.f32.mrf.mxu2  ;;  %v2045_v33 = vpop.f32.mrf.mxu3 }
 0x199   :  { %v2056_v38 = vpop.f32.mrf.mxu0  ;;  %v2069_v39 = vpop.f32.mrf.mxu1 }
 0x19a   :  { %v2057_v40 = vadd.f32 %v2056_v38, %v2044_v37 }
 0x19c   :  { %v2070_v41 = vadd.f32 %v2069_v39, %v2057_v40 }
 0x1a1   :  { %v2082_v42 = vpop.f32.mrf.mxu2  ;;  %v2095_v45 = vpop.f32.mrf.mxu3 }
 0x1a2   :  { %v2083_v43 = vadd.f32 %v2082_v42, %v2070_v41  ;;  %v2058_v48 = vpop.f32.mrf.mxu0  ;;  %v2071_v49 = vpop.f32.mrf.mxu1 }
 0x1a4   :  { %v2096_v50 = vadd.f32 %v2095_v45, %v2083_v43 }
 0x1a6   :  { %v2102_v52 = vmax.f32 %v2096_v50, 0.0 }
 0x1a8   :  { %v2106_v53 = vpack.c.bf16 %v2102_v52, %v2102_v52 }
 0x1a9   :  { %v2084_v57 = vpop.f32.mrf.mxu2  ;;  %v2097_v56 = vpop.f32.mrf.mxu3 }
 0x1aa   :  { %2414 = vmatmul.bf16.vlgmr.msra.gmra.mxu3 %v2106_v53 }
 0x1b9   :  { %v2376_v61 = vpop.f32.mrf.mxu0  ;;  %v2389_v63 = vpop.f32.mrf.mxu1 }
 0x1ba   :  { %v2377_v62 = vadd.f32 %v3892_v60, %v2376_v61 }
 0x1bc   :  { %v2390_v0 = vadd.f32 %v2389_v63, %v2377_v62 }
 0x1c1   :  { %v2378_v1 = vpop.f32.mrf.mxu0  ;;  %v2391_v2 = vpop.f32.mrf.mxu1 }
 0x1ed   :  { %v2402_v4 = vpop.f32.mrf.mxu2 }
 0x1ee   :  { %v2403_v5 = vadd.f32 %v2402_v4, %v2390_v0 }
 0x1f5   :  { %v2404_v3 = vpop.f32.mrf.mxu2 }
 0x22d   :  { %v2415_v6 = vpop.f32.mrf.mxu3 }
 0x22e   :  { %v2416_v46 = vadd.f32 %v2415_v6, %v2403_v5 }
 0x230   :  { %2419 = vst [vmem:[#allocation10] sm:$0xff] %v2416_v46 }
 0x235   :  { %v2417_v7 = vpop.f32.mrf.mxu3 }
 0x236   :  { %2423 = vsyncadd [#allocation4], 96  ;;  %s2426_s17 = sshll.u32 %s4154_s5, 4  ;;  %s4029_s18 = smov [#allocation10]   ;;  %s2427_s17 = int_to_ptr.hbm [resolvable:$true] %s2426_s17 }
 0x237   :  { %s2424_s4 = sshll.u32 %s4029_s18, 4  ;;  %s4030_s19 = smov 32   ;;  %s2425_s4 = int_to_ptr.vmem [resolvable:$true] %s2424_s4 }
 0x238   :  { %s4031_s20 = smov 2  }
 0x239   :  { %2432 = dma.vmem_to_hbm [thread:$0]  %s2425_s4, 32, %s2427_s17, [#allocation4], %s4030_s19, %s4030_s19, %s4031_s20  }
 0x23a   :  { %4019 = dma.done.wait [#allocation4], 128  }
 0x23b   :  { %4020 = vsyncadd [#allocation4], 4294967168 }
 0x23c   :  { %2437 = vsyncpa [#allocation3], 1 }
 0x23d   :  { %2438 = vsyncpa [#allocation6], 1 }
 0x23e   :  { %2439 = vsyncpa [#allocation9], 1 }
 0x23f   :  { %2440 = vsyncpa [#allocation4], 1 }

// kernel: tpu_custom_call.1
= control target key start
LH: loop header
LB: loop body
LE: loop exit
PB: predicated region body
PF: predicated region fallthrough
CT: control target
= control target key end

     0   :  { %10 = vsyncpa [#allocation3], 0  ;;  %s4149_s0 = inlined_call_operand.hbm [shape: f32[2,1024], index: 0, kind: input, shape index: {}]   ;;  %s4150_s1 = inlined_call_operand.hbm [shape: bf16[1024,512], index: 1, kind: input, shape index: {}]   ;;  %s4151_s2 = inlined_call_operand.hbm [shape: f32[1,512], index: 2, kind: input, shape index: {}]   ;;  %s4152_s3 = inlined_call_operand.hbm [shape: bf16[512,128], index: 3, kind: input, shape index: {}]   ;;  %s4153_s4 = inlined_call_operand.vmem [shape: f32[1,128], index: 4, kind: input, shape index: {}]   ;;  %s4154_s5 = inlined_call_operand.hbm [shape: f32[2,128], index: 5, kind: output, shape index: {}]  }
   0x1   :  { %11 = vsyncpa [#allocation6], 0 }
   0x2   :  { %12 = vsyncpa [#allocation9], 0 }
   0x3   :  { %13 = vsyncpa [#allocation4], 0 }
   0x4   :  { %17 = vsyncadd [#allocation3], 768  ;;  %s31_s20 = sshll.u32 %s4150_s1, 4  ;;  %s4021_s21 = smov [#allocation5]   ;;  %s32_s20 = int_to_ptr.hbm [resolvable:$true] %s31_s20 }
   0x5   :  { %s33_s22 = sshll.u32 %s4021_s21, 4  ;;  %s18_s25 = sshll.u32 %s4149_s0, 4  ;;  %s34_s22 = int_to_ptr.vmem [resolvable:$true] %s33_s22  ;;  %s19_s25 = int_to_ptr.hbm [resolvable:$true] %s18_s25 }
   0x6   :  { %s4022_s26 = smov 256   ;;  %s4023_s27 = smov 16  }
   0x7   :  { %39 = dma.hbm_to_vmem [thread:$0]  %s32_s20, 32768, %s34_s22, [#allocation6], %s4022_s26, %s4022_s26, %s4023_s27  }
   0x8   :  { %s4024_s28 = smov [#allocation2]   ;;  %s45_s7 = sshll.u32 %s4151_s2, 4  ;;  %s46_s7 = int_to_ptr.hbm [resolvable:$true] %s45_s7 }
   0x9   :  { %s20_s29 = sshll.u32 %s4024_s28, 4  ;;  %s55_s9 = sshll.u32 %s4152_s3, 4  ;;  %s21_s29 = int_to_ptr.vmem [resolvable:$true] %s20_s29  ;;  %s56_s9 = int_to_ptr.hbm [resolvable:$true] %s55_s9 }
   0xa   :  { %26 = dma.hbm_to_vmem [thread:$0]  %s19_s25, 256, %s21_s29, [#allocation3], %s4022_s26, %s4022_s26, %s4023_s27  }
   0xb   :  { %s4025_s10 = smov [#allocation7]   ;;  %s4026_s0 = smov [#allocation8]  }
   0xc   :  { %s47_s11 = sshll.u32 %s4025_s10, 4  ;;  %s57_s12 = sshll.u32 %s4026_s0, 4  ;;  %s48_s11 = int_to_ptr.vmem [resolvable:$true] %s47_s11  ;;  %s58_s12 = int_to_ptr.vmem [resolvable:$true] %s57_s12 }
   0xd   :  { %50 = dma.hbm_to_vmem [thread:$0]  %s46_s7, 64, %s48_s11, [#allocation6]  }
   0xe   :  { %s4027_s13 = smov 64   ;;  %s4028_s14 = smov 4  }
   0xf   :  { %63 = dma.hbm_to_vmem [thread:$0]  %s56_s9, 4096, %s58_s12, [#allocation9], %s4027_s13, %s4027_s13, %s4028_s14  }
  0x10   :  { %4013 = dma.done.wait [#allocation3], 1024  }
  0x11   :  { %4014 = vsyncadd [#allocation3], 4294966272 }
  0x12   :  { %4015 = dma.done.wait [#allocation6], 32832  }
  0x13   :  { %4016 = vsyncadd [#allocation6], 4294934464 }
  0x14   :  { %4017 = dma.done.wait [#allocation9], 4096  }
  0x15   :  { %4018 = vsyncadd [#allocation9], 4294963200  ;;  %v2555_v0 = vld [vmem:[#allocation5 + $0xe0] sm:$0xf]  ;;  %v3623_v1 = vld [vmem:[#allocation5 + $0xec] sm:$0xf0] }
  0x16   :  { %v2683_v2 = vld [vmem:[#allocation5 + $0x1e0] sm:$0xf]  ;;  %v2556_v3 = vor.u32 %v3623_v1, %v2555_v0  ;;  %v3655_v4 = vld [vmem:[#allocation5 + $0x1ec] sm:$0xf0] }
  0x17   :  { %v2811_v5 = vld [vmem:[#allocation5 + $0x2e0] sm:$0xf]  ;;  %v3687_v6 = vld [vmem:[#allocation5 + $0x2ec] sm:$0xf0]  ;;  %v2684_v7 = vor.u32 %v3655_v4, %v2683_v2 }
  0x18   :  { %v2812_v8 = vor.u32 %v3687_v6, %v2811_v5  ;;  %v2939_v9 = vld [vmem:[#allocation5 + $0x3e0] sm:$0xf]  ;;  %v3719_v10 = vld [vmem:[#allocation5 + $0x3ec] sm:$0xf0]  ;;  %1683 = vmatpush.bf16.msra.mxu0 %v2556_v3 }
  0x19   :  { %v2539_v11 = vld [vmem:[#allocation5 + $0xc0] sm:$0xf]  ;;  %v2940_v12 = vor.u32 %v3719_v10, %v2939_v9  ;;  %v3619_v13 = vld [vmem:[#allocation5 + $0xcc] sm:$0xf0]  ;;  %1696 = vmatpush.bf16.msra.mxu1 %v2684_v7 }
  0x1a   :  { %v2667_v14 = vld [vmem:[#allocation5 + $0x1c0] sm:$0xf]  ;;  %v3651_v15 = vld [vmem:[#allocation5 + $0x1cc] sm:$0xf0]  ;;  %1709 = vmatpush.bf16.msra.mxu2 %v2812_v8  ;;  %v2540_v16 = vor.u32 %v3619_v13, %v2539_v11 }
  0x1b   :  { %v2668_v17 = vor.u32 %v3651_v15, %v2667_v14  ;;  %v2795_v18 = vld [vmem:[#allocation5 + $0x2c0] sm:$0xf]  ;;  %v3683_v19 = vld [vmem:[#allocation5 + $0x2cc] sm:$0xf0]  ;;  %1722 = vmatpush.bf16.msra.mxu3 %v2940_v12 }
  0x1c   :  { %v2923_v20 = vld [vmem:[#allocation5 + $0x3c0] sm:$0xf]  ;;  %v2796_v21 = vor.u32 %v3683_v19, %v2795_v18  ;;  %v3715_v22 = vld [vmem:[#allocation5 + $0x3cc] sm:$0xf0]  ;;  %1684 = vmatpush.bf16.msra.mxu0 %v2540_v16 }
  0x1d   :  { %v2523_v23 = vld [vmem:[#allocation5 + $0xa0] sm:$0xf]  ;;  %v3615_v24 = vld [vmem:[#allocation5 + $0xac] sm:$0xf0]  ;;  %v2924_v25 = vor.u32 %v3715_v22, %v2923_v20  ;;  %1697 = vmatpush.bf16.msra.mxu1 %v2668_v17 }
  0x1e   :  { %v2651_v26 = vld [vmem:[#allocation5 + $0x1a0] sm:$0xf]  ;;  %v3647_v27 = vld [vmem:[#allocation5 + $0x1ac] sm:$0xf0]  ;;  %v2524_v29 = vor.u32 %v3615_v24, %v2523_v23  ;;  %1710 = vmatpush.bf16.msra.mxu2 %v2796_v21 }
  0x1f   :  { %v2779_v28 = vld [vmem:[#allocation5 + $0x2a0] sm:$0xf]  ;;  %v3679_v30 = vld [vmem:[#allocation5 + $0x2ac] sm:$0xf0]  ;;  %v2652_v33 = vor.u32 %v3647_v27, %v2651_v26  ;;  %1723 = vmatpush.bf16.msra.mxu3 %v2924_v25 }
  0x20   :  { %v2907_v31 = vld [vmem:[#allocation5 + $0x3a0] sm:$0xf]  ;;  %v3711_v32 = vld [vmem:[#allocation5 + $0x3ac] sm:$0xf0]  ;;  %v2780_v34 = vor.u32 %v3679_v30, %v2779_v28  ;;  %1685 = vmatpush.bf16.msra.mxu0 %v2524_v29 }
  0x21   :  { %v2507_v35 = vld [vmem:[#allocation5 + $0x80] sm:$0xf]  ;;  %v3611_v36 = vld [vmem:[#allocation5 + $0x8c] sm:$0xf0]  ;;  %v2908_v38 = vor.u32 %v3711_v32, %v2907_v31  ;;  %1698 = vmatpush.bf16.msra.mxu1 %v2652_v33 }
  0x22   :  { %v2635_v37 = vld [vmem:[#allocation5 + $0x180] sm:$0xf]  ;;  %v3643_v39 = vld [vmem:[#allocation5 + $0x18c] sm:$0xf0]  ;;  %v2508_v44 = vor.u32 %v3611_v36, %v2507_v35  ;;  %1711 = vmatpush.bf16.msra.mxu2 %v2780_v34 }
  0x23   :  { %v2763_v40 = vld [vmem:[#allocation5 + $0x280] sm:$0xf]  ;;  %v3675_v41 = vld [vmem:[#allocation5 + $0x28c] sm:$0xf0]  ;;  %v2636_v45 = vor.u32 %v3643_v39, %v2635_v37  ;;  %1724 = vmatpush.bf16.msra.mxu3 %v2908_v38 }
  0x24   :  { %v2891_v42 = vld [vmem:[#allocation5 + $0x380] sm:$0xf]  ;;  %v3707_v43 = vld [vmem:[#allocation5 + $0x38c] sm:$0xf0]  ;;  %v2764_v46 = vor.u32 %v3675_v41, %v2763_v40  ;;  %1686 = vmatpush.bf16.msra.mxu0 %v2508_v44 }
  0x25   :  { %v2491_v47 = vld [vmem:[#allocation5 + $0x60] sm:$0xf]  ;;  %v3607_v48 = vld [vmem:[#allocation5 + $0x6c] sm:$0xf0]  ;;  %v2892_v50 = vor.u32 %v3707_v43, %v2891_v42  ;;  %1699 = vmatpush.bf16.msra.mxu1 %v2636_v45 }
  0x26   :  { %v2619_v49 = vld [vmem:[#allocation5 + $0x160] sm:$0xf]  ;;  %v3639_v51 = vld [vmem:[#allocation5 + $0x16c] sm:$0xf0]  ;;  %v2492_v56 = vor.u32 %v3607_v48, %v2491_v47  ;;  %1712 = vmatpush.bf16.msra.mxu2 %v2764_v46 }
  0x27   :  { %v2747_v52 = vld [vmem:[#allocation5 + $0x260] sm:$0xf]  ;;  %v3671_v53 = vld [vmem:[#allocation5 + $0x26c] sm:$0xf0]  ;;  %v2620_v57 = vor.u32 %v3639_v51, %v2619_v49  ;;  %1725 = vmatpush.bf16.msra.mxu3 %v2892_v50 }
  0x28   :  { %v2875_v54 = vld [vmem:[#allocation5 + $0x360] sm:$0xf]  ;;  %v3703_v55 = vld [vmem:[#allocation5 + $0x36c] sm:$0xf0]  ;;  %v2748_v58 = vor.u32 %v3671_v53, %v2747_v52  ;;  %1687 = vmatpush.bf16.msra.mxu0 %v2492_v56 }
  0x29   :  { %v2475_v59 = vld [vmem:[#allocation5 + $0x40] sm:$0xf]  ;;  %v3603_v60 = vld [vmem:[#allocation5 + $0x4c] sm:$0xf0]  ;;  %v2876_v62 = vor.u32 %v3703_v55, %v2875_v54  ;;  %1700 = vmatpush.bf16.msra.mxu1 %v2620_v57 }
  0x2a   :  { %v2603_v61 = vld [vmem:[#allocation5 + $0x140] sm:$0xf]  ;;  %v3635_v63 = vld [vmem:[#allocation5 + $0x14c] sm:$0xf0]  ;;  %v2476_v4 = vor.u32 %v3603_v60, %v2475_v59  ;;  %1713 = vmatpush.bf16.msra.mxu2 %v2748_v58 }
  0x2b   :  { %v2731_v0 = vld [vmem:[#allocation5 + $0x240] sm:$0xf]  ;;  %v3667_v1 = vld [vmem:[#allocation5 + $0x24c] sm:$0xf0]  ;;  %v2604_v5 = vor.u32 %v3635_v63, %v2603_v61  ;;  %1726 = vmatpush.bf16.msra.mxu3 %v2876_v62 }
  0x2c   :  { %v2859_v2 = vld [vmem:[#allocation5 + $0x340] sm:$0xf]  ;;  %v3699_v3 = vld [vmem:[#allocation5 + $0x34c] sm:$0xf0]  ;;  %v2732_v6 = vor.u32 %v3667_v1, %v2731_v0  ;;  %1688 = vmatpush.bf16.msra.mxu0 %v2476_v4 }
  0x2d   :  { %v2459_v7 = vld [vmem:[#allocation5 + $0x20] sm:$0xf]  ;;  %v3599_v8 = vld [vmem:[#allocation5 + $0x2c] sm:$0xf0]  ;;  %v2860_v10 = vor.u32 %v3699_v3, %v2859_v2  ;;  %1701 = vmatpush.bf16.msra.mxu1 %v2604_v5 }
  0x2e   :  { %v2587_v9 = vld [vmem:[#allocation5 + $0x120] sm:$0xf]  ;;  %v3631_v11 = vld [vmem:[#allocation5 + $0x12c] sm:$0xf0]  ;;  %v2460_v16 = vor.u32 %v3599_v8, %v2459_v7  ;;  %1714 = vmatpush.bf16.msra.mxu2 %v2732_v6 }
  0x2f   :  { %v2715_v12 = vld [vmem:[#allocation5 + $0x220] sm:$0xf]  ;;  %v3663_v13 = vld [vmem:[#allocation5 + $0x22c] sm:$0xf0]  ;;  %v2588_v19 = vor.u32 %v3631_v11, %v2587_v9  ;;  %1727 = vmatpush.bf16.msra.mxu3 %v2860_v10 }
  0x30   :  { %v2843_v14 = vld [vmem:[#allocation5 + $0x320] sm:$0xf]  ;;  %v3695_v15 = vld [vmem:[#allocation5 + $0x32c] sm:$0xf0]  ;;  %v2716_v20 = vor.u32 %v3663_v13, %v2715_v12  ;;  %1689 = vmatpush.bf16.msra.mxu0 %v2460_v16 }
  0x31   :  { %v2443_v17 = vld [vmem:[#allocation5] sm:$0xf]  ;;  %v3595_v18 = vld [vmem:[#allocation5 + $0xc] sm:$0xf0]  ;;  %v2844_v24 = vor.u32 %v3695_v15, %v2843_v14  ;;  %1702 = vmatpush.bf16.msra.mxu1 %v2588_v19 }
  0x32   :  { %v2571_v21 = vld [vmem:[#allocation5 + $0x100] sm:$0xf]  ;;  %v3627_v22 = vld [vmem:[#allocation5 + $0x10c] sm:$0xf0]  ;;  %v2444_v31 = vor.u32 %v3595_v18, %v2443_v17  ;;  %1715 = vmatpush.bf16.msra.mxu2 %v2716_v20 }
  0x33   :  { %v2699_v23 = vld [vmem:[#allocation5 + $0x200] sm:$0xf]  ;;  %v3659_v25 = vld [vmem:[#allocation5 + $0x20c] sm:$0xf0]  ;;  %v2572_v35 = vor.u32 %v3627_v22, %v2571_v21  ;;  %1728 = vmatpush.bf16.msra.mxu3 %v2844_v24 }
  0x34   :  { %v2827_v26 = vld [vmem:[#allocation5 + $0x300] sm:$0xf]  ;;  %v3691_v27 = vld [vmem:[#allocation5 + $0x30c] sm:$0xf0]  ;;  %v2700_v36 = vor.u32 %v3659_v25, %v2699_v23  ;;  %1690 = vmatpush.bf16.msra.mxu0 %v2444_v31 }
  0x35   :  { %v3067_v28 = vld [vmem:[#allocation5 + $0x4e0] sm:$0xf]  ;;  %v3751_v29 = vld [vmem:[#allocation5 + $0x4ec] sm:$0xf0]  ;;  %v2828_v39 = vor.u32 %v3691_v27, %v2827_v26  ;;  %1703 = vmatpush.bf16.msra.mxu1 %v2572_v35 }
  0x36   :  { %v3195_v30 = vld [vmem:[#allocation5 + $0x5e0] sm:$0xf]  ;;  %v3783_v32 = vld [vmem:[#allocation5 + $0x5ec] sm:$0xf0]  ;;  %v3068_v40 = vor.u32 %v3751_v29, %v3067_v28  ;;  %1716 = vmatpush.bf16.msra.mxu2 %v2700_v36 }
  0x37   :  { %v3323_v33 = vld [vmem:[#allocation5 + $0x6e0] sm:$0xf]  ;;  %v3815_v34 = vld [vmem:[#allocation5 + $0x6ec] sm:$0xf0]  ;;  %v3196_v41 = vor.u32 %v3783_v32, %v3195_v30  ;;  %1729 = vmatpush.bf16.msra.mxu3 %v2828_v39 }
  0x38   :  { %v3451_v37 = vld [vmem:[#allocation5 + $0x7e0] sm:$0xf]  ;;  %v3847_v38 = vld [vmem:[#allocation5 + $0x7ec] sm:$0xf0]  ;;  %v3324_v42 = vor.u32 %v3815_v34, %v3323_v33  ;;  %1735 = vmatpush.bf16.msrb.mxu0 %v3068_v40 }
  0x39   :  { %v3051_v43 = vld [vmem:[#allocation5 + $0x4c0] sm:$0xf]  ;;  %v3747_v44 = vld [vmem:[#allocation5 + $0x4cc] sm:$0xf0]  ;;  %v3452_v46 = vor.u32 %v3847_v38, %v3451_v37  ;;  %1748 = vmatpush.bf16.msrb.mxu1 %v3196_v41 }
  0x3a   :  { %v3179_v45 = vld [vmem:[#allocation5 + $0x5c0] sm:$0xf]  ;;  %v3779_v47 = vld [vmem:[#allocation5 + $0x5cc] sm:$0xf0]  ;;  %v3052_v52 = vor.u32 %v3747_v44, %v3051_v43  ;;  %1761 = vmatpush.bf16.msrb.mxu2 %v3324_v42 }
  0x3b   :  { %v3307_v48 = vld [vmem:[#allocation5 + $0x6c0] sm:$0xf]  ;;  %v3811_v49 = vld [vmem:[#allocation5 + $0x6cc] sm:$0xf0]  ;;  %v3180_v54 = vor.u32 %v3779_v47, %v3179_v45  ;;  %1774 = vmatpush.bf16.msrb.mxu3 %v3452_v46 }
  0x3c   :  { %v3435_v50 = vld [vmem:[#allocation5 + $0x7c0] sm:$0xf]  ;;  %v3843_v51 = vld [vmem:[#allocation5 + $0x7cc] sm:$0xf0]  ;;  %v3308_v55 = vor.u32 %v3811_v49, %v3307_v48  ;;  %1736 = vmatpush.bf16.msrb.mxu0 %v3052_v52 }
  0x3d   :  { %v3035_v53 = vld [vmem:[#allocation5 + $0x4a0] sm:$0xf]  ;;  %v3743_v56 = vld [vmem:[#allocation5 + $0x4ac] sm:$0xf0]  ;;  %v3436_v59 = vor.u32 %v3843_v51, %v3435_v50  ;;  %1749 = vmatpush.bf16.msrb.mxu1 %v3180_v54 }
  0x3e   :  { %v3163_v57 = vld [vmem:[#allocation5 + $0x5a0] sm:$0xf]  ;;  %v3775_v58 = vld [vmem:[#allocation5 + $0x5ac] sm:$0xf0]  ;;  %v3036_v2 = vor.u32 %v3743_v56, %v3035_v53  ;;  %1762 = vmatpush.bf16.msrb.mxu2 %v3308_v55 }
  0x3f   :  { %v3291_v60 = vld [vmem:[#allocation5 + $0x6a0] sm:$0xf]  ;;  %v3807_v61 = vld [vmem:[#allocation5 + $0x6ac] sm:$0xf0]  ;;  %v3164_v6 = vor.u32 %v3775_v58, %v3163_v57  ;;  %1775 = vmatpush.bf16.msrb.mxu3 %v3436_v59 }
  0x40   :  { %v3419_v62 = vld [vmem:[#allocation5 + $0x7a0] sm:$0xf]  ;;  %v3839_v63 = vld [vmem:[#allocation5 + $0x7ac] sm:$0xf0]  ;;  %v3292_v7 = vor.u32 %v3807_v61, %v3291_v60  ;;  %1737 = vmatpush.bf16.msrb.mxu0 %v3036_v2 }
  0x41   :  { %v3019_v0 = vld [vmem:[#allocation5 + $0x480] sm:$0xf]  ;;  %v3739_v1 = vld [vmem:[#allocation5 + $0x48c] sm:$0xf0]  ;;  %v3420_v11 = vor.u32 %v3839_v63, %v3419_v62  ;;  %1750 = vmatpush.bf16.msrb.mxu1 %v3164_v6  ;;  %v83_v62 = vld [vmem:[#allocation2 + $0x8] sm:$0xff] }
  0x42   :  { %v3147_v3 = vld [vmem:[#allocation5 + $0x580] sm:$0xf]  ;;  %v84_v5 = vld [vmem:[#allocation2 + $0x10] sm:$0xff]  ;;  %v3020_v16 = vor.u32 %v3739_v1, %v3019_v0  ;;  %1763 = vmatpush.bf16.msrb.mxu2 %v3292_v7  ;;  %v85_v63 = vld [vmem:[#allocation2 + $0x18] sm:$0xff]  ;;  %106 = vst [vmem:[#allocation1 + $0x20] ss:$4 sm:$0xff] %v83_v62 }
  0x43   :  { %v82_v4 = vld [vmem:[#allocation2] sm:$0xff]  ;;  %v3771_v8 = vld [vmem:[#allocation5 + $0x58c] sm:$0xf0]  ;;  %100 = vst [vmem:[#allocation1 + $0x1] ss:$4 sm:$0xff] %v84_v5  ;;  %1776 = vmatpush.bf16.msrb.mxu3 %v3420_v11  ;;  %v89_v5 = vld [vmem:[#allocation2 + $0x38] sm:$0xff] }
  0x44   :  { %v86_v9 = vld [vmem:[#allocation2 + $0x20] sm:$0xff]  ;;  %v88_v10 = vld [vmem:[#allocation2 + $0x30] sm:$0xff]  ;;  %98 = vst [vmem:[#allocation1] ss:$4 sm:$0xff] %v82_v4  ;;  %v3148_v17 = vor.u32 %v3771_v8, %v3147_v3  ;;  %1738 = vmatpush.bf16.msrb.mxu0 %v3020_v16  ;;  %v87_v4 = vld [vmem:[#allocation2 + $0x28] sm:$0xff] }
  0x45   :  { %v3275_v12 = vld [vmem:[#allocation5 + $0x680] sm:$0xf]  ;;  %v3803_v13 = vld [vmem:[#allocation5 + $0x68c] sm:$0xf0]  ;;  %102 = vst [vmem:[#allocation1 + $0x2] ss:$4 sm:$0xff] %v86_v9 }
  0x46   :  { %v3403_v14 = vld [vmem:[#allocation5 + $0x780] sm:$0xf]  ;;  %v3835_v15 = vld [vmem:[#allocation5 + $0x78c] sm:$0xf0]  ;;  %104 = vst [vmem:[#allocation1 + $0x3] ss:$4 sm:$0xff] %v88_v10  ;;  %v3276_v18 = vor.u32 %v3803_v13, %v3275_v12  ;;  %1751 = vmatpush.bf16.msrb.mxu1 %v3148_v17 }
  0x47   :  { %v3003_v19 = vld [vmem:[#allocation5 + $0x460] sm:$0xf]  ;;  %v3735_v20 = vld [vmem:[#allocation5 + $0x46c] sm:$0xf0]  ;;  %v3404_v22 = vor.u32 %v3835_v15, %v3403_v14  ;;  %108 = vst [vmem:[#allocation1 + $0x21] ss:$4 sm:$0xff] %v85_v63 }
  0x48   :  { %v3131_v21 = vld [vmem:[#allocation5 + $0x560] sm:$0xf]  ;;  %v3767_v23 = vld [vmem:[#allocation5 + $0x56c] sm:$0xf0]  ;;  %v3004_v28 = vor.u32 %v3735_v20, %v3003_v19  ;;  %1764 = vmatpush.bf16.msrb.mxu2 %v3276_v18  ;;  %v3621_v12 = vld [vmem:[#allocation5 + $0xe4] sm:$0xf] }
  0x49   :  { %v3259_v24 = vld [vmem:[#allocation5 + $0x660] sm:$0xf]  ;;  %v3799_v25 = vld [vmem:[#allocation5 + $0x66c] sm:$0xf0]  ;;  %v3132_v31 = vor.u32 %v3767_v23, %v3131_v21  ;;  %1777 = vmatpush.bf16.msrb.mxu3 %v3404_v22  ;;  %110 = vst [vmem:[#allocation1 + $0x22] ss:$4 sm:$0xff] %v87_v4 }
  0x4a   :  { %v3387_v26 = vld [vmem:[#allocation5 + $0x760] sm:$0xf]  ;;  %v3831_v27 = vld [vmem:[#allocation5 + $0x76c] sm:$0xf0]  ;;  %v3260_v32 = vor.u32 %v3799_v25, %v3259_v24  ;;  %1739 = vmatpush.bf16.msrb.mxu0 %v3004_v28  ;;  %v2557_v13 = vld [vmem:[#allocation5 + $0xf0] sm:$0xf0] }
  0x4b   :  { %v2987_v29 = vld [vmem:[#allocation5 + $0x440] sm:$0xf]  ;;  %v3731_v30 = vld [vmem:[#allocation5 + $0x44c] sm:$0xf0]  ;;  %v3388_v36 = vor.u32 %v3831_v27, %v3387_v26  ;;  %1752 = vmatpush.bf16.msrb.mxu1 %v3132_v31  ;;  %v3653_v14 = vld [vmem:[#allocation5 + $0x1e4] sm:$0xf]  ;;  %v2560_v24 = vor.u32 %v3621_v12, %v2557_v13 }
  0x4c   :  { %v3115_v33 = vld [vmem:[#allocation5 + $0x540] sm:$0xf]  ;;  %v3763_v34 = vld [vmem:[#allocation5 + $0x54c] sm:$0xf0]  ;;  %v2988_v44 = vor.u32 %v3731_v30, %v2987_v29  ;;  %1765 = vmatpush.bf16.msrb.mxu2 %v3260_v32  ;;  %112 = vst [vmem:[#allocation1 + $0x23] ss:$4 sm:$0xff] %v89_v5 }
  0x4d   :  { %v3243_v35 = vld [vmem:[#allocation5 + $0x640] sm:$0xf]  ;;  %v3795_v37 = vld [vmem:[#allocation5 + $0x64c] sm:$0xf0]  ;;  %v3116_v45 = vor.u32 %v3763_v34, %v3115_v33  ;;  %1778 = vmatpush.bf16.msrb.mxu3 %v3388_v36  ;;  %v2685_v16 = vld [vmem:[#allocation5 + $0x1f0] sm:$0xf0] }
  0x4e   :  { %v3371_v38 = vld [vmem:[#allocation5 + $0x740] sm:$0xf]  ;;  %v3827_v39 = vld [vmem:[#allocation5 + $0x74c] sm:$0xf0]  ;;  %v3244_v50 = vor.u32 %v3795_v37, %v3243_v35  ;;  %1740 = vmatpush.bf16.msrb.mxu0 %v2988_v44  ;;  %v3685_v17 = vld [vmem:[#allocation5 + $0x2e4] sm:$0xf]  ;;  %v2688_v26 = vor.u32 %v3653_v14, %v2685_v16 }
  0x4f   :  { %v115_v40 = vld.sshfl [vmem:[#allocation1 + $0x10] sm:$0xff pattern:$0x73625140]  ;;  %v113_v41 = vld.sshfl [vmem:[#allocation1] sm:$0xff pattern:$0x73625140]  ;;  %v3372_v56 = vor.u32 %v3827_v39, %v3371_v38  ;;  %1753 = vmatpush.bf16.msrb.mxu1 %v3116_v45 }
  0x50   :  { %v2971_v42 = vld [vmem:[#allocation5 + $0x420] sm:$0xf]  ;;  %v3727_v43 = vld [vmem:[#allocation5 + $0x42c] sm:$0xf0]  ;;  %v4074_v46 = vpack.c.bf16 %v115_v40, %v115_v40  ;;  %v4076_v47 = vpack.c.bf16 %v113_v41, %v113_v41  ;;  %1766 = vmatpush.bf16.msrb.mxu2 %v3244_v50  ;;  %v2813_v18 = vld [vmem:[#allocation5 + $0x2f0] sm:$0xf0] }
  0x51   :  { %v116_v48 = vld.sshfl [vmem:[#allocation1 + $0x18] sm:$0xff pattern:$0x73625140]  ;;  %v114_v49 = vld.sshfl [vmem:[#allocation1 + $0x8] sm:$0xff pattern:$0x73625140]  ;;  %v2972_v0 = vor.u32 %v3727_v43, %v2971_v42  ;;  %1779 = vmatpush.bf16.msrb.mxu3 %v3372_v56  ;;  %v2816_v27 = vor.u32 %v3685_v17, %v2813_v18 }
  0x52   :  { %v4078_v51 = vpack.c.bf16 %v116_v48, %v116_v48  ;;  %v3099_v52 = vld [vmem:[#allocation5 + $0x520] sm:$0xf]  ;;  %v3759_v53 = vld [vmem:[#allocation5 + $0x52c] sm:$0xf0]  ;;  %v4080_v55 = vpack.c.bf16 %v114_v49, %v114_v49  ;;  %1717 = vmatmul.bf16.vlgmr.msra.gmra.mxu2 %v4074_v46  ;;  %1691 = vmatmul.bf16.vlgmr.msra.gmra.mxu0 %v4076_v47  ;;  %v3717_v21 = vld [vmem:[#allocation5 + $0x3e4] sm:$0xf] }
  0x53   :  { %v3227_v54 = vld [vmem:[#allocation5 + $0x620] sm:$0xf]  ;;  %v3791_v57 = vld [vmem:[#allocation5 + $0x62c] sm:$0xf0]  ;;  %v3100_v6 = vor.u32 %v3759_v53, %v3099_v52  ;;  %1741 = vmatpush.bf16.msrb.mxu0 %v2972_v0  ;;  %v2941_v22 = vld [vmem:[#allocation5 + $0x3f0] sm:$0xf0] }
  0x54   :  { %v3355_v58 = vld [vmem:[#allocation5 + $0x720] sm:$0xf]  ;;  %v3823_v59 = vld [vmem:[#allocation5 + $0x72c] sm:$0xf0]  ;;  %1730 = vmatmul.bf16.vlgmr.msra.gmra.mxu3 %v4078_v51  ;;  %1704 = vmatmul.bf16.vlgmr.msra.gmra.mxu1 %v4080_v55  ;;  %v3228_v7 = vor.u32 %v3791_v57, %v3227_v54  ;;  %v3617_v25 = vld [vmem:[#allocation5 + $0xc4] sm:$0xf]  ;;  %v2944_v31 = vor.u32 %v3717_v21, %v2941_v22 }
  0x55   :  { %v2955_v60 = vld [vmem:[#allocation5 + $0x400] sm:$0xf]  ;;  %v3723_v61 = vld [vmem:[#allocation5 + $0x40c] sm:$0xf0]  ;;  %v3356_v10 = vor.u32 %v3823_v59, %v3355_v58  ;;  %1754 = vmatpush.bf16.msrb.mxu1 %v3100_v6  ;;  %v2541_v28 = vld [vmem:[#allocation5 + $0xd0] sm:$0xf0] }
  0x56   :  { %v3083_v1 = vld [vmem:[#allocation5 + $0x500] sm:$0xf]  ;;  %v3755_v2 = vld [vmem:[#allocation5 + $0x50c] sm:$0xf0]  ;;  %v2956_v15 = vor.u32 %v3723_v61, %v2955_v60  ;;  %1767 = vmatpush.bf16.msrb.mxu2 %v3228_v7  ;;  %v3649_v29 = vld [vmem:[#allocation5 + $0x1c4] sm:$0xf]  ;;  %v2544_v38 = vor.u32 %v3617_v25, %v2541_v28 }
  0x57   :  { %v3211_v3 = vld [vmem:[#allocation5 + $0x600] sm:$0xf]  ;;  %v3787_v8 = vld [vmem:[#allocation5 + $0x60c] sm:$0xf0]  ;;  %v3084_v19 = vor.u32 %v3755_v2, %v3083_v1  ;;  %1780 = vmatpush.bf16.msrb.mxu3 %v3356_v10  ;;  %v2669_v30 = vld [vmem:[#allocation5 + $0x1d0] sm:$0xf0] }
  0x58   :  { %v3339_v9 = vld [vmem:[#allocation5 + $0x700] sm:$0xf]  ;;  %v3819_v11 = vld [vmem:[#allocation5 + $0x70c] sm:$0xf0]  ;;  %v3212_v20 = vor.u32 %v3787_v8, %v3211_v3  ;;  %1742 = vmatpush.bf16.msrb.mxu0 %v2956_v15  ;;  %v3681_v32 = vld [vmem:[#allocation5 + $0x2c4] sm:$0xf]  ;;  %v2672_v42 = vor.u32 %v3649_v29, %v2669_v30 }
  0x59   :  { %v3340_v23 = vor.u32 %v3819_v11, %v3339_v9  ;;  %v2797_v33 = vld [vmem:[#allocation5 + $0x2d0] sm:$0xf0]  ;;  %v3713_v34 = vld [vmem:[#allocation5 + $0x3c4] sm:$0xf]  ;;  %1755 = vmatpush.bf16.msrb.mxu1 %v3084_v19 }
  0x5a   :  { %1768 = vmatpush.bf16.msrb.mxu2 %v3212_v20  ;;  %v2925_v35 = vld [vmem:[#allocation5 + $0x3d0] sm:$0xf0]  ;;  %v3613_v36 = vld [vmem:[#allocation5 + $0xa4] sm:$0xf]  ;;  %v2800_v43 = vor.u32 %v3681_v32, %v2797_v33 }
  0x5b   :  { %v2525_v37 = vld [vmem:[#allocation5 + $0xb0] sm:$0xf0]  ;;  %1781 = vmatpush.bf16.msrb.mxu3 %v3340_v23  ;;  %v119_v39 = vld.sshfl [vmem:[#allocation1 + $0x30] sm:$0xff pattern:$0x73625140]  ;;  %v2928_v49 = vor.u32 %v3713_v34, %v2925_v35 }
  0x5c   :  { %1787 = vmatpush.bf16.msra.mxu0 %v2560_v24  ;;  %v3645_v40 = vld [vmem:[#allocation5 + $0x1a4] sm:$0xf]  ;;  %v117_v41 = vld.sshfl [vmem:[#allocation1 + $0x20] sm:$0xff pattern:$0x73625140]  ;;  %v4086_v44 = vpack.c.bf16 %v119_v39, %v119_v39  ;;  %v2528_v60 = vor.u32 %v3613_v36, %v2525_v37 }
  0x5d   :  { %1800 = vmatpush.bf16.msra.mxu1 %v2688_v26  ;;  %v120_v45 = vld.sshfl [vmem:[#allocation1 + $0x38] sm:$0xff pattern:$0x73625140]  ;;  %v118_v48 = vld.sshfl [vmem:[#allocation1 + $0x28] sm:$0xff pattern:$0x73625140]  ;;  %v4088_v54 = vpack.c.bf16 %v117_v41, %v117_v41 }
  0x5e   :  { %1813 = vmatpush.bf16.msra.mxu2 %v2816_v27  ;;  %v2653_v50 = vld [vmem:[#allocation5 + $0x1b0] sm:$0xf0]  ;;  %v3677_v52 = vld [vmem:[#allocation5 + $0x2a4] sm:$0xf]  ;;  %v4090_v58 = vpack.c.bf16 %v120_v45, %v120_v45  ;;  %v4092_v59 = vpack.c.bf16 %v118_v48, %v118_v48 }
  0x5f   :  { %1826 = vmatpush.bf16.msra.mxu3 %v2944_v31  ;;  %v2781_v53 = vld [vmem:[#allocation5 + $0x2b0] sm:$0xf0]  ;;  %v3709_v56 = vld [vmem:[#allocation5 + $0x3a4] sm:$0xf]  ;;  %v2656_v61 = vor.u32 %v3645_v40, %v2653_v50 }
  0x60   :  { %v2909_v57 = vld [vmem:[#allocation5 + $0x3b0] sm:$0xf0]  ;;  %1788 = vmatpush.bf16.msra.mxu0 %v2544_v38  ;;  %v2784_v62 = vor.u32 %v3677_v52, %v2781_v53  ;;  %v3609_v63 = vld [vmem:[#allocation5 + $0x84] sm:$0xf] }
  0x61   :  { %1801 = vmatpush.bf16.msra.mxu1 %v2672_v42  ;;  %v2509_v0 = vld [vmem:[#allocation5 + $0x90] sm:$0xf0]  ;;  %v3641_v1 = vld [vmem:[#allocation5 + $0x184] sm:$0xf]  ;;  %v2912_v2 = vor.u32 %v3709_v56, %v2909_v57 }
  0x62   :  { %1769 = vmatmul.bf16.vlgmr.msrb.gmra.mxu2 %v4086_v44  ;;  %1743 = vmatmul.bf16.vlgmr.msrb.gmra.mxu0 %v4088_v54  ;;  %v2637_v3 = vld [vmem:[#allocation5 + $0x190] sm:$0xf0]  ;;  %v3673_v4 = vld [vmem:[#allocation5 + $0x284] sm:$0xf]  ;;  %v2512_v8 = vor.u32 %v3609_v63, %v2509_v0 }
  0x63   :  { %1814 = vmatpush.bf16.msra.mxu2 %v2800_v43  ;;  %1827 = vmatpush.bf16.msra.mxu3 %v2928_v49  ;;  %v2765_v5 = vld [vmem:[#allocation5 + $0x290] sm:$0xf0]  ;;  %v3705_v6 = vld [vmem:[#allocation5 + $0x384] sm:$0xf]  ;;  %v2640_v9 = vor.u32 %v3641_v1, %v2637_v3 }
  0x64   :  { %1782 = vmatmul.bf16.vlgmr.msrb.gmra.mxu3 %v4090_v58  ;;  %1756 = vmatmul.bf16.vlgmr.msrb.gmra.mxu1 %v4092_v59  ;;  %v2893_v7 = vld [vmem:[#allocation5 + $0x390] sm:$0xf0]  ;;  %v2768_v10 = vor.u32 %v3673_v4, %v2765_v5  ;;  %v3605_v11 = vld [vmem:[#allocation5 + $0x64] sm:$0xf] }
  0x65   :  { %1789 = vmatpush.bf16.msra.mxu0 %v2528_v60  ;;  %1802 = vmatpush.bf16.msra.mxu1 %v2656_v61  ;;  %v2493_v12 = vld [vmem:[#allocation5 + $0x70] sm:$0xf0]  ;;  %v3637_v13 = vld [vmem:[#allocation5 + $0x164] sm:$0xf]  ;;  %v2896_v14 = vor.u32 %v3705_v6, %v2893_v7 }
  0x66   :  { %v2621_v15 = vld [vmem:[#allocation5 + $0x170] sm:$0xf0]  ;;  %v3669_v16 = vld [vmem:[#allocation5 + $0x264] sm:$0xf]  ;;  %v2496_v20 = vor.u32 %v3605_v11, %v2493_v12 }
  0x67   :  { %1815 = vmatpush.bf16.msra.mxu2 %v2784_v62  ;;  %1828 = vmatpush.bf16.msra.mxu3 %v2912_v2  ;;  %v2749_v17 = vld [vmem:[#allocation5 + $0x270] sm:$0xf0]  ;;  %v3701_v18 = vld [vmem:[#allocation5 + $0x364] sm:$0xf]  ;;  %v2624_v21 = vor.u32 %v3637_v13, %v2621_v15 }
  0x68   :  { %v2877_v19 = vld [vmem:[#allocation5 + $0x370] sm:$0xf0]  ;;  %v2752_v22 = vor.u32 %v3669_v16, %v2749_v17  ;;  %v3601_v23 = vld [vmem:[#allocation5 + $0x44] sm:$0xf] }
  0x69   :  { %1790 = vmatpush.bf16.msra.mxu0 %v2512_v8  ;;  %1803 = vmatpush.bf16.msra.mxu1 %v2640_v9  ;;  %v2477_v24 = vld [vmem:[#allocation5 + $0x50] sm:$0xf0]  ;;  %v3633_v25 = vld [vmem:[#allocation5 + $0x144] sm:$0xf]  ;;  %v2880_v26 = vor.u32 %v3701_v18, %v2877_v19 }
  0x6a   :  { %v2605_v27 = vld [vmem:[#allocation5 + $0x150] sm:$0xf0]  ;;  %v3665_v28 = vld [vmem:[#allocation5 + $0x244] sm:$0xf]  ;;  %v2480_v32 = vor.u32 %v3601_v23, %v2477_v24 }
  0x6b   :  { %1816 = vmatpush.bf16.msra.mxu2 %v2768_v10  ;;  %1829 = vmatpush.bf16.msra.mxu3 %v2896_v14  ;;  %v2733_v29 = vld [vmem:[#allocation5 + $0x250] sm:$0xf0]  ;;  %v3697_v30 = vld [vmem:[#allocation5 + $0x344] sm:$0xf]  ;;  %v2608_v33 = vor.u32 %v3633_v25, %v2605_v27 }
  0x6c   :  { %v2861_v31 = vld [vmem:[#allocation5 + $0x350] sm:$0xf0]  ;;  %v2736_v34 = vor.u32 %v3665_v28, %v2733_v29  ;;  %v3597_v35 = vld [vmem:[#allocation5 + $0x24] sm:$0xf] }
  0x6d   :  { %1791 = vmatpush.bf16.msra.mxu0 %v2496_v20  ;;  %1804 = vmatpush.bf16.msra.mxu1 %v2624_v21  ;;  %v2461_v36 = vld [vmem:[#allocation5 + $0x30] sm:$0xf0]  ;;  %v3629_v37 = vld [vmem:[#allocation5 + $0x124] sm:$0xf]  ;;  %v2864_v38 = vor.u32 %v3697_v30, %v2861_v31 }
  0x6e   :  { %v2589_v39 = vld [vmem:[#allocation5 + $0x130] sm:$0xf0]  ;;  %v3661_v40 = vld [vmem:[#allocation5 + $0x224] sm:$0xf]  ;;  %v2464_v45 = vor.u32 %v3597_v35, %v2461_v36 }
  0x6f   :  { %1817 = vmatpush.bf16.msra.mxu2 %v2752_v22  ;;  %1830 = vmatpush.bf16.msra.mxu3 %v2880_v26  ;;  %v2717_v41 = vld [vmem:[#allocation5 + $0x230] sm:$0xf0]  ;;  %v3693_v42 = vld [vmem:[#allocation5 + $0x324] sm:$0xf]  ;;  %v2592_v50 = vor.u32 %v3629_v37, %v2589_v39 }
  0x70   :  { %v2845_v43 = vld [vmem:[#allocation5 + $0x330] sm:$0xf0]  ;;  %v3593_v48 = vld [vmem:[#allocation5 + $0x4] sm:$0xf]  ;;  %v2720_v52 = vor.u32 %v3661_v40, %v2717_v41 }
  0x71   :  { %1792 = vmatpush.bf16.msra.mxu0 %v2480_v32  ;;  %v2445_v49 = vld [vmem:[#allocation5 + $0x10] sm:$0xf0]  ;;  %1805 = vmatpush.bf16.msra.mxu1 %v2608_v33  ;;  %v3625_v53 = vld [vmem:[#allocation5 + $0x104] sm:$0xf]  ;;  %v2848_v60 = vor.u32 %v3693_v42, %v2845_v43 }
  0x72   :  { %v2573_v56 = vld [vmem:[#allocation5 + $0x110] sm:$0xf0]  ;;  %v3657_v57 = vld [vmem:[#allocation5 + $0x204] sm:$0xf]  ;;  %v2448_v3 = vor.u32 %v3593_v48, %v2445_v49 }
  0x73   :  { %1818 = vmatpush.bf16.msra.mxu2 %v2736_v34  ;;  %1831 = vmatpush.bf16.msra.mxu3 %v2864_v38  ;;  %v2701_v61 = vld [vmem:[#allocation5 + $0x210] sm:$0xf0]  ;;  %v3689_v62 = vld [vmem:[#allocation5 + $0x304] sm:$0xf]  ;;  %v2576_v7 = vor.u32 %v3625_v53, %v2573_v56 }
  0x74   :  { %v2829_v63 = vld [vmem:[#allocation5 + $0x310] sm:$0xf0]  ;;  %v3749_v0 = vld [vmem:[#allocation5 + $0x4e4] sm:$0xf]  ;;  %v2704_v8 = vor.u32 %v3657_v57, %v2701_v61 }
  0x75   :  { %v3069_v1 = vld [vmem:[#allocation5 + $0x4f0] sm:$0xf0]  ;;  %v3781_v2 = vld [vmem:[#allocation5 + $0x5e4] sm:$0xf]  ;;  %1793 = vmatpush.bf16.msra.mxu0 %v2464_v45  ;;  %1806 = vmatpush.bf16.msra.mxu1 %v2592_v50  ;;  %v2832_v11 = vor.u32 %v3689_v62, %v2829_v63 }
  0x76   :  { %v3197_v4 = vld [vmem:[#allocation5 + $0x5f0] sm:$0xf0]  ;;  %v3813_v5 = vld [vmem:[#allocation5 + $0x6e4] sm:$0xf]  ;;  %v3072_v12 = vor.u32 %v3749_v0, %v3069_v1 }
  0x77   :  { %v3325_v6 = vld [vmem:[#allocation5 + $0x6f0] sm:$0xf0]  ;;  %1819 = vmatpush.bf16.msra.mxu2 %v2720_v52  ;;  %v3845_v9 = vld [vmem:[#allocation5 + $0x7e4] sm:$0xf]  ;;  %1832 = vmatpush.bf16.msra.mxu3 %v2848_v60  ;;  %v3200_v13 = vor.u32 %v3781_v2, %v3197_v4 }
  0x78   :  { %v3453_v10 = vld [vmem:[#allocation5 + $0x7f0] sm:$0xf0]  ;;  %v3328_v14 = vor.u32 %v3813_v5, %v3325_v6  ;;  %v3745_v15 = vld [vmem:[#allocation5 + $0x4c4] sm:$0xf] }
  0x79   :  { %v3053_v16 = vld [vmem:[#allocation5 + $0x4d0] sm:$0xf0]  ;;  %v3777_v17 = vld [vmem:[#allocation5 + $0x5c4] sm:$0xf]  ;;  %1794 = vmatpush.bf16.msra.mxu0 %v2448_v3  ;;  %v3456_v18 = vor.u32 %v3845_v9, %v3453_v10  ;;  %1807 = vmatpush.bf16.msra.mxu1 %v2576_v7 }
  0x7a   :  { %v3181_v19 = vld [vmem:[#allocation5 + $0x5d0] sm:$0xf0]  ;;  %v3809_v20 = vld [vmem:[#allocation5 + $0x6c4] sm:$0xf]  ;;  %v3056_v24 = vor.u32 %v3745_v15, %v3053_v16 }
  0x7b   :  { %v3309_v21 = vld [vmem:[#allocation5 + $0x6d0] sm:$0xf0]  ;;  %1820 = vmatpush.bf16.msra.mxu2 %v2704_v8  ;;  %v3841_v22 = vld [vmem:[#allocation5 + $0x7c4] sm:$0xf]  ;;  %1833 = vmatpush.bf16.msra.mxu3 %v2832_v11  ;;  %v3184_v25 = vor.u32 %v3777_v17, %v3181_v19 }
  0x7c   :  { %v3437_v23 = vld [vmem:[#allocation5 + $0x7d0] sm:$0xf0]  ;;  %v3312_v26 = vor.u32 %v3809_v20, %v3309_v21  ;;  %v3741_v27 = vld [vmem:[#allocation5 + $0x4a4] sm:$0xf]  ;;  %1795 = vmatmul.bf16.vlgmr.msra.gmra.mxu0 %v4076_v47  ;;  %1808 = vmatmul.bf16.vlgmr.msra.gmra.mxu1 %v4080_v55 }
  0x7d   :  { %1839 = vmatpush.bf16.msrb.mxu0 %v3072_v12  ;;  %1852 = vmatpush.bf16.msrb.mxu1 %v3200_v13  ;;  %v3037_v28 = vld [vmem:[#allocation5 + $0x4b0] sm:$0xf0]  ;;  %v3773_v29 = vld [vmem:[#allocation5 + $0x5a4] sm:$0xf]  ;;  %v3440_v30 = vor.u32 %v3841_v22, %v3437_v23 }
  0x7e   :  { %v3165_v31 = vld [vmem:[#allocation5 + $0x5b0] sm:$0xf0]  ;;  %v3805_v32 = vld [vmem:[#allocation5 + $0x6a4] sm:$0xf]  ;;  %1821 = vmatmul.bf16.vlgmr.msra.gmra.mxu2 %v4074_v46  ;;  %1834 = vmatmul.bf16.vlgmr.msra.gmra.mxu3 %v4078_v51  ;;  %v3040_v36 = vor.u32 %v3741_v27, %v3037_v28 }
  0x7f   :  { %1865 = vmatpush.bf16.msrb.mxu2 %v3328_v14  ;;  %1878 = vmatpush.bf16.msrb.mxu3 %v3456_v18  ;;  %v3293_v33 = vld [vmem:[#allocation5 + $0x6b0] sm:$0xf0]  ;;  %v3837_v34 = vld [vmem:[#allocation5 + $0x7a4] sm:$0xf]  ;;  %v3168_v37 = vor.u32 %v3773_v29, %v3165_v31 }
  0x80   :  { %v3421_v35 = vld [vmem:[#allocation5 + $0x7b0] sm:$0xf0]  ;;  %v3296_v38 = vor.u32 %v3805_v32, %v3293_v33  ;;  %v3737_v39 = vld [vmem:[#allocation5 + $0x484] sm:$0xf] }
  0x81   :  { %1840 = vmatpush.bf16.msrb.mxu0 %v3056_v24  ;;  %1853 = vmatpush.bf16.msrb.mxu1 %v3184_v25  ;;  %v3021_v40 = vld [vmem:[#allocation5 + $0x490] sm:$0xf0]  ;;  %v3769_v41 = vld [vmem:[#allocation5 + $0x584] sm:$0xf]  ;;  %v3424_v42 = vor.u32 %v3837_v34, %v3421_v35 }
  0x82   :  { %v3149_v43 = vld [vmem:[#allocation5 + $0x590] sm:$0xf0]  ;;  %v3801_v45 = vld [vmem:[#allocation5 + $0x684] sm:$0xf]  ;;  %v3024_v52 = vor.u32 %v3737_v39, %v3021_v40  ;;  %v2563_v40 = vld [vmem:[#allocation5 + $0xe8] sm:$0xf] }
  0x83   :  { %1866 = vmatpush.bf16.msrb.mxu2 %v3312_v26  ;;  %1879 = vmatpush.bf16.msrb.mxu3 %v3440_v30  ;;  %v3277_v48 = vld [vmem:[#allocation5 + $0x690] sm:$0xf0]  ;;  %v3833_v49 = vld [vmem:[#allocation5 + $0x784] sm:$0xf]  ;;  %v3152_v53 = vor.u32 %v3769_v41, %v3149_v43  ;;  %v3624_v41 = vld [vmem:[#allocation5 + $0xf4] sm:$0xf0] }
  0x84   :  { %v3405_v50 = vld [vmem:[#allocation5 + $0x790] sm:$0xf0]  ;;  %v3280_v56 = vor.u32 %v3801_v45, %v3277_v48  ;;  %v3733_v57 = vld [vmem:[#allocation5 + $0x464] sm:$0xf]  ;;  %v3656_v45 = vld [vmem:[#allocation5 + $0x1f4] sm:$0xf0] }
  0x85   :  { %1841 = vmatpush.bf16.msrb.mxu0 %v3040_v36  ;;  %1854 = vmatpush.bf16.msrb.mxu1 %v3168_v37  ;;  %v3005_v60 = vld [vmem:[#allocation5 + $0x470] sm:$0xf0]  ;;  %v3765_v61 = vld [vmem:[#allocation5 + $0x564] sm:$0xf]  ;;  %v3408_v62 = vor.u32 %v3833_v49, %v3405_v50  ;;  %v2819_v48 = vld [vmem:[#allocation5 + $0x2e8] sm:$0xf] }
  0x86   :  { %v3133_v63 = vld [vmem:[#allocation5 + $0x570] sm:$0xf0]  ;;  %v3797_v0 = vld [vmem:[#allocation5 + $0x664] sm:$0xf]  ;;  %v3008_v4 = vor.u32 %v3733_v57, %v3005_v60  ;;  %v3688_v49 = vld [vmem:[#allocation5 + $0x2f4] sm:$0xf0]  ;;  %v2564_v60 = vor.u32 %v3624_v41, %v2563_v40 }
  0x87   :  { %1867 = vmatpush.bf16.msrb.mxu2 %v3296_v38  ;;  %1880 = vmatpush.bf16.msrb.mxu3 %v3424_v42  ;;  %v3261_v1 = vld [vmem:[#allocation5 + $0x670] sm:$0xf0]  ;;  %v3829_v2 = vld [vmem:[#allocation5 + $0x764] sm:$0xf]  ;;  %v3136_v5 = vor.u32 %v3765_v61, %v3133_v63  ;;  %v2691_v42 = vld [vmem:[#allocation5 + $0x1e8] sm:$0xf] }
  0x88   :  { %v3389_v3 = vld [vmem:[#allocation5 + $0x770] sm:$0xf0]  ;;  %v3264_v6 = vor.u32 %v3797_v0, %v3261_v1  ;;  %v3729_v7 = vld [vmem:[#allocation5 + $0x444] sm:$0xf]  ;;  %v2692_v61 = vor.u32 %v3656_v45, %v2691_v42  ;;  %v2547_v63 = vld [vmem:[#allocation5 + $0xc8] sm:$0xf] }
  0x89   :  { %1842 = vmatpush.bf16.msrb.mxu0 %v3024_v52  ;;  %1855 = vmatpush.bf16.msrb.mxu1 %v3152_v53  ;;  %v2989_v8 = vld [vmem:[#allocation5 + $0x450] sm:$0xf0]  ;;  %v3761_v9 = vld [vmem:[#allocation5 + $0x544] sm:$0xf]  ;;  %v3392_v10 = vor.u32 %v3829_v2, %v3389_v3  ;;  %v2947_v53 = vld [vmem:[#allocation5 + $0x3e8] sm:$0xf] }
  0x8a   :  { %v3117_v11 = vld [vmem:[#allocation5 + $0x550] sm:$0xf0]  ;;  %v3793_v12 = vld [vmem:[#allocation5 + $0x644] sm:$0xf]  ;;  %v2992_v16 = vor.u32 %v3729_v7, %v2989_v8  ;;  %v3620_v0 = vld [vmem:[#allocation5 + $0xd4] sm:$0xf0] }
  0x8b   :  { %1868 = vmatpush.bf16.msrb.mxu2 %v3280_v56  ;;  %1881 = vmatpush.bf16.msrb.mxu3 %v3408_v62  ;;  %v3245_v13 = vld [vmem:[#allocation5 + $0x650] sm:$0xf0]  ;;  %v3825_v14 = vld [vmem:[#allocation5 + $0x744] sm:$0xf]  ;;  %v3120_v17 = vor.u32 %v3761_v9, %v3117_v11  ;;  %v3720_v56 = vld [vmem:[#allocation5 + $0x3f4] sm:$0xf0]  ;;  %v2820_v62 = vor.u32 %v3688_v49, %v2819_v48  ;;  %v2548_v8 = vor.u32 %v3620_v0, %v2547_v63 }
  0x8c   :  { %v3373_v15 = vld [vmem:[#allocation5 + $0x750] sm:$0xf0]  ;;  %v3248_v18 = vor.u32 %v3793_v12, %v3245_v13  ;;  %v3725_v19 = vld [vmem:[#allocation5 + $0x424] sm:$0xf]  ;;  %v2675_v1 = vld [vmem:[#allocation5 + $0x1c8] sm:$0xf]  ;;  %v2948_v2 = vor.u32 %v3720_v56, %v2947_v53 }
  0x8d   :  { %1843 = vmatpush.bf16.msrb.mxu0 %v3008_v4  ;;  %1856 = vmatpush.bf16.msrb.mxu1 %v3136_v5  ;;  %v2973_v20 = vld [vmem:[#allocation5 + $0x430] sm:$0xf0]  ;;  %v3757_v21 = vld [vmem:[#allocation5 + $0x524] sm:$0xf]  ;;  %v3376_v22 = vor.u32 %v3825_v14, %v3373_v15  ;;  %v3652_v3 = vld [vmem:[#allocation5 + $0x1d4] sm:$0xf0] }
  0x8e   :  { %v3101_v23 = vld [vmem:[#allocation5 + $0x530] sm:$0xf0]  ;;  %v3789_v24 = vld [vmem:[#allocation5 + $0x624] sm:$0xf]  ;;  %v2976_v28 = vor.u32 %v3725_v19, %v2973_v20  ;;  %v2803_v4 = vld [vmem:[#allocation5 + $0x2c8] sm:$0xf]  ;;  %v2676_v9 = vor.u32 %v3652_v3, %v2675_v1 }
  0x8f   :  { %1869 = vmatpush.bf16.msrb.mxu2 %v3264_v6  ;;  %1882 = vmatpush.bf16.msrb.mxu3 %v3392_v10  ;;  %v3229_v25 = vld [vmem:[#allocation5 + $0x630] sm:$0xf0]  ;;  %v3821_v26 = vld [vmem:[#allocation5 + $0x724] sm:$0xf]  ;;  %v3104_v31 = vor.u32 %v3757_v21, %v3101_v23  ;;  %v3684_v5 = vld [vmem:[#allocation5 + $0x2d4] sm:$0xf0] }
  0x90   :  { %v3357_v27 = vld [vmem:[#allocation5 + $0x730] sm:$0xf0]  ;;  %v3721_v29 = vld [vmem:[#allocation5 + $0x404] sm:$0xf]  ;;  %v3232_v32 = vor.u32 %v3789_v24, %v3229_v25  ;;  %v2931_v6 = vld [vmem:[#allocation5 + $0x3c8] sm:$0xf]  ;;  %v2804_v10 = vor.u32 %v3684_v5, %v2803_v4 }
  0x91   :  { %1844 = vmatpush.bf16.msrb.mxu0 %v2992_v16  ;;  %v2957_v30 = vld [vmem:[#allocation5 + $0x410] sm:$0xf0]  ;;  %1857 = vmatpush.bf16.msrb.mxu1 %v3120_v17  ;;  %v3753_v33 = vld [vmem:[#allocation5 + $0x504] sm:$0xf]  ;;  %v3360_v36 = vor.u32 %v3821_v26, %v3357_v27  ;;  %v3716_v7 = vld [vmem:[#allocation5 + $0x3d4] sm:$0xf0] }
  0x92   :  { %v3085_v34 = vld [vmem:[#allocation5 + $0x510] sm:$0xf0]  ;;  %v3785_v35 = vld [vmem:[#allocation5 + $0x604] sm:$0xf]  ;;  %v2960_v43 = vor.u32 %v3721_v29, %v2957_v30  ;;  %v2531_v11 = vld [vmem:[#allocation5 + $0xa8] sm:$0xf]  ;;  %v2932_v14 = vor.u32 %v3716_v7, %v2931_v6 }
  0x93   :  { %1870 = vmatpush.bf16.msrb.mxu2 %v3248_v18  ;;  %1883 = vmatpush.bf16.msrb.mxu3 %v3376_v22  ;;  %v3213_v37 = vld [vmem:[#allocation5 + $0x610] sm:$0xf0]  ;;  %v3817_v38 = vld [vmem:[#allocation5 + $0x704] sm:$0xf]  ;;  %v3088_v50 = vor.u32 %v3753_v33, %v3085_v34  ;;  %v3616_v12 = vld [vmem:[#allocation5 + $0xb4] sm:$0xf0] }
  0x94   :  { %v3341_v39 = vld [vmem:[#allocation5 + $0x710] sm:$0xf0]  ;;  %v3216_v52 = vor.u32 %v3785_v35, %v3213_v37  ;;  %v2659_v13 = vld [vmem:[#allocation5 + $0x1a8] sm:$0xf]  ;;  %v3648_v15 = vld [vmem:[#allocation5 + $0x1b4] sm:$0xf0]  ;;  %v2532_v20 = vor.u32 %v3616_v12, %v2531_v11 }
  0x95   :  { %1845 = vmatpush.bf16.msrb.mxu0 %v2976_v28  ;;  %1858 = vmatpush.bf16.msrb.mxu1 %v3104_v31  ;;  %v3344_v57 = vor.u32 %v3817_v38, %v3341_v39  ;;  %v2787_v16 = vld [vmem:[#allocation5 + $0x2a8] sm:$0xf]  ;;  %v3680_v17 = vld [vmem:[#allocation5 + $0x2b4] sm:$0xf0]  ;;  %v2660_v21 = vor.u32 %v3648_v15, %v2659_v13 }
  0x96   :  { %v2915_v18 = vld [vmem:[#allocation5 + $0x3a8] sm:$0xf]  ;;  %v3712_v19 = vld [vmem:[#allocation5 + $0x3b4] sm:$0xf0]  ;;  %v2788_v22 = vor.u32 %v3680_v17, %v2787_v16 }
  0x97   :  { %1871 = vmatpush.bf16.msrb.mxu2 %v3232_v32  ;;  %1884 = vmatpush.bf16.msrb.mxu3 %v3360_v36  ;;  %v2515_v23 = vld [vmem:[#allocation5 + $0x88] sm:$0xf]  ;;  %v3612_v24 = vld [vmem:[#allocation5 + $0x94] sm:$0xf0]  ;;  %v2916_v26 = vor.u32 %v3712_v19, %v2915_v18 }
  0x98   :  { %v2643_v25 = vld [vmem:[#allocation5 + $0x188] sm:$0xf]  ;;  %v3644_v27 = vld [vmem:[#allocation5 + $0x194] sm:$0xf0]  ;;  %v2516_v32 = vor.u32 %v3612_v24, %v2515_v23 }
  0x99   :  { %1846 = vmatpush.bf16.msrb.mxu0 %v2960_v43  ;;  %1859 = vmatpush.bf16.msrb.mxu1 %v3088_v50  ;;  %v2771_v28 = vld [vmem:[#allocation5 + $0x288] sm:$0xf]  ;;  %v3676_v29 = vld [vmem:[#allocation5 + $0x294] sm:$0xf0]  ;;  %v2644_v33 = vor.u32 %v3644_v27, %v2643_v25 }
  0x9a   :  { %v2899_v30 = vld [vmem:[#allocation5 + $0x388] sm:$0xf]  ;;  %v3708_v31 = vld [vmem:[#allocation5 + $0x394] sm:$0xf0]  ;;  %v2772_v34 = vor.u32 %v3676_v29, %v2771_v28 }
  0x9b   :  { %1872 = vmatpush.bf16.msrb.mxu2 %v3216_v52  ;;  %1885 = vmatpush.bf16.msrb.mxu3 %v3344_v57  ;;  %v2499_v35 = vld [vmem:[#allocation5 + $0x68] sm:$0xf]  ;;  %v3608_v36 = vld [vmem:[#allocation5 + $0x74] sm:$0xf0]  ;;  %v2900_v38 = vor.u32 %v3708_v31, %v2899_v30 }
  0x9c   :  { %1847 = vmatmul.bf16.vlgmr.msrb.gmra.mxu0 %v4088_v54  ;;  %1860 = vmatmul.bf16.vlgmr.msrb.gmra.mxu1 %v4092_v59  ;;  %v2627_v37 = vld [vmem:[#allocation5 + $0x168] sm:$0xf]  ;;  %v3640_v39 = vld [vmem:[#allocation5 + $0x174] sm:$0xf0]  ;;  %v2500_v45 = vor.u32 %v3608_v36, %v2499_v35 }
  0x9d   :  { %1891 = vmatpush.bf16.msra.mxu0 %v2564_v60  ;;  %1904 = vmatpush.bf16.msra.mxu1 %v2692_v61  ;;  %v2755_v40 = vld [vmem:[#allocation5 + $0x268] sm:$0xf]  ;;  %v3672_v41 = vld [vmem:[#allocation5 + $0x274] sm:$0xf0]  ;;  %v2628_v48 = vor.u32 %v3640_v39, %v2627_v37 }
  0x9e   :  { %1873 = vmatmul.bf16.vlgmr.msrb.gmra.mxu2 %v4086_v44  ;;  %1886 = vmatmul.bf16.vlgmr.msrb.gmra.mxu3 %v4090_v58  ;;  %v2883_v42 = vld [vmem:[#allocation5 + $0x368] sm:$0xf]  ;;  %v3704_v43 = vld [vmem:[#allocation5 + $0x374] sm:$0xf0]  ;;  %v2756_v49 = vor.u32 %v3672_v41, %v2755_v40 }
  0x9f   :  { %1917 = vmatpush.bf16.msra.mxu2 %v2820_v62  ;;  %1930 = vmatpush.bf16.msra.mxu3 %v2948_v2  ;;  %v2483_v50 = vld [vmem:[#allocation5 + $0x48] sm:$0xf]  ;;  %v3604_v52 = vld [vmem:[#allocation5 + $0x54] sm:$0xf0]  ;;  %v2884_v56 = vor.u32 %v3704_v43, %v2883_v42 }
  0xa0   :  { %v2611_v53 = vld [vmem:[#allocation5 + $0x148] sm:$0xf]  ;;  %v3636_v57 = vld [vmem:[#allocation5 + $0x154] sm:$0xf0]  ;;  %v2484_v0 = vor.u32 %v3604_v52, %v2483_v50 }
  0xa1   :  { %1892 = vmatpush.bf16.msra.mxu0 %v2548_v8  ;;  %1905 = vmatpush.bf16.msra.mxu1 %v2676_v9  ;;  %v2739_v60 = vld [vmem:[#allocation5 + $0x248] sm:$0xf]  ;;  %v3668_v61 = vld [vmem:[#allocation5 + $0x254] sm:$0xf0]  ;;  %v2612_v1 = vor.u32 %v3636_v57, %v2611_v53 }
  0xa2   :  { %v2867_v62 = vld [vmem:[#allocation5 + $0x348] sm:$0xf]  ;;  %v3700_v63 = vld [vmem:[#allocation5 + $0x354] sm:$0xf0]  ;;  %v2740_v2 = vor.u32 %v3668_v61, %v2739_v60 }
  0xa3   :  { %1918 = vmatpush.bf16.msra.mxu2 %v2804_v10  ;;  %1931 = vmatpush.bf16.msra.mxu3 %v2932_v14  ;;  %v2467_v3 = vld [vmem:[#allocation5 + $0x28] sm:$0xf]  ;;  %v3600_v4 = vld [vmem:[#allocation5 + $0x34] sm:$0xf0]  ;;  %v2868_v6 = vor.u32 %v3700_v63, %v2867_v62 }
  0xa4   :  { %v2595_v5 = vld [vmem:[#allocation5 + $0x128] sm:$0xf]  ;;  %v3632_v7 = vld [vmem:[#allocation5 + $0x134] sm:$0xf0]  ;;  %v2468_v12 = vor.u32 %v3600_v4, %v2467_v3 }
  0xa5   :  { %1893 = vmatpush.bf16.msra.mxu0 %v2532_v20  ;;  %1906 = vmatpush.bf16.msra.mxu1 %v2660_v21  ;;  %v2723_v8 = vld [vmem:[#allocation5 + $0x228] sm:$0xf]  ;;  %v3664_v9 = vld [vmem:[#allocation5 + $0x234] sm:$0xf0]  ;;  %v2596_v15 = vor.u32 %v3632_v7, %v2595_v5 }
  0xa6   :  { %v2851_v10 = vld [vmem:[#allocation5 + $0x328] sm:$0xf]  ;;  %v3696_v11 = vld [vmem:[#allocation5 + $0x334] sm:$0xf0]  ;;  %v2724_v16 = vor.u32 %v3664_v9, %v2723_v8 }
  0xa7   :  { %1919 = vmatpush.bf16.msra.mxu2 %v2788_v22  ;;  %1932 = vmatpush.bf16.msra.mxu3 %v2916_v26  ;;  %v2451_v13 = vld [vmem:[#allocation5 + $0x8] sm:$0xf]  ;;  %v3596_v14 = vld [vmem:[#allocation5 + $0x14] sm:$0xf0]  ;;  %v2852_v20 = vor.u32 %v3696_v11, %v2851_v10 }
  0xa8   :  { %v2579_v17 = vld [vmem:[#allocation5 + $0x108] sm:$0xf]  ;;  %v3628_v18 = vld [vmem:[#allocation5 + $0x114] sm:$0xf0]  ;;  %v2452_v27 = vor.u32 %v3596_v14, %v2451_v13 }
  0xa9   :  { %1894 = vmatpush.bf16.msra.mxu0 %v2516_v32  ;;  %1907 = vmatpush.bf16.msra.mxu1 %v2644_v33  ;;  %v2707_v19 = vld [vmem:[#allocation5 + $0x208] sm:$0xf]  ;;  %v3660_v21 = vld [vmem:[#allocation5 + $0x214] sm:$0xf0]  ;;  %v2580_v31 = vor.u32 %v3628_v18, %v2579_v17 }
  0xaa   :  { %v2835_v22 = vld [vmem:[#allocation5 + $0x308] sm:$0xf]  ;;  %v3692_v23 = vld [vmem:[#allocation5 + $0x314] sm:$0xf0]  ;;  %v2708_v32 = vor.u32 %v3660_v21, %v2707_v19 }
  0xab   :  { %1920 = vmatpush.bf16.msra.mxu2 %v2772_v34  ;;  %1933 = vmatpush.bf16.msra.mxu3 %v2900_v38  ;;  %v3075_v24 = vld [vmem:[#allocation5 + $0x4e8] sm:$0xf]  ;;  %v3752_v25 = vld [vmem:[#allocation5 + $0x4f4] sm:$0xf0]  ;;  %v2836_v35 = vor.u32 %v3692_v23, %v2835_v22 }
  0xac   :  { %v3203_v26 = vld [vmem:[#allocation5 + $0x5e8] sm:$0xf]  ;;  %v3784_v28 = vld [vmem:[#allocation5 + $0x5f4] sm:$0xf0]  ;;  %v3076_v36 = vor.u32 %v3752_v25, %v3075_v24 }
  0xad   :  { %1895 = vmatpush.bf16.msra.mxu0 %v2500_v45  ;;  %1908 = vmatpush.bf16.msra.mxu1 %v2628_v48  ;;  %v3331_v29 = vld [vmem:[#allocation5 + $0x6e8] sm:$0xf]  ;;  %v3816_v30 = vld [vmem:[#allocation5 + $0x6f4] sm:$0xf0]  ;;  %v3204_v37 = vor.u32 %v3784_v28, %v3203_v26 }
  0xae   :  { %v3459_v33 = vld [vmem:[#allocation5 + $0x7e8] sm:$0xf]  ;;  %v3848_v34 = vld [vmem:[#allocation5 + $0x7f4] sm:$0xf0]  ;;  %v3332_v38 = vor.u32 %v3816_v30, %v3331_v29 }
  0xaf   :  { %1921 = vmatpush.bf16.msra.mxu2 %v2756_v49  ;;  %1934 = vmatpush.bf16.msra.mxu3 %v2884_v56  ;;  %v3059_v39 = vld [vmem:[#allocation5 + $0x4c8] sm:$0xf]  ;;  %v3748_v40 = vld [vmem:[#allocation5 + $0x4d4] sm:$0xf0]  ;;  %v3460_v42 = vor.u32 %v3848_v34, %v3459_v33 }
  0xb0   :  { %v3187_v41 = vld [vmem:[#allocation5 + $0x5c8] sm:$0xf]  ;;  %v3780_v43 = vld [vmem:[#allocation5 + $0x5d4] sm:$0xf0]  ;;  %v3060_v52 = vor.u32 %v3748_v40, %v3059_v39 }
  0xb1   :  { %1896 = vmatpush.bf16.msra.mxu0 %v2484_v0  ;;  %1909 = vmatpush.bf16.msra.mxu1 %v2612_v1  ;;  %v3315_v45 = vld [vmem:[#allocation5 + $0x6c8] sm:$0xf]  ;;  %v3812_v48 = vld [vmem:[#allocation5 + $0x6d4] sm:$0xf0]  ;;  %v3188_v53 = vor.u32 %v3780_v43, %v3187_v41 }
  0xb2   :  { %v3443_v49 = vld [vmem:[#allocation5 + $0x7c8] sm:$0xf]  ;;  %v3844_v50 = vld [vmem:[#allocation5 + $0x7d4] sm:$0xf0]  ;;  %v3316_v56 = vor.u32 %v3812_v48, %v3315_v45 }
  0xb3   :  { %1922 = vmatpush.bf16.msra.mxu2 %v2740_v2  ;;  %1935 = vmatpush.bf16.msra.mxu3 %v2868_v6  ;;  %v3043_v57 = vld [vmem:[#allocation5 + $0x4a8] sm:$0xf]  ;;  %v3744_v60 = vld [vmem:[#allocation5 + $0x4b4] sm:$0xf0]  ;;  %v3444_v62 = vor.u32 %v3844_v50, %v3443_v49 }
  0xb4   :  { %v3171_v61 = vld [vmem:[#allocation5 + $0x5a8] sm:$0xf]  ;;  %v3776_v63 = vld [vmem:[#allocation5 + $0x5b4] sm:$0xf0]  ;;  %v3044_v4 = vor.u32 %v3744_v60, %v3043_v57 }
  0xb5   :  { %1897 = vmatpush.bf16.msra.mxu0 %v2468_v12  ;;  %1910 = vmatpush.bf16.msra.mxu1 %v2596_v15  ;;  %v3299_v0 = vld [vmem:[#allocation5 + $0x6a8] sm:$0xf]  ;;  %v3808_v1 = vld [vmem:[#allocation5 + $0x6b4] sm:$0xf0]  ;;  %v3172_v5 = vor.u32 %v3776_v63, %v3171_v61 }
  0xb6   :  { %v3427_v2 = vld [vmem:[#allocation5 + $0x7a8] sm:$0xf]  ;;  %v3840_v3 = vld [vmem:[#allocation5 + $0x7b4] sm:$0xf0]  ;;  %v3300_v6 = vor.u32 %v3808_v1, %v3299_v0 }
  0xb7   :  { %1923 = vmatpush.bf16.msra.mxu2 %v2724_v16  ;;  %1936 = vmatpush.bf16.msra.mxu3 %v2852_v20  ;;  %v3027_v7 = vld [vmem:[#allocation5 + $0x488] sm:$0xf]  ;;  %v3740_v8 = vld [vmem:[#allocation5 + $0x494] sm:$0xf0]  ;;  %v3428_v10 = vor.u32 %v3840_v3, %v3427_v2 }
  0xb8   :  { %v3155_v9 = vld [vmem:[#allocation5 + $0x588] sm:$0xf]  ;;  %v3772_v11 = vld [vmem:[#allocation5 + $0x594] sm:$0xf0]  ;;  %v3028_v16 = vor.u32 %v3740_v8, %v3027_v7 }
  0xb9   :  { %1898 = vmatpush.bf16.msra.mxu0 %v2452_v27  ;;  %1911 = vmatpush.bf16.msra.mxu1 %v2580_v31  ;;  %v3283_v12 = vld [vmem:[#allocation5 + $0x688] sm:$0xf]  ;;  %v3804_v13 = vld [vmem:[#allocation5 + $0x694] sm:$0xf0]  ;;  %v3156_v17 = vor.u32 %v3772_v11, %v3155_v9  ;;  %v2565_v11 = vld [vmem:[#allocation5 + $0xf8] sm:$0xf0] }
  0xba   :  { %v3411_v14 = vld [vmem:[#allocation5 + $0x788] sm:$0xf]  ;;  %v3836_v15 = vld [vmem:[#allocation5 + $0x794] sm:$0xf0]  ;;  %v3284_v18 = vor.u32 %v3804_v13, %v3283_v12  ;;  %v3654_v12 = vld [vmem:[#allocation5 + $0x1ec] sm:$0xf] }
  0xbb   :  { %1924 = vmatpush.bf16.msra.mxu2 %v2708_v32  ;;  %1937 = vmatpush.bf16.msra.mxu3 %v2836_v35  ;;  %v3011_v19 = vld [vmem:[#allocation5 + $0x468] sm:$0xf]  ;;  %v3736_v20 = vld [vmem:[#allocation5 + $0x474] sm:$0xf0]  ;;  %v3412_v22 = vor.u32 %v3836_v15, %v3411_v14  ;;  %v2693_v14 = vld [vmem:[#allocation5 + $0x1f8] sm:$0xf0] }
  0xbc   :  { %1899 = vmatmul.bf16.vlgmr.msra.gmra.mxu0 %v4076_v47  ;;  %1912 = vmatmul.bf16.vlgmr.msra.gmra.mxu1 %v4080_v55  ;;  %v3139_v21 = vld [vmem:[#allocation5 + $0x568] sm:$0xf]  ;;  %v3768_v23 = vld [vmem:[#allocation5 + $0x574] sm:$0xf0]  ;;  %v3012_v28 = vor.u32 %v3736_v20, %v3011_v19  ;;  %v3686_v15 = vld [vmem:[#allocation5 + $0x2ec] sm:$0xf] }
  0xbd   :  { %1943 = vmatpush.bf16.msrb.mxu0 %v3076_v36  ;;  %1956 = vmatpush.bf16.msrb.mxu1 %v3204_v37  ;;  %v3267_v24 = vld [vmem:[#allocation5 + $0x668] sm:$0xf]  ;;  %v3800_v25 = vld [vmem:[#allocation5 + $0x674] sm:$0xf0]  ;;  %v3140_v29 = vor.u32 %v3768_v23, %v3139_v21  ;;  %v3718_v20 = vld [vmem:[#allocation5 + $0x3ec] sm:$0xf] }
  0xbe   :  { %1925 = vmatmul.bf16.vlgmr.msra.gmra.mxu2 %v4074_v46  ;;  %1938 = vmatmul.bf16.vlgmr.msra.gmra.mxu3 %v4078_v51  ;;  %v3395_v26 = vld [vmem:[#allocation5 + $0x768] sm:$0xf]  ;;  %v3832_v27 = vld [vmem:[#allocation5 + $0x774] sm:$0xf0]  ;;  %v3268_v30 = vor.u32 %v3800_v25, %v3267_v24  ;;  %v2949_v21 = vld [vmem:[#allocation5 + $0x3f8] sm:$0xf0] }
  0xbf   :  { %1969 = vmatpush.bf16.msrb.mxu2 %v3332_v38  ;;  %1982 = vmatpush.bf16.msrb.mxu3 %v3460_v42  ;;  %v2995_v31 = vld [vmem:[#allocation5 + $0x448] sm:$0xf]  ;;  %v3732_v32 = vld [vmem:[#allocation5 + $0x454] sm:$0xf0]  ;;  %v3396_v34 = vor.u32 %v3832_v27, %v3395_v26  ;;  %v2696_v26 = vor.u32 %v3654_v12, %v2693_v14  ;;  %v2901_v12 = vld [vmem:[#allocation5 + $0x398] sm:$0xf0] }
  0xc0   :  { %v3123_v33 = vld [vmem:[#allocation5 + $0x548] sm:$0xf]  ;;  %v3764_v35 = vld [vmem:[#allocation5 + $0x554] sm:$0xf0]  ;;  %v2996_v40 = vor.u32 %v3732_v32, %v2995_v31  ;;  %v2952_v32 = vor.u32 %v3718_v20, %v2949_v21  ;;  %v3638_v20 = vld [vmem:[#allocation5 + $0x16c] sm:$0xf] }
  0xc1   :  { %1944 = vmatpush.bf16.msrb.mxu0 %v3060_v52  ;;  %1957 = vmatpush.bf16.msrb.mxu1 %v3188_v53  ;;  %v3251_v36 = vld [vmem:[#allocation5 + $0x648] sm:$0xf]  ;;  %v3796_v37 = vld [vmem:[#allocation5 + $0x654] sm:$0xf0]  ;;  %v3124_v42 = vor.u32 %v3764_v35, %v3123_v33  ;;  %v2677_v33 = vld [vmem:[#allocation5 + $0x1d8] sm:$0xf0] }
  0xc2   :  { %v3379_v38 = vld [vmem:[#allocation5 + $0x748] sm:$0xf]  ;;  %v3828_v39 = vld [vmem:[#allocation5 + $0x754] sm:$0xf0]  ;;  %v3252_v43 = vor.u32 %v3796_v37, %v3251_v36  ;;  %v2805_v35 = vld [vmem:[#allocation5 + $0x2d8] sm:$0xf0] }
  0xc3   :  { %1970 = vmatpush.bf16.msrb.mxu2 %v3316_v56  ;;  %1983 = vmatpush.bf16.msrb.mxu3 %v3444_v62  ;;  %v2979_v41 = vld [vmem:[#allocation5 + $0x428] sm:$0xf]  ;;  %v3728_v45 = vld [vmem:[#allocation5 + $0x434] sm:$0xf0]  ;;  %v3380_v50 = vor.u32 %v3828_v39, %v3379_v38  ;;  %v4110_v56 = vld [vmem:[#allocation7] sm:$0xf] }
  0xc4   :  { %v3107_v48 = vld [vmem:[#allocation5 + $0x528] sm:$0xf]  ;;  %v3760_v49 = vld [vmem:[#allocation5 + $0x534] sm:$0xf0]  ;;  %v2980_v61 = vor.u32 %v3728_v45, %v2979_v41  ;;  %v3714_v36 = vld [vmem:[#allocation5 + $0x3cc] sm:$0xf] }
  0xc5   :  { %1945 = vmatpush.bf16.msrb.mxu0 %v3044_v4  ;;  %1958 = vmatpush.bf16.msrb.mxu1 %v3172_v5  ;;  %v3235_v52 = vld [vmem:[#allocation5 + $0x628] sm:$0xf]  ;;  %v3792_v53 = vld [vmem:[#allocation5 + $0x634] sm:$0xf0]  ;;  %v3108_v1 = vor.u32 %v3760_v49, %v3107_v48  ;;  %v395_v5 = vperm.slane %v4110_v56, 0 }
  0xc6   :  { %v3363_v57 = vld [vmem:[#allocation5 + $0x728] sm:$0xf]  ;;  %v3824_v60 = vld [vmem:[#allocation5 + $0x734] sm:$0xf0]  ;;  %v3236_v2 = vor.u32 %v3792_v53, %v3235_v52  ;;  %v2933_v37 = vld [vmem:[#allocation5 + $0x3d8] sm:$0xf0] }
  0xc7   :  { %1971 = vmatpush.bf16.msrb.mxu2 %v3300_v6  ;;  %1984 = vmatpush.bf16.msrb.mxu3 %v3428_v10  ;;  %v2963_v62 = vld [vmem:[#allocation5 + $0x408] sm:$0xf]  ;;  %v3724_v63 = vld [vmem:[#allocation5 + $0x414] sm:$0xf0]  ;;  %v3364_v6 = vor.u32 %v3824_v60, %v3363_v57  ;;  %v3622_v10 = vld [vmem:[#allocation5 + $0xec] sm:$0xf] }
  0xc8   :  { %v3091_v0 = vld [vmem:[#allocation5 + $0x508] sm:$0xf]  ;;  %v3756_v3 = vld [vmem:[#allocation5 + $0x514] sm:$0xf0]  ;;  %v2964_v13 = vor.u32 %v3724_v63, %v2963_v62  ;;  %v2568_v25 = vor.u32 %v3622_v10, %v2565_v11  ;;  %v3614_v45 = vld [vmem:[#allocation5 + $0xac] sm:$0xf] }
  0xc9   :  { %1946 = vmatpush.bf16.msrb.mxu0 %v3028_v16  ;;  %1959 = vmatpush.bf16.msrb.mxu1 %v3156_v17  ;;  %v3219_v4 = vld [vmem:[#allocation5 + $0x608] sm:$0xf]  ;;  %v3788_v7 = vld [vmem:[#allocation5 + $0x614] sm:$0xf0]  ;;  %v2821_v16 = vld [vmem:[#allocation5 + $0x2f8] sm:$0xf0] }
  0xca   :  { %v3347_v8 = vld [vmem:[#allocation5 + $0x708] sm:$0xf]  ;;  %v3820_v9 = vld [vmem:[#allocation5 + $0x714] sm:$0xf0]  ;;  %v3220_v19 = vor.u32 %v3788_v7, %v3219_v4  ;;  %v2824_v27 = vor.u32 %v3686_v15, %v2821_v16  ;;  %v2533_v48 = vld [vmem:[#allocation5 + $0xb8] sm:$0xf0] }
  0xcb   :  { %1972 = vmatpush.bf16.msrb.mxu2 %v3284_v18  ;;  %1985 = vmatpush.bf16.msrb.mxu3 %v3412_v22  ;;  %v3092_v18 = vor.u32 %v3756_v3, %v3091_v0  ;;  %v3348_v24 = vor.u32 %v3820_v9, %v3347_v8  ;;  %v3646_v49 = vld [vmem:[#allocation5 + $0x1ac] sm:$0xf]  ;;  %v2661_v52 = vld [vmem:[#allocation5 + $0x1b8] sm:$0xf0] }
  0xcc   :  { %v3678_v53 = vld [vmem:[#allocation5 + $0x2ac] sm:$0xf]  ;;  %v2789_v57 = vld [vmem:[#allocation5 + $0x2b8] sm:$0xf0] }
  0xcd   :  { %1947 = vmatpush.bf16.msrb.mxu0 %v3012_v28  ;;  %1960 = vmatpush.bf16.msrb.mxu1 %v3140_v29  ;;  %v3618_v28 = vld [vmem:[#allocation5 + $0xcc] sm:$0xf]  ;;  %v2549_v29 = vld [vmem:[#allocation5 + $0xd8] sm:$0xf0]  ;;  %v2792_v3 = vor.u32 %v3678_v53, %v2789_v57 }
  0xce   :  { %v2552_v39 = vor.u32 %v3618_v28, %v2549_v29  ;;  %v3710_v62 = vld [vmem:[#allocation5 + $0x3ac] sm:$0xf]  ;;  %v2917_v63 = vld [vmem:[#allocation5 + $0x3b8] sm:$0xf0] }
  0xcf   :  { %1973 = vmatpush.bf16.msrb.mxu2 %v3268_v30  ;;  %1986 = vmatpush.bf16.msrb.mxu3 %v3396_v34  ;;  %v1692_v17 = vpop.f32.mrf.mxu0  ;;  %v3650_v30 = vld [vmem:[#allocation5 + $0x1cc] sm:$0xf]  ;;  %v2920_v7 = vor.u32 %v3710_v62, %v2917_v63  ;;  %v2645_v8 = vld [vmem:[#allocation5 + $0x198] sm:$0xf0] }
  0xd0   :  { %v1693_v22 = vadd.f32 %v1692_v17, %v395_v5  ;;  %v3682_v34 = vld [vmem:[#allocation5 + $0x2cc] sm:$0xf]  ;;  %v2517_v5 = vld [vmem:[#allocation5 + $0x98] sm:$0xf0] }
  0xd1   :  { %1948 = vmatpush.bf16.msrb.mxu0 %v2996_v40  ;;  %1961 = vmatpush.bf16.msrb.mxu1 %v3124_v42  ;;  %v1705_v23 = vpop.f32.mrf.mxu1  ;;  %v2680_v42 = vor.u32 %v3650_v30, %v2677_v33  ;;  %v3610_v4 = vld [vmem:[#allocation5 + $0x8c] sm:$0xf]  ;;  %v2773_v10 = vld [vmem:[#allocation5 + $0x298] sm:$0xf0] }
  0xd2   :  { %v1706_v31 = vadd.f32 %v1705_v23, %v1693_v22  ;;  %v3674_v9 = vld [vmem:[#allocation5 + $0x28c] sm:$0xf]  ;;  %v2520_v14 = vor.u32 %v3610_v4, %v2517_v5  ;;  %v2629_v22 = vld [vmem:[#allocation5 + $0x178] sm:$0xf0] }
  0xd3   :  { %1974 = vmatpush.bf16.msrb.mxu2 %v3252_v43  ;;  %1987 = vmatpush.bf16.msrb.mxu3 %v3380_v50  ;;  %v2808_v43 = vor.u32 %v3682_v34, %v2805_v35  ;;  %v2936_v50 = vor.u32 %v3714_v36, %v2933_v37  ;;  %v3706_v11 = vld [vmem:[#allocation5 + $0x38c] sm:$0xf]  ;;  %v2776_v17 = vor.u32 %v3674_v9, %v2773_v10  ;;  %v2485_v34 = vld [vmem:[#allocation5 + $0x58] sm:$0xf0] }
  0xd4   :  { %v2904_v21 = vor.u32 %v3706_v11, %v2901_v12  ;;  %v3670_v23 = vld [vmem:[#allocation5 + $0x26c] sm:$0xf]  ;;  %v2613_v37 = vld [vmem:[#allocation5 + $0x158] sm:$0xf0] }
  0xd5   :  { %1949 = vmatpush.bf16.msrb.mxu0 %v2980_v61  ;;  %1962 = vmatpush.bf16.msrb.mxu1 %v3108_v1  ;;  %v1718_v38 = vpop.f32.mrf.mxu2  ;;  %v2536_v1 = vor.u32 %v3614_v45, %v2533_v48  ;;  %v3602_v33 = vld [vmem:[#allocation5 + $0x4c] sm:$0xf]  ;;  %v2469_v53 = vld [vmem:[#allocation5 + $0x38] sm:$0xf0] }
  0xd6   :  { %v1719_v40 = vadd.f32 %v1718_v38, %v1706_v31  ;;  %v2632_v31 = vor.u32 %v3638_v20, %v2629_v22  ;;  %v3634_v35 = vld [vmem:[#allocation5 + $0x14c] sm:$0xf]  ;;  %v2488_v45 = vor.u32 %v3602_v33, %v2485_v34  ;;  %v2725_v63 = vld [vmem:[#allocation5 + $0x238] sm:$0xf0] }
  0xd7   :  { %1975 = vmatpush.bf16.msrb.mxu2 %v3236_v2  ;;  %1988 = vmatpush.bf16.msrb.mxu3 %v3364_v6  ;;  %v1731_v41 = vpop.f32.mrf.mxu3  ;;  %v1694_v61 = vpop.f32.mrf.mxu0  ;;  %v2664_v2 = vor.u32 %v3646_v49, %v2661_v52  ;;  %v3642_v6 = vld [vmem:[#allocation5 + $0x18c] sm:$0xf]  ;;  %v2616_v49 = vor.u32 %v3634_v35, %v2613_v37  ;;  %v2581_v12 = vld [vmem:[#allocation5 + $0x118] sm:$0xf0] }
  0xd8   :  { %v1732_v60 = vadd.f32 %v1731_v41, %v1719_v40  ;;  %v2648_v16 = vor.u32 %v3642_v6, %v2645_v8  ;;  %v3666_v38 = vld [vmem:[#allocation5 + $0x24c] sm:$0xf]  ;;  %v2597_v61 = vld [vmem:[#allocation5 + $0x138] sm:$0xf0] }
  0xd9   :  { %1950 = vmatpush.bf16.msrb.mxu0 %v2964_v13  ;;  %1963 = vmatpush.bf16.msrb.mxu1 %v3092_v18  ;;  %v1707_v0 = vpop.f32.mrf.mxu1  ;;  %v3606_v18 = vld [vmem:[#allocation5 + $0x6c] sm:$0xf] }
  0xda   :  { %v3698_v41 = vld [vmem:[#allocation5 + $0x34c] sm:$0xf] }
  0xdb   :  { %1976 = vmatpush.bf16.msrb.mxu2 %v3220_v19  ;;  %1989 = vmatpush.bf16.msrb.mxu3 %v3348_v24  ;;  %v2501_v19 = vld [vmem:[#allocation5 + $0x78] sm:$0xf0]  ;;  %v3598_v52 = vld [vmem:[#allocation5 + $0x2c] sm:$0xf] }
  0xdc   :  { %1951 = vmatmul.bf16.vlgmr.msrb.gmra.mxu0 %v4088_v54  ;;  %1964 = vmatmul.bf16.vlgmr.msrb.gmra.mxu1 %v4092_v59  ;;  %v2757_v24 = vld [vmem:[#allocation5 + $0x278] sm:$0xf0]  ;;  %v2504_v28 = vor.u32 %v3606_v18, %v2501_v19  ;;  %v3630_v57 = vld [vmem:[#allocation5 + $0x12c] sm:$0xf]  ;;  %v2472_v5 = vor.u32 %v3598_v52, %v2469_v53 }
  0xdd   :  { %1995 = vmatpush.bf16.msra.mxu0 %v2568_v25  ;;  %2008 = vmatpush.bf16.msra.mxu1 %v2696_v26  ;;  %v1720_v13 = vpop.f32.mrf.mxu2  ;;  %v3702_v25 = vld [vmem:[#allocation5 + $0x36c] sm:$0xf]  ;;  %v2885_v26 = vld [vmem:[#allocation5 + $0x378] sm:$0xf0]  ;;  %v2600_v9 = vor.u32 %v3630_v57, %v2597_v61 }
  0xde   :  { %1977 = vmatmul.bf16.vlgmr.msrb.gmra.mxu2 %v4086_v44  ;;  %1990 = vmatmul.bf16.vlgmr.msrb.gmra.mxu3 %v4090_v58  ;;  %v2888_v36 = vor.u32 %v3702_v25, %v2885_v26  ;;  %v3662_v62 = vld [vmem:[#allocation5 + $0x22c] sm:$0xf]  ;;  %v3077_v19 = vld [vmem:[#allocation5 + $0x4f8] sm:$0xf0] }
  0xdf   :  { %2021 = vmatpush.bf16.msra.mxu2 %v2824_v27  ;;  %2034 = vmatpush.bf16.msra.mxu3 %v2952_v32  ;;  %v1733_v15 = vpop.f32.mrf.mxu3  ;;  %v1744_v27 = vpop.f32.mrf.mxu0  ;;  %v2760_v32 = vor.u32 %v3670_v23, %v2757_v24  ;;  %v3594_v6 = vld [vmem:[#allocation5 + $0xc] sm:$0xf]  ;;  %v2728_v10 = vor.u32 %v3662_v62, %v2725_v63  ;;  %v3205_v23 = vld [vmem:[#allocation5 + $0x5f8] sm:$0xf0] }
  0xe0   :  { %v1745_v29 = vadd.f32 %v1744_v27, %v1732_v60  ;;  %v3626_v11 = vld [vmem:[#allocation5 + $0x10c] sm:$0xf]  ;;  %v2709_v15 = vld [vmem:[#allocation5 + $0x218] sm:$0xf0] }
  0xe1   :  { %1996 = vmatpush.bf16.msra.mxu0 %v2552_v39  ;;  %2009 = vmatpush.bf16.msra.mxu1 %v2680_v42  ;;  %v1757_v30 = vpop.f32.mrf.mxu1  ;;  %v2741_v39 = vld [vmem:[#allocation5 + $0x258] sm:$0xf0]  ;;  %v3658_v13 = vld [vmem:[#allocation5 + $0x20c] sm:$0xf]  ;;  %v2584_v26 = vor.u32 %v3626_v11, %v2581_v12 }
  0xe2   :  { %v1758_v40 = vadd.f32 %v1757_v30, %v1745_v29  ;;  %v2869_v42 = vld [vmem:[#allocation5 + $0x358] sm:$0xf0]  ;;  %v3750_v18 = vld [vmem:[#allocation5 + $0x4ec] sm:$0xf]  ;;  %v2712_v27 = vor.u32 %v3658_v13, %v2709_v15 }
  0xe3   :  { %2022 = vmatpush.bf16.msra.mxu2 %v2808_v43  ;;  %2035 = vmatpush.bf16.msra.mxu3 %v2936_v50  ;;  %v2744_v50 = vor.u32 %v3666_v38, %v2741_v39  ;;  %v2872_v60 = vor.u32 %v3698_v41, %v2869_v42  ;;  %v3782_v20 = vld [vmem:[#allocation5 + $0x5ec] sm:$0xf]  ;;  %v3333_v25 = vld [vmem:[#allocation5 + $0x6f8] sm:$0xf0] }
  0xe4   :  { %v3814_v24 = vld [vmem:[#allocation5 + $0x6ec] sm:$0xf]  ;;  %v3461_v29 = vld [vmem:[#allocation5 + $0x7f8] sm:$0xf0]  ;;  %v3208_v33 = vor.u32 %v3782_v20, %v3205_v23 }
  0xe5   :  { %1997 = vmatpush.bf16.msra.mxu0 %v2536_v1  ;;  %2010 = vmatpush.bf16.msra.mxu1 %v2664_v2  ;;  %v1770_v43 = vpop.f32.mrf.mxu2  ;;  %v3694_v1 = vld [vmem:[#allocation5 + $0x32c] sm:$0xf]  ;;  %v2853_v2 = vld [vmem:[#allocation5 + $0x338] sm:$0xf0]  ;;  %v3336_v34 = vor.u32 %v3814_v24, %v3333_v25 }
  0xe6   :  { %v1771_v48 = vadd.f32 %v1770_v43, %v1758_v40  ;;  %v3746_v35 = vld [vmem:[#allocation5 + $0x4cc] sm:$0xf]  ;;  %v3189_v39 = vld [vmem:[#allocation5 + $0x5d8] sm:$0xf0] }
  0xe7   :  { %2023 = vmatpush.bf16.msra.mxu2 %v2792_v3  ;;  %2036 = vmatpush.bf16.msra.mxu3 %v2920_v7  ;;  %v1783_v0 = vpop.f32.mrf.mxu3  ;;  %v1746_v4 = vpop.f32.mrf.mxu0  ;;  %v2453_v7 = vld [vmem:[#allocation5 + $0x18] sm:$0xf0]  ;;  %v3778_v37 = vld [vmem:[#allocation5 + $0x5cc] sm:$0xf] }
  0xe8   :  { %v4117_v3 = vadd.f32 %v1783_v0, %v1771_v48  ;;  %v2456_v22 = vor.u32 %v3594_v6, %v2453_v7  ;;  %v3810_v40 = vld [vmem:[#allocation5 + $0x6cc] sm:$0xf]  ;;  %v3317_v41 = vld [vmem:[#allocation5 + $0x6d8] sm:$0xf0]  ;;  %v3192_v48 = vor.u32 %v3778_v37, %v3189_v39 }
  0xe9   :  { %1998 = vmatpush.bf16.msra.mxu0 %v2520_v14  ;;  %2011 = vmatpush.bf16.msra.mxu1 %v2648_v16  ;;  %v1759_v8 = vpop.f32.mrf.mxu1  ;;  %v2856_v14 = vor.u32 %v3694_v1, %v2853_v2  ;;  %v3690_v16 = vld [vmem:[#allocation5 + $0x30c] sm:$0xf]  ;;  %v3445_v43 = vld [vmem:[#allocation5 + $0x7d8] sm:$0xf0] }
  0xea   :  { %v3842_v42 = vld [vmem:[#allocation5 + $0x7cc] sm:$0xf]  ;;  %v3045_v52 = vld [vmem:[#allocation5 + $0x4b8] sm:$0xf0] }
  0xeb   :  { %2024 = vmatpush.bf16.msra.mxu2 %v2776_v17  ;;  %2037 = vmatpush.bf16.msra.mxu3 %v2904_v21  ;;  %v2837_v17 = vld [vmem:[#allocation5 + $0x318] sm:$0xf0]  ;;  %v3774_v53 = vld [vmem:[#allocation5 + $0x5ac] sm:$0xf]  ;;  %v3448_v57 = vor.u32 %v3842_v42, %v3445_v43 }
  0xec   :  { %v2840_v30 = vor.u32 %v3690_v16, %v2837_v17  ;;  %v3806_v61 = vld [vmem:[#allocation5 + $0x6ac] sm:$0xf]  ;;  %v3301_v62 = vld [vmem:[#allocation5 + $0x6b8] sm:$0xf0] }
  0xed   :  { %1999 = vmatpush.bf16.msra.mxu0 %v2504_v28  ;;  %2012 = vmatpush.bf16.msra.mxu1 %v2632_v31  ;;  %v1772_v21 = vpop.f32.mrf.mxu2  ;;  %v3846_v28 = vld [vmem:[#allocation5 + $0x7ec] sm:$0xf]  ;;  %v3080_v31 = vor.u32 %v3750_v18, %v3077_v19  ;;  %v3429_v0 = vld [vmem:[#allocation5 + $0x7b8] sm:$0xf0]  ;;  %v3304_v4 = vor.u32 %v3806_v61, %v3301_v62  ;;  %v396_v61 = vperm.slane %v4110_v56, 1 }
  0xee   :  { %v3464_v38 = vor.u32 %v3846_v28, %v3461_v29  ;;  %v3838_v63 = vld [vmem:[#allocation5 + $0x7ac] sm:$0xf]  ;;  %v3029_v6 = vld [vmem:[#allocation5 + $0x498] sm:$0xf0] }
  0xef   :  { %2025 = vmatpush.bf16.msra.mxu2 %v2760_v32  ;;  %2038 = vmatpush.bf16.msra.mxu3 %v2888_v36  ;;  %v1785_v32 = vpop.f32.mrf.mxu3  ;;  %v3061_v36 = vld [vmem:[#allocation5 + $0x4d8] sm:$0xf0]  ;;  %v3432_v7 = vor.u32 %v3838_v63, %v3429_v0  ;;  %v3834_v11 = vld [vmem:[#allocation5 + $0x78c] sm:$0xf] }
  0xf0   :  { %v3157_v8 = vld [vmem:[#allocation5 + $0x598] sm:$0xf0]  ;;  %v3766_v16 = vld [vmem:[#allocation5 + $0x56c] sm:$0xf] }
  0xf1   :  { %2000 = vmatpush.bf16.msra.mxu0 %v2488_v45  ;;  %2013 = vmatpush.bf16.msra.mxu1 %v2616_v49  ;;  %v3064_v45 = vor.u32 %v3746_v35, %v3061_v36  ;;  %v3320_v49 = vor.u32 %v3810_v40, %v3317_v41  ;;  %v3013_v15 = vld [vmem:[#allocation5 + $0x478] sm:$0xf0]  ;;  %v3798_v20 = vld [vmem:[#allocation5 + $0x66c] sm:$0xf] }
  0xf2   :  { %v3141_v19 = vld [vmem:[#allocation5 + $0x578] sm:$0xf0]  ;;  %v3762_v29 = vld [vmem:[#allocation5 + $0x54c] sm:$0xf] }
  0xf3   :  { %2026 = vmatpush.bf16.msra.mxu2 %v2744_v50  ;;  %2039 = vmatpush.bf16.msra.mxu3 %v2872_v60  ;;  %v3742_v50 = vld [vmem:[#allocation5 + $0x4ac] sm:$0xf]  ;;  %v3173_v60 = vld [vmem:[#allocation5 + $0x5b8] sm:$0xf0]  ;;  %v3144_v25 = vor.u32 %v3766_v16, %v3141_v19  ;;  %v3855_v19 = vld [vmem:[#allocation8 + $0x30] sm:$0xff] }
  0xf4   :  { %v3048_v1 = vor.u32 %v3742_v50, %v3045_v52  ;;  %v3176_v2 = vor.u32 %v3774_v53, %v3173_v60  ;;  %v3269_v21 = vld [vmem:[#allocation5 + $0x678] sm:$0xf0]  ;;  %v3826_v36 = vld [vmem:[#allocation5 + $0x74c] sm:$0xf] }
  0xf5   :  { %2001 = vmatpush.bf16.msra.mxu0 %v2472_v5  ;;  %2014 = vmatpush.bf16.msra.mxu1 %v2600_v9  ;;  %v3738_v5 = vld [vmem:[#allocation5 + $0x48c] sm:$0xf]  ;;  %v3397_v23 = vld [vmem:[#allocation5 + $0x778] sm:$0xf0] }
  0xf6   :  { %v3802_v9 = vld [vmem:[#allocation5 + $0x68c] sm:$0xf]  ;;  %v2997_v28 = vld [vmem:[#allocation5 + $0x458] sm:$0xf0] }
  0xf7   :  { %2027 = vmatpush.bf16.msra.mxu2 %v2728_v10  ;;  %2040 = vmatpush.bf16.msra.mxu3 %v2856_v14  ;;  %v3285_v10 = vld [vmem:[#allocation5 + $0x698] sm:$0xf0]  ;;  %v3734_v14 = vld [vmem:[#allocation5 + $0x46c] sm:$0xf] }
  0xf8   :  { %v3288_v13 = vor.u32 %v3802_v9, %v3285_v10  ;;  %v3016_v24 = vor.u32 %v3734_v14, %v3013_v15  ;;  %v3125_v32 = vld [vmem:[#allocation5 + $0x558] sm:$0xf0]  ;;  %v3726_v42 = vld [vmem:[#allocation5 + $0x42c] sm:$0xf] }
  0xf9   :  { %2002 = vmatpush.bf16.msra.mxu0 %v2456_v22  ;;  %2015 = vmatpush.bf16.msra.mxu1 %v2584_v26  ;;  %v4123_v12 = vpop.f32.mrf.mxu0  ;;  %v4125_v17 = vpop.f32.mrf.mxu1  ;;  %v3830_v22 = vld [vmem:[#allocation5 + $0x76c] sm:$0xf]  ;;  %v3272_v26 = vor.u32 %v3798_v20, %v3269_v21  ;;  %v3381_v37 = vld [vmem:[#allocation5 + $0x758] sm:$0xf0]  ;;  %v3128_v40 = vor.u32 %v3762_v29, %v3125_v32  ;;  %v3851_v32 = vld [vmem:[#allocation8 + $0x10] sm:$0xff] }
  0xfa   :  { %v2981_v43 = vld [vmem:[#allocation5 + $0x438] sm:$0xf0]  ;;  %v3790_v52 = vld [vmem:[#allocation5 + $0x62c] sm:$0xf] }
  0xfb   :  { %2028 = vmatpush.bf16.msra.mxu2 %v2712_v27  ;;  %2041 = vmatpush.bf16.msra.mxu3 %v2840_v30  ;;  %v3730_v27 = vld [vmem:[#allocation5 + $0x44c] sm:$0xf]  ;;  %v3109_v50 = vld [vmem:[#allocation5 + $0x538] sm:$0xf0]  ;;  %v2984_v62 = vor.u32 %v3726_v42, %v2981_v43 }
  0xfc   :  { %2003 = vmatmul.bf16.vlgmr.msra.gmra.mxu0 %v4076_v47  ;;  %2016 = vmatmul.bf16.vlgmr.msra.gmra.mxu1 %v4080_v55  ;;  %v3413_v47 = vld [vmem:[#allocation5 + $0x798] sm:$0xf0]  ;;  %v3818_v10 = vld [vmem:[#allocation5 + $0x70c] sm:$0xf] }
  0xfd   :  { %2047 = vmatpush.bf16.msrb.mxu0 %v3080_v31  ;;  %2060 = vmatpush.bf16.msrb.mxu1 %v3208_v33  ;;  %v3416_v18 = vor.u32 %v3834_v11, %v3413_v47  ;;  %v3400_v31 = vor.u32 %v3830_v22, %v3397_v23  ;;  %v3794_v33 = vld [vmem:[#allocation5 + $0x64c] sm:$0xf]  ;;  %v3237_v53 = vld [vmem:[#allocation5 + $0x638] sm:$0xf0]  ;;  %v1797_v47 = vadd.f32 %v4123_v12, %v396_v61  ;;  %v3863_v12 = vld [vmem:[#allocation8 + $0x70] sm:$0xff] }
  0xfe   :  { %2029 = vmatmul.bf16.vlgmr.msra.gmra.mxu2 %v4074_v46  ;;  %2042 = vmatmul.bf16.vlgmr.msra.gmra.mxu3 %v4078_v51  ;;  %v3770_v46 = vld [vmem:[#allocation5 + $0x58c] sm:$0xf]  ;;  %v3032_v51 = vor.u32 %v3738_v5, %v3029_v6  ;;  %v3365_v60 = vld [vmem:[#allocation5 + $0x738] sm:$0xf0]  ;;  %v3240_v0 = vor.u32 %v3790_v52, %v3237_v53  ;;  %v3867_v61 = vld [vmem:[#allocation8 + $0x90] sm:$0xff] }
  0xff   :  { %2073 = vmatpush.bf16.msrb.mxu2 %v3336_v34  ;;  %2086 = vmatpush.bf16.msrb.mxu3 %v3464_v38  ;;  %v3160_v55 = vor.u32 %v3770_v46, %v3157_v8  ;;  %v3253_v34 = vld [vmem:[#allocation5 + $0x658] sm:$0xf0]  ;;  %v3000_v38 = vor.u32 %v3730_v27, %v2997_v28  ;;  %v3862_v23 = vld [vmem:[#allocation8 + $0x68] sm:$0xff]  ;;  %v3871_v28 = vld [vmem:[#allocation8 + $0xb0] sm:$0xff] }
 0x100   :  { %v3256_v41 = vor.u32 %v3794_v33, %v3253_v34  ;;  %v3093_v46 = vld [vmem:[#allocation5 + $0x518] sm:$0xf0] }
 0x101   :  { %2048 = vmatpush.bf16.msrb.mxu0 %v3064_v45  ;;  %2061 = vmatpush.bf16.msrb.mxu1 %v3192_v48  ;;  %v4127_v30 = vpop.f32.mrf.mxu2  ;;  %v4129_v35 = vpop.f32.mrf.mxu3  ;;  %v3758_v45 = vld [vmem:[#allocation5 + $0x52c] sm:$0xf]  ;;  %v3221_v8 = vld [vmem:[#allocation5 + $0x618] sm:$0xf0] }
 0x102   :  { %v1798_v39 = vpop.f32.mrf.mxu0  ;;  %v1811_v48 = vpop.f32.mrf.mxu1  ;;  %v3112_v63 = vor.u32 %v3758_v45, %v3109_v50  ;;  %v3349_v11 = vld [vmem:[#allocation5 + $0x718] sm:$0xf0]  ;;  %v3857_v50 = vld [vmem:[#allocation8 + $0x40] sm:$0xff] }
 0x103   :  { %2074 = vmatpush.bf16.msrb.mxu2 %v3320_v49  ;;  %2087 = vmatpush.bf16.msrb.mxu3 %v3448_v57  ;;  %v3384_v49 = vor.u32 %v3826_v36, %v3381_v37  ;;  %v3822_v57 = vld [vmem:[#allocation5 + $0x72c] sm:$0xf]  ;;  %v3352_v14 = vor.u32 %v3818_v10, %v3349_v11  ;;  %v3856_v15 = vld [vmem:[#allocation8 + $0x38] sm:$0xff]  ;;  %v3859_v36 = vld [vmem:[#allocation8 + $0x50] sm:$0xff] }
 0x104   :  { %v3368_v6 = vor.u32 %v3822_v57, %v3365_v60  ;;  %v3864_v16 = vld [vmem:[#allocation8 + $0x78] sm:$0xff]  ;;  %v3850_v39 = vld [vmem:[#allocation8 + $0x8] sm:$0xff]  ;;  %v3849_v48 = vld [vmem:[#allocation8] sm:$0xff] }
 0x105   :  { %2049 = vmatpush.bf16.msrb.mxu0 %v3048_v1  ;;  %2062 = vmatpush.bf16.msrb.mxu1 %v3176_v2  ;;  %v3722_v1 = vld [vmem:[#allocation5 + $0x40c] sm:$0xf]  ;;  %v2965_v2 = vld [vmem:[#allocation5 + $0x418] sm:$0xf0] }
 0x106   :  { %v3872_v20 = vld [vmem:[#allocation8 + $0xb8] sm:$0xff] }
 0x107   :  { %2075 = vmatpush.bf16.msrb.mxu2 %v3304_v4  ;;  %2088 = vmatpush.bf16.msrb.mxu3 %v3432_v7  ;;  %v3754_v4 = vld [vmem:[#allocation5 + $0x50c] sm:$0xf] }
 0x108   :  { %v3786_v7 = vld [vmem:[#allocation5 + $0x60c] sm:$0xf] }
 0x109   :  { %2050 = vmatpush.bf16.msrb.mxu0 %v3032_v51  ;;  %2063 = vmatpush.bf16.msrb.mxu1 %v3160_v55  ;;  %v1824_v5 = vpop.f32.mrf.mxu2  ;;  %v1837_v9 = vpop.f32.mrf.mxu3  ;;  %v2968_v51 = vor.u32 %v3722_v1, %v2965_v2  ;;  %v3096_v55 = vor.u32 %v3754_v4, %v3093_v46  ;;  %v3865_v4 = vld [vmem:[#allocation8 + $0x80] sm:$0xff] }
 0x10b   :  { %2076 = vmatpush.bf16.msrb.mxu2 %v3288_v13  ;;  %2089 = vmatpush.bf16.msrb.mxu3 %v3416_v18  ;;  %v3224_v13 = vor.u32 %v3786_v7, %v3221_v8  ;;  %v1810_v18 = vadd.f32 %v4125_v17, %v1797_v47  ;;  %v3854_v17 = vld [vmem:[#allocation8 + $0x28] sm:$0xff] }
 0x10d   :  { %2051 = vmatpush.bf16.msrb.mxu0 %v3016_v24  ;;  %2064 = vmatpush.bf16.msrb.mxu1 %v3144_v25  ;;  %v1823_v21 = vadd.f32 %v4127_v30, %v1810_v18  ;;  %v3853_v24 = vld [vmem:[#allocation8 + $0x20] sm:$0xff] }
 0x10f   :  { %2077 = vmatpush.bf16.msrb.mxu2 %v3272_v26  ;;  %2090 = vmatpush.bf16.msrb.mxu3 %v3400_v31  ;;  %v1836_v22 = vadd.f32 %v4129_v35, %v1823_v21  ;;  %v3870_v31 = vld [vmem:[#allocation8 + $0xa8] sm:$0xff]  ;;  %v3869_v35 = vld [vmem:[#allocation8 + $0xa0] sm:$0xff] }
 0x111   :  { %2052 = vmatpush.bf16.msrb.mxu0 %v3000_v38  ;;  %2065 = vmatpush.bf16.msrb.mxu1 %v3128_v40  ;;  %v3868_v40 = vld [vmem:[#allocation8 + $0x98] sm:$0xff] }
 0x113   :  { %2078 = vmatpush.bf16.msrb.mxu2 %v3256_v41  ;;  %2091 = vmatpush.bf16.msrb.mxu3 %v3384_v49  ;;  %v3858_v41 = vld [vmem:[#allocation8 + $0x48] sm:$0xff]  ;;  %v2099_v49 = vmax.f32 %v4117_v3, 0.0  ;;  %v397_v3 = vperm.slane %v4110_v56, 2 }
 0x115   :  { %2053 = vmatpush.bf16.msrb.mxu0 %v2984_v62  ;;  %2066 = vmatpush.bf16.msrb.mxu1 %v3112_v63  ;;  %v2103_v53 = vpack.c.bf16 %v2099_v49, %v2099_v49 }
 0x117   :  { %2079 = vmatpush.bf16.msrb.mxu2 %v3240_v0  ;;  %2092 = vmatpush.bf16.msrb.mxu3 %v3368_v6  ;;  %v3866_v0 = vld [vmem:[#allocation8 + $0x88] sm:$0xff] }
 0x119   :  { %2054 = vmatpush.bf16.msrb.mxu0 %v2968_v51  ;;  %2067 = vmatpush.bf16.msrb.mxu1 %v3096_v55  ;;  %v1848_v25 = vpop.f32.mrf.mxu0  ;;  %v1861_v27 = vpop.f32.mrf.mxu1 }
 0x11a   :  { %v1849_v26 = vadd.f32 %v1848_v25, %v1836_v22  ;;  %v3876_v25 = vld [vmem:[#allocation8 + $0xd8] sm:$0xff] }
 0x11b   :  { %2080 = vmatpush.bf16.msrb.mxu2 %v3224_v13  ;;  %2093 = vmatpush.bf16.msrb.mxu3 %v3352_v14 }
 0x11c   :  { %2055 = vmatmul.bf16.vlgmr.msrb.gmra.mxu0 %v4088_v54  ;;  %2068 = vmatmul.bf16.vlgmr.msrb.gmra.mxu1 %v4092_v59  ;;  %v3861_v54 = vld [vmem:[#allocation8 + $0x60] sm:$0xff]  ;;  %v1862_v59 = vadd.f32 %v1861_v27, %v1849_v26 }
 0x11d   :  { %2367 = vmatpush.bf16.msra.mxu0 %v3856_v15  ;;  %2380 = vmatpush.bf16.msra.mxu1 %v3864_v16  ;;  %v3880_v15 = vld [vmem:[#allocation8 + $0xf8] sm:$0xff] }
 0x11e   :  { %2081 = vmatmul.bf16.vlgmr.msrb.gmra.mxu2 %v4086_v44  ;;  %2094 = vmatmul.bf16.vlgmr.msrb.gmra.mxu3 %v4090_v58  ;;  %v3852_v44 = vld [vmem:[#allocation8 + $0x18] sm:$0xff] }
 0x11f   :  { %2393 = vmatpush.bf16.msra.mxu2 %v3872_v20  ;;  %v3860_v58 = vld [vmem:[#allocation8 + $0x58] sm:$0xff]  ;;  %2406 = vmatpush.bf16.msra.mxu3 %v3880_v15 }
 0x121   :  { %2368 = vmatpush.bf16.msra.mxu0 %v3855_v19  ;;  %2381 = vmatpush.bf16.msra.mxu1 %v3863_v12  ;;  %v1874_v29 = vpop.f32.mrf.mxu2  ;;  %v1887_v30 = vpop.f32.mrf.mxu3  ;;  %v3879_v19 = vld [vmem:[#allocation8 + $0xf0] sm:$0xff] }
 0x122   :  { %v1875_v33 = vadd.f32 %v1874_v29, %v1862_v59  ;;  %v1850_v34 = vpop.f32.mrf.mxu0  ;;  %v1863_v37 = vpop.f32.mrf.mxu1  ;;  %v3873_v29 = vld [vmem:[#allocation8 + $0xc0] sm:$0xff] }
 0x123   :  { %2394 = vmatpush.bf16.msra.mxu2 %v3871_v28  ;;  %2407 = vmatpush.bf16.msra.mxu3 %v3879_v19  ;;  %v3874_v28 = vld [vmem:[#allocation8 + $0xc8] sm:$0xff] }
 0x124   :  { %v1888_v38 = vadd.f32 %v1887_v30, %v1875_v33 }
 0x125   :  { %2369 = vmatpush.bf16.msra.mxu0 %v3854_v17  ;;  %2382 = vmatpush.bf16.msra.mxu1 %v3862_v23  ;;  %v3878_v17 = vld [vmem:[#allocation8 + $0xe8] sm:$0xff] }
 0x126   :  { %v2100_v45 = vmax.f32 %v1888_v38, 0.0 }
 0x127   :  { %2395 = vmatpush.bf16.msra.mxu2 %v3870_v31  ;;  %2408 = vmatpush.bf16.msra.mxu3 %v3878_v17  ;;  %v398_v31 = vperm.slane %v4110_v56, 3 }
 0x128   :  { %v2104_v52 = vpack.c.bf16 %v2100_v45, %v2100_v45 }
 0x129   :  { %2370 = vmatpush.bf16.msra.mxu0 %v3853_v24  ;;  %2383 = vmatpush.bf16.msra.mxu1 %v3861_v54  ;;  %v1876_v42 = vpop.f32.mrf.mxu2  ;;  %v1889_v43 = vpop.f32.mrf.mxu3  ;;  %v3877_v24 = vld [vmem:[#allocation8 + $0xe0] sm:$0xff]  ;;  %v3875_v54 = vld [vmem:[#allocation8 + $0xd0] sm:$0xff] }
 0x12b   :  { %2396 = vmatpush.bf16.msra.mxu2 %v3869_v35  ;;  %2409 = vmatpush.bf16.msra.mxu3 %v3877_v24 }
 0x12d   :  { %2371 = vmatpush.bf16.msra.mxu0 %v3852_v44  ;;  %2384 = vmatpush.bf16.msra.mxu1 %v3860_v58 }
 0x12f   :  { %2397 = vmatpush.bf16.msra.mxu2 %v3868_v40  ;;  %2410 = vmatpush.bf16.msra.mxu3 %v3876_v25 }
 0x131   :  { %2372 = vmatpush.bf16.msra.mxu0 %v3851_v32  ;;  %2385 = vmatpush.bf16.msra.mxu1 %v3859_v36 }
 0x133   :  { %2398 = vmatpush.bf16.msra.mxu2 %v3867_v61  ;;  %2411 = vmatpush.bf16.msra.mxu3 %v3875_v54 }
 0x135   :  { %2373 = vmatpush.bf16.msra.mxu0 %v3850_v39  ;;  %2386 = vmatpush.bf16.msra.mxu1 %v3858_v41 }
 0x137   :  { %2399 = vmatpush.bf16.msra.mxu2 %v3866_v0  ;;  %2412 = vmatpush.bf16.msra.mxu3 %v3874_v28 }
 0x139   :  { %2374 = vmatpush.bf16.msra.mxu0 %v3849_v48  ;;  %2387 = vmatpush.bf16.msra.mxu1 %v3857_v50  ;;  %v1900_v57 = vpop.f32.mrf.mxu0  ;;  %v1913_v60 = vpop.f32.mrf.mxu1 }
 0x13a   :  { %v1901_v46 = vadd.f32 %v1900_v57, %v397_v3 }
 0x13b   :  { %2400 = vmatpush.bf16.msra.mxu2 %v3865_v4  ;;  %2413 = vmatpush.bf16.msra.mxu3 %v3873_v29 }
 0x13c   :  { %2375 = vmatmul.bf16.vlgmr.msra.gmra.mxu0 %v2103_v53  ;;  %2388 = vmatmul.bf16.vlgmr.msra.gmra.mxu1 %v2104_v52  ;;  %v1914_v7 = vadd.f32 %v1913_v60, %v1901_v46  ;;  %v3892_v60 = vld [vmem:[%s4153_s4] ss:$0 sm:$0xff] }
 0x141   :  { %v1926_v62 = vpop.f32.mrf.mxu2  ;;  %v1939_v63 = vpop.f32.mrf.mxu3 }
 0x142   :  { %v1902_v1 = vpop.f32.mrf.mxu0  ;;  %v1915_v2 = vpop.f32.mrf.mxu1  ;;  %v1927_v8 = vadd.f32 %v1926_v62, %v1914_v7 }
 0x144   :  { %v1940_v9 = vadd.f32 %v1939_v63, %v1927_v8 }
 0x149   :  { %v1928_v5 = vpop.f32.mrf.mxu2  ;;  %v1941_v6 = vpop.f32.mrf.mxu3 }
 0x159   :  { %v1952_v10 = vpop.f32.mrf.mxu0  ;;  %v1965_v47 = vpop.f32.mrf.mxu1 }
 0x15a   :  { %v1953_v11 = vadd.f32 %v1952_v10, %v1940_v9 }
 0x15c   :  { %v1966_v51 = vadd.f32 %v1965_v47, %v1953_v11 }
 0x161   :  { %v1978_v55 = vpop.f32.mrf.mxu2  ;;  %v1991_v14 = vpop.f32.mrf.mxu3 }
 0x162   :  { %v1979_v13 = vadd.f32 %v1978_v55, %v1966_v51  ;;  %v1954_v18 = vpop.f32.mrf.mxu0  ;;  %v1967_v20 = vpop.f32.mrf.mxu1 }
 0x164   :  { %v1992_v16 = vadd.f32 %v1991_v14, %v1979_v13 }
 0x166   :  { %v2101_v12 = vmax.f32 %v1992_v16, 0.0 }
 0x168   :  { %v2105_v21 = vpack.c.bf16 %v2101_v12, %v2101_v12 }
 0x169   :  { %v1980_v22 = vpop.f32.mrf.mxu2  ;;  %v1993_v23 = vpop.f32.mrf.mxu3 }
 0x16a   :  { %2401 = vmatmul.bf16.vlgmr.msra.gmra.mxu2 %v2105_v21 }
 0x179   :  { %v2004_v26 = vpop.f32.mrf.mxu0  ;;  %v2017_v27 = vpop.f32.mrf.mxu1 }
 0x17a   :  { %v2005_v34 = vadd.f32 %v2004_v26, %v398_v31 }
 0x17c   :  { %v2018_v35 = vadd.f32 %v2017_v27, %v2005_v34 }
 0x181   :  { %v2030_v44 = vpop.f32.mrf.mxu2  ;;  %v2043_v59 = vpop.f32.mrf.mxu3 }
 0x182   :  { %v2006_v58 = vpop.f32.mrf.mxu0  ;;  %v2019_v30 = vpop.f32.mrf.mxu1  ;;  %v2031_v36 = vadd.f32 %v2030_v44, %v2018_v35 }
 0x184   :  { %v2044_v37 = vadd.f32 %v2043_v59, %v2031_v36 }
 0x189   :  { %v2032_v32 = vpop.f32.mrf.mxu2  ;;  %v2045_v33 = vpop.f32.mrf.mxu3 }
 0x199   :  { %v2056_v38 = vpop.f32.mrf.mxu0  ;;  %v2069_v39 = vpop.f32.mrf.mxu1 }
 0x19a   :  { %v2057_v40 = vadd.f32 %v2056_v38, %v2044_v37 }
 0x19c   :  { %v2070_v41 = vadd.f32 %v2069_v39, %v2057_v40 }
 0x1a1   :  { %v2082_v42 = vpop.f32.mrf.mxu2  ;;  %v2095_v45 = vpop.f32.mrf.mxu3 }
 0x1a2   :  { %v2083_v43 = vadd.f32 %v2082_v42, %v2070_v41  ;;  %v2058_v48 = vpop.f32.mrf.mxu0  ;;  %v2071_v49 = vpop.f32.mrf.mxu1 }
 0x1a4   :  { %v2096_v50 = vadd.f32 %v2095_v45, %v2083_v43 }
 0x1a6   :  { %v2102_v52 = vmax.f32 %v2096_v50, 0.0 }
 0x1a8   :  { %v2106_v53 = vpack.c.bf16 %v2102_v52, %v2102_v52 }
 0x1a9   :  { %v2084_v57 = vpop.f32.mrf.mxu2  ;;  %v2097_v56 = vpop.f32.mrf.mxu3 }
 0x1aa   :  { %2414 = vmatmul.bf16.vlgmr.msra.gmra.mxu3 %v2106_v53 }
 0x1b9   :  { %v2376_v61 = vpop.f32.mrf.mxu0  ;;  %v2389_v63 = vpop.f32.mrf.mxu1 }
 0x1ba   :  { %v2377_v62 = vadd.f32 %v3892_v60, %v2376_v61 }
 0x1bc   :  { %v2390_v0 = vadd.f32 %v2389_v63, %v2377_v62 }
 0x1c1   :  { %v2378_v1 = vpop.f32.mrf.mxu0  ;;  %v2391_v2 = vpop.f32.mrf.mxu1 }
 0x1ed   :  { %v2402_v4 = vpop.f32.mrf.mxu2 }
 0x1ee   :  { %v2403_v5 = vadd.f32 %v2402_v4, %v2390_v0 }
 0x1f5   :  { %v2404_v3 = vpop.f32.mrf.mxu2 }
 0x22d   :  { %v2415_v6 = vpop.f32.mrf.mxu3 }
 0x22e   :  { %v2416_v46 = vadd.f32 %v2415_v6, %v2403_v5 }
 0x230   :  { %2419 = vst [vmem:[#allocation10] sm:$0xff] %v2416_v46 }
 0x235   :  { %v2417_v7 = vpop.f32.mrf.mxu3 }
 0x236   :  { %2423 = vsyncadd [#allocation4], 96  ;;  %s2426_s17 = sshll.u32 %s4154_s5, 4  ;;  %s4029_s18 = smov [#allocation10]   ;;  %s2427_s17 = int_to_ptr.hbm [resolvable:$true] %s2426_s17 }
 0x237   :  { %s2424_s4 = sshll.u32 %s4029_s18, 4  ;;  %s4030_s19 = smov 32   ;;  %s2425_s4 = int_to_ptr.vmem [resolvable:$true] %s2424_s4 }
 0x238   :  { %s4031_s20 = smov 2  }
 0x239   :  { %2432 = dma.vmem_to_hbm [thread:$0]  %s2425_s4, 32, %s2427_s17, [#allocation4], %s4030_s19, %s4030_s19, %s4031_s20  }
 0x23a   :  { %4019 = dma.done.wait [#allocation4], 128  }
 0x23b   :  { %4020 = vsyncadd [#allocation4], 4294967168 }
 0x23c   :  { %2437 = vsyncpa [#allocation3], 1 }
 0x23d   :  { %2438 = vsyncpa [#allocation6], 1 }
 0x23e   :  { %2439 = vsyncpa [#allocation9], 1 }
 0x23f   :  { %2440 = vsyncpa [#allocation4], 1 }

</bundles_post_ra>
